<compile_context>
chip_gen: v7x
topology: tpu7x:2x2x1
jax: 0.10.0
libtpu: 0.0.40
codegen_flags: <defaults>
</compile_context>

<pallas_src>
import functools

import jax
import jax.numpy as jnp
from jax import lax
from jax.experimental import pallas as pl
from jax.experimental.pallas import tpu as pltpu

LN_EPS = 1e-5  # torch.nn.LayerNorm default

_SUPPORTED_ACTIVATIONS = ("relu", "tanh", "sigmoid", "softplus")


def _apply_activation(x, activation):
    if activation == "relu":
        return jnp.maximum(x, 0.0)
    elif activation == "tanh":
        return jnp.tanh(x)
    elif activation == "sigmoid":
        return jax.nn.sigmoid(x)
    elif activation == "softplus":
        return jax.nn.softplus(x)
    # Mirrors the torch module, which would raise when calling None(x).
    raise ValueError(f"unsupported activation: {activation!r}")


def _layernorm(y, gamma, beta):
    # Centered two-pass statistics (matches torch.nn.LayerNorm; avoids the
    # catastrophic-cancellation issue of the E[y^2] - mu^2 form).
    mu = jnp.mean(y, axis=-1, keepdims=True)
    yc = y - mu
    var = jnp.mean(yc * yc, axis=-1, keepdims=True)
    return yc * lax.rsqrt(var + LN_EPS) * gamma + beta


def integrator_block_kernel(
    x_ref, hx0_ref,
    w_h2h_ref, g_h2h_ref, b_h2h_ref,
    w_x2h_ref, g_x2h_ref, b_x2h_ref,
    out_ref,
    hx_scr,
    *, activation, time_block,
):
    tb = pl.program_id(0)

    # Load the initial hidden state into the persistent VMEM scratch once.
    @pl.when(tb == 0)
    def _():
        hx_scr[...] = hx0_ref[...].astype(jnp.float32)

    # Hoist resident loads (weights / LN params) out of the unrolled time
    # loop -- JAX does not CSE broadcast_in_dim, so re-reading the (1, F)
    # refs per step would pay Tb redundant sublane broadcasts.
    w_h2h = w_h2h_ref[...]
    w_x2h = w_x2h_ref[...]
    g_h2h = g_h2h_ref[...]
    b_h2h = b_h2h_ref[...]
    g_x2h = g_x2h_ref[...]
    b_x2h = b_x2h_ref[...]

    n = out_ref.shape[-1]

    def step(i, hx):
        x = x_ref[i].astype(jnp.float32)

        # ---- h2h: Linear(N -> 2N, no bias) + LayerNorm(2N) -----------------
        # bf16 operands into the MXU, f32 accumulation.
        y = jnp.dot(hx.astype(w_h2h.dtype), w_h2h,
                    preferred_element_type=jnp.float32)
        y = _layernorm(y, g_h2h, b_h2h)
        h_i = y[:, :n]   # tile-aligned when N is a multiple of 128
        h_g = y[:, n:]

        # ---- x = activation(x + h_i) ---------------------------------------
        xa = _apply_activation(x + h_i, activation)

        # ---- x2h: Linear(N -> N, no bias) + LayerNorm(N) --------------------
        z = jnp.dot(xa.astype(w_x2h.dtype), w_x2h,
                    preferred_element_type=jnp.float32)
        z = _layernorm(z, g_x2h, b_x2h)

        # ---- gate & convex blend (all f32) -----------------------------------
        g = jax.nn.sigmoid(z + h_g)
        h = (1.0 - g) * hx + g * xa

        out_ref[i] = h.astype(out_ref.dtype)
        return h

    hx_final = lax.fori_loop(0, time_block, step, hx_scr[...], unroll=True)
    hx_scr[...] = hx_final


def _pick_time_block(T, requested):
    tb = max(1, min(int(requested), int(T)))
    while T % tb:
        tb -= 1
    return tb


def _resident_spec(shape, buffer_count):
    # Constant index_map -> block stays resident in VMEM across all steps.
    index_map = lambda t, _r=len(shape): (0,) * _r
    if buffer_count is None:
        return pl.BlockSpec(shape, index_map)
    return pl.BlockSpec(shape, index_map,
                        pipeline_mode=pl.Buffered(buffer_count))


def integrator_scan(x_seq, hx, params, activation, *, time_block=8):
    """Run the Integrator cell over a sequence in ONE pallas_call.

    x_seq: (T, B, N) inputs, hx: (B, N) initial hidden state.
    Returns (T, B, N) hidden states (out[-1] is the final state).
    Note: per-step outputs are stored in x_seq.dtype.
    """
    if activation not in _SUPPORTED_ACTIVATIONS:
        raise ValueError(f"unsupported activation: {activation!r}")
    T, B, N = x_seq.shape
    tb = _pick_time_block(T, time_block)
    kernel = functools.partial(
        integrator_block_kernel, activation=activation, time_block=tb)

    def _call(resident_buffer_count):
        grid_spec = pltpu.PrefetchScalarGridSpec(
            num_scalar_prefetch=0,
            grid=(T // tb,),
            in_specs=[
                # Tb timesteps of x streamed per grid step.
                pl.BlockSpec((tb, B, N), lambda t: (t, 0, 0)),
                _resident_spec((B, N), resident_buffer_count),       # hx0
                _resident_spec((N, 2 * N), resident_buffer_count),   # w_h2h
                _resident_spec((1, 2 * N), resident_buffer_count),   # gamma_h2h
                _resident_spec((1, 2 * N), resident_buffer_count),   # beta_h2h
                _resident_spec((N, N), resident_buffer_count),       # w_x2h
                _resident_spec((1, N), resident_buffer_count),       # gamma_x2h
                _resident_spec((1, N), resident_buffer_count),       # beta_x2h
            ],
            out_specs=pl.BlockSpec((tb, B, N), lambda t: (t, 0, 0)),
            scratch_shapes=[pltpu.VMEM((B, N), jnp.float32)],   # hidden state
        )
        return pl.pallas_call(
            kernel,
            out_shape=jax.ShapeDtypeStruct((T, B, N), x_seq.dtype),
            grid_spec=grid_spec,
            compiler_params=pltpu.CompilerParams(
                # Recurrence over time: must be serial.  (For large B, add a
                # leading "parallel" batch-block axis to use both v7x TCs.)
                dimension_semantics=("arbitrary",)),
        )(
            x_seq, hx,
            params["w_h2h"], params["g_h2h"], params["b_h2h"],
            params["w_x2h"], params["g_x2h"], params["b_x2h"],
        )

    try:
        # Single-buffered resident operands: they are DMA'd exactly once, so
        # the default second pipeline buffer is pure VMEM waste.
        return _call(1)
    except Exception:
        # Graceful fallback if this JAX build rejects Buffered(1).
        return _call(None)


def integrator_forward(x, hx, params, activation):
    """Single-step forward (matches Integrator.forward(x, hx))."""
    return integrator_scan(x[jnp.newaxis], hx, params, activation,
                           time_block=1)[0]


def init_integrator_params(key, out_neurons, Tmax):
    """Deterministic synthetic init mirroring Integrator.__init__/_reset_parameters.

    Linear weights use the torch-default bounded uniform and are stored
    pre-transposed as (in_features, out_features) in bf16 (MXU operand dtype);
    LayerNorm gammas = 0.1; x2h LN bias = -log(U(1, Tmax-1)); h2h LN bias = 0.
    """
    k1, k2, k3 = jax.random.split(key, 3)
    n = out_neurons
    bound = 1.0 / jnp.sqrt(n)
    w_x2h = jax.random.uniform(k1, (n, n), jnp.float32, -bound, bound).T
    w_h2h = jax.random.uniform(k2, (2 * n, n), jnp.float32, -bound, bound).T
    g_x2h = jnp.full((1, n), 0.1, jnp.float32)
    b_x2h = -jnp.log(
        jax.random.uniform(k3, (1, n), jnp.float32, 1.0, float(Tmax - 1)))
    g_h2h = jnp.full((1, 2 * n), 0.1, jnp.float32)
    b_h2h = jnp.zeros((1, 2 * n), jnp.float32)
    return dict(
        w_x2h=w_x2h.astype(jnp.bfloat16), g_x2h=g_x2h, b_x2h=b_x2h,
        w_h2h=w_h2h.astype(jnp.bfloat16), g_h2h=g_h2h, b_h2h=b_h2h,
    )


def integrator_step_reference(x, hx, params, activation):
    """Pure-JAX reference for one step (mirrors the PyTorch forward, with the
    same bf16-operand / f32-accumulate matmul convention as the kernel)."""
    n = x.shape[-1]

    def mm(a, w):
        return jnp.dot(a.astype(w.dtype), w, preferred_element_type=jnp.float32)

    def ln(y, gamma, beta):
        mu = jnp.mean(y, axis=-1, keepdims=True)
        var = jnp.mean(jnp.square(y - mu), axis=-1, keepdims=True)
        return (y - mu) * lax.rsqrt(var + LN_EPS) * gamma + beta

    y = ln(mm(hx, params["w_h2h"]), params["g_h2h"], params["b_h2h"])
    h_i, h_g = y[:, :n], y[:, n:]
    xa = _apply_activation(x + h_i, activation)
    z = ln(mm(xa, params["w_x2h"]), params["g_x2h"], params["b_x2h"])
    g = jax.nn.sigmoid(z + h_g)
    return (1.0 - g) * hx + g * xa


def integrator_scan_reference(x_seq, hx, params, activation):
    outs = []
    for t in range(x_seq.shape[0]):
        hx = integrator_step_reference(x_seq[t], hx, params, activation)
        outs.append(hx)
    return jnp.stack(outs, axis=0)


if __name__ == "__main__":
    out_neurons = 128   # lane-dense: multiple of 128 -> unmasked stores,
                        # tile-aligned h_i/h_g split
    Tmax = 10
    activation = "relu"
    batch = 8           # sublane-full; scale to >=128 to fill the MXU M dim
    T = 16              # total recurrence length
    time_block = 8      # Tb timesteps per grid step (grid = (2,))

    key = jax.random.PRNGKey(0)
    kp, kx, kh = jax.random.split(key, 3)
    params = init_integrator_params(kp, out_neurons, Tmax)
    x_seq = jax.random.normal(kx, (T, batch, out_neurons), jnp.float32)
    hx = jax.random.normal(kh, (batch, out_neurons), jnp.float32)

    # Fused T-step recurrence in a single pallas_call (Tb steps per grid step).
    h_seq = jax.block_until_ready(
        integrator_scan(x_seq, hx, params, activation, time_block=time_block))
    h_seq_ref = integrator_scan_reference(x_seq, hx, params, activation)
    assert h_seq.shape == (T, batch, out_neurons)
    assert jnp.allclose(h_seq, h_seq_ref, atol=2e-3, rtol=2e-3), \
        "fused-scan mismatch vs reference"

    # Single-step forward (exact Integrator.forward semantics).
    h1 = jax.block_until_ready(
        integrator_forward(x_seq[0], hx, params, activation))
    h1_ref = integrator_step_reference(x_seq[0], hx, params, activation)
    assert h1.shape == (batch, out_neurons)
    assert jnp.allclose(h1, h1_ref, atol=2e-3, rtol=2e-3), \
        "single-step mismatch vs reference"

    print("KERNEL_OK")
</pallas_src>

<mosaic_0001>
module attributes {stable_mosaic.version = 11 : i64} {
  func.func @integrator_block_kernel(%arg0: i32, %arg1: memref<8x8x128xf32, #tpu.memory_space<vmem>>, %arg2: memref<8x128xf32, #tpu.memory_space<vmem>>, %arg3: memref<128x256xbf16, #tpu.memory_space<vmem>>, %arg4: memref<1x256xf32, #tpu.memory_space<vmem>>, %arg5: memref<1x256xf32, #tpu.memory_space<vmem>>, %arg6: memref<128x128xbf16, #tpu.memory_space<vmem>>, %arg7: memref<1x128xf32, #tpu.memory_space<vmem>>, %arg8: memref<1x128xf32, #tpu.memory_space<vmem>>, %arg9: memref<8x8x128xf32, #tpu.memory_space<vmem>>, %arg10: memref<8x128xf32, #tpu.memory_space<vmem>>) attributes {dimension_semantics = [#tpu.dimension_semantics<arbitrary>], iteration_bounds = array<i64: 2>, scalar_prefetch = 0 : i64, scratch_operands = 1 : i64, tpu.core_type = #tpu.core_type<tc>, window_params = [{transform_indices = @transform_0, window_bounds = array<i64: 8, 8, 128>}, {pipeline_mode = #tpu.pipeline_mode<synchronous>, transform_indices = @transform_1, window_bounds = array<i64: 8, 128>}, {pipeline_mode = #tpu.pipeline_mode<synchronous>, transform_indices = @transform_2, window_bounds = array<i64: 128, 256>}, {pipeline_mode = #tpu.pipeline_mode<synchronous>, transform_indices = @transform_3, window_bounds = array<i64: 1, 256>}, {pipeline_mode = #tpu.pipeline_mode<synchronous>, transform_indices = @transform_4, window_bounds = array<i64: 1, 256>}, {pipeline_mode = #tpu.pipeline_mode<synchronous>, transform_indices = @transform_5, window_bounds = array<i64: 128, 128>}, {pipeline_mode = #tpu.pipeline_mode<synchronous>, transform_indices = @transform_6, window_bounds = array<i64: 1, 128>}, {pipeline_mode = #tpu.pipeline_mode<synchronous>, transform_indices = @transform_7, window_bounds = array<i64: 1, 128>}, {transform_indices = @transform_8, window_bounds = array<i64: 8, 8, 128>}]} {
    %c0_i32 = arith.constant 0 : i32
    %0 = arith.cmpi eq, %arg0, %c0_i32 : i32
    %1 = arith.extui %0 : i1 to i32
    %c0_i32_0 = arith.constant 0 : i32
    %2 = arith.cmpi ne, %1, %c0_i32_0 : i32
    scf.if %2 {
      %c0_168 = arith.constant 0 : index
      %c0_169 = arith.constant 0 : index
      %547 = vector.load %arg2[%c0_168, %c0_169] : memref<8x128xf32, #tpu.memory_space<vmem>>, vector<8x128xf32>
      %c0_170 = arith.constant 0 : index
      %c0_171 = arith.constant 0 : index
      %548 = vector.load %arg10[%c0_170, %c0_171] : memref<8x128xf32, #tpu.memory_space<vmem>>, vector<8x128xf32>
      tpu.vector_store %arg10[%c0_170, %c0_171], %547 {strides = array<i32>} : memref<8x128xf32, #tpu.memory_space<vmem>>, vector<8x128xf32>,
    } else {
    }
    %c0 = arith.constant 0 : index
    %c0_1 = arith.constant 0 : index
    %3 = vector.load %arg3[%c0, %c0_1] : memref<128x256xbf16, #tpu.memory_space<vmem>>, vector<128x256xbf16>
    %c0_2 = arith.constant 0 : index
    %c0_3 = arith.constant 0 : index
    %4 = vector.load %arg6[%c0_2, %c0_3] : memref<128x128xbf16, #tpu.memory_space<vmem>>, vector<128x128xbf16>
    %c0_4 = arith.constant 0 : index
    %c0_5 = arith.constant 0 : index
    %5 = vector.load %arg4[%c0_4, %c0_5] : memref<1x256xf32, #tpu.memory_space<vmem>>, vector<1x256xf32>
    %c0_6 = arith.constant 0 : index
    %c0_7 = arith.constant 0 : index
    %6 = vector.load %arg5[%c0_6, %c0_7] : memref<1x256xf32, #tpu.memory_space<vmem>>, vector<1x256xf32>
    %c0_8 = arith.constant 0 : index
    %c0_9 = arith.constant 0 : index
    %7 = vector.load %arg7[%c0_8, %c0_9] : memref<1x128xf32, #tpu.memory_space<vmem>>, vector<1x128xf32>
    %c0_10 = arith.constant 0 : index
    %c0_11 = arith.constant 0 : index
    %8 = vector.load %arg8[%c0_10, %c0_11] : memref<1x128xf32, #tpu.memory_space<vmem>>, vector<1x128xf32>
    %c0_12 = arith.constant 0 : index
    %c0_13 = arith.constant 0 : index
    %9 = vector.load %arg10[%c0_12, %c0_13] : memref<8x128xf32, #tpu.memory_space<vmem>>, vector<8x128xf32>
    %c0_i32_14 = arith.constant 0 : i32
    %10 = arith.index_cast %c0_i32_14 : i32 to index
    %c0_15 = arith.constant 0 : index
    %c0_16 = arith.constant 0 : index
    %11 = vector.load %arg1[%10, %c0_15, %c0_16] : memref<8x8x128xf32, #tpu.memory_space<vmem>>, vector<1x8x128xf32>
    %12 = vector.shape_cast %11 : vector<1x8x128xf32> to vector<8x128xf32>
    %13 = arith.truncf %9 : vector<8x128xf32> to vector<8x128xbf16>
    %cst = arith.constant dense<0.000000e+00> : vector<8x256xf32>
    %14 = tpu.matmul %13, %3, %cst {dimension_numbers = #tpu.dot_dimension_numbers<[1], [0], [0], [1], [0, 0, 1, 1], [], []>} : vector<8x128xbf16>, vector<128x256xbf16>, vector<8x256xf32> -> vector<8x256xf32>
    %cst_17 = arith.constant dense<0.000000e+00> : vector<8xf32>
    %15 = vector.multi_reduction <add>, %14, %cst_17 [1] : vector<8x256xf32> to vector<8xf32>
    %16 = vector.shape_cast %15 : vector<8xf32> to vector<8x1xf32>
    %cst_18 = arith.constant 2.560000e+02 : f32
    %17 = vector.broadcast %cst_18 : f32 to vector<8x1xf32>
    %18 = arith.divf %16, %17 : vector<8x1xf32>
    %19 = vector.broadcast %18 : vector<8x1xf32> to vector<8x256xf32>
    %20 = arith.subf %14, %19 : vector<8x256xf32>
    %21 = arith.mulf %20, %20 : vector<8x256xf32>
    %cst_19 = arith.constant dense<0.000000e+00> : vector<8xf32>
    %22 = vector.multi_reduction <add>, %21, %cst_19 [1] : vector<8x256xf32> to vector<8xf32>
    %23 = vector.shape_cast %22 : vector<8xf32> to vector<8x1xf32>
    %cst_20 = arith.constant 2.560000e+02 : f32
    %24 = vector.broadcast %cst_20 : f32 to vector<8x1xf32>
    %25 = arith.divf %23, %24 : vector<8x1xf32>
    %cst_21 = arith.constant 9.99999974E-6 : f32
    %26 = vector.broadcast %cst_21 : f32 to vector<8x1xf32>
    %27 = arith.addf %25, %26 : vector<8x1xf32>
    %28 = math.rsqrt %27 : vector<8x1xf32>
    %29 = vector.broadcast %28 : vector<8x1xf32> to vector<8x256xf32>
    %30 = arith.mulf %20, %29 : vector<8x256xf32>
    %31 = vector.broadcast %5 : vector<1x256xf32> to vector<8x256xf32>
    %32 = arith.mulf %30, %31 : vector<8x256xf32>
    %33 = vector.broadcast %6 : vector<1x256xf32> to vector<8x256xf32>
    %34 = arith.addf %32, %33 : vector<8x256xf32>
    %35 = vector.extract_strided_slice %34 {offsets = [0, 0], sizes = [8, 128], strides = [1, 1]} : vector<8x256xf32> to vector<8x128xf32>
    %36 = vector.extract_strided_slice %34 {offsets = [0, 128], sizes = [8, 128], strides = [1, 1]} : vector<8x256xf32> to vector<8x128xf32>
    %37 = arith.addf %12, %35 : vector<8x128xf32>
    %cst_22 = arith.constant 0.000000e+00 : f32
    %38 = vector.broadcast %cst_22 : f32 to vector<8x128xf32>
    %39 = arith.maximumf %37, %38 : vector<8x128xf32>
    %40 = arith.truncf %39 : vector<8x128xf32> to vector<8x128xbf16>
    %cst_23 = arith.constant dense<0.000000e+00> : vector<8x128xf32>
    %41 = tpu.matmul %40, %4, %cst_23 {dimension_numbers = #tpu.dot_dimension_numbers<[1], [0], [0], [1], [0, 0, 1, 1], [], []>} : vector<8x128xbf16>, vector<128x128xbf16>, vector<8x128xf32> -> vector<8x128xf32>
    %cst_24 = arith.constant dense<0.000000e+00> : vector<8xf32>
    %42 = vector.multi_reduction <add>, %41, %cst_24 [1] : vector<8x128xf32> to vector<8xf32>
    %43 = vector.shape_cast %42 : vector<8xf32> to vector<8x1xf32>
    %cst_25 = arith.constant 1.280000e+02 : f32
    %44 = vector.broadcast %cst_25 : f32 to vector<8x1xf32>
    %45 = arith.divf %43, %44 : vector<8x1xf32>
    %46 = vector.broadcast %45 : vector<8x1xf32> to vector<8x128xf32>
    %47 = arith.subf %41, %46 : vector<8x128xf32>
    %48 = arith.mulf %47, %47 : vector<8x128xf32>
    %cst_26 = arith.constant dense<0.000000e+00> : vector<8xf32>
    %49 = vector.multi_reduction <add>, %48, %cst_26 [1] : vector<8x128xf32> to vector<8xf32>
    %50 = vector.shape_cast %49 : vector<8xf32> to vector<8x1xf32>
    %cst_27 = arith.constant 1.280000e+02 : f32
    %51 = vector.broadcast %cst_27 : f32 to vector<8x1xf32>
    %52 = arith.divf %50, %51 : vector<8x1xf32>
    %cst_28 = arith.constant 9.99999974E-6 : f32
    %53 = vector.broadcast %cst_28 : f32 to vector<8x1xf32>
    %54 = arith.addf %52, %53 : vector<8x1xf32>
    %55 = math.rsqrt %54 : vector<8x1xf32>
    %56 = vector.broadcast %55 : vector<8x1xf32> to vector<8x128xf32>
    %57 = arith.mulf %47, %56 : vector<8x128xf32>
    %58 = vector.broadcast %7 : vector<1x128xf32> to vector<8x128xf32>
    %59 = arith.mulf %57, %58 : vector<8x128xf32>
    %60 = vector.broadcast %8 : vector<1x128xf32> to vector<8x128xf32>
    %61 = arith.addf %59, %60 : vector<8x128xf32>
    %62 = arith.addf %61, %36 : vector<8x128xf32>
    %63 = arith.negf %62 : vector<8x128xf32>
    %64 = math.exp %63 : vector<8x128xf32>
    %cst_29 = arith.constant 1.000000e+00 : f32
    %65 = vector.broadcast %cst_29 : f32 to vector<8x128xf32>
    %66 = arith.addf %65, %64 : vector<8x128xf32>
    %67 = arith.divf %65, %66 : vector<8x128xf32>
    %cst_30 = arith.constant 1.000000e+00 : f32
    %68 = vector.broadcast %cst_30 : f32 to vector<8x128xf32>
    %69 = arith.subf %68, %67 : vector<8x128xf32>
    %70 = arith.mulf %69, %9 : vector<8x128xf32>
    %71 = arith.mulf %67, %39 : vector<8x128xf32>
    %72 = arith.addf %70, %71 : vector<8x128xf32>
    %73 = arith.index_cast %c0_i32_14 : i32 to index
    %c0_31 = arith.constant 0 : index
    %c0_32 = arith.constant 0 : index
    %74 = vector.load %arg9[%73, %c0_31, %c0_32] : memref<8x8x128xf32, #tpu.memory_space<vmem>>, vector<1x8x128xf32>
    %75 = vector.shape_cast %74 : vector<1x8x128xf32> to vector<8x128xf32>
    %76 = vector.shape_cast %72 : vector<8x128xf32> to vector<1x8x128xf32>
    tpu.vector_store %arg9[%73, %c0_31, %c0_32], %76 {strides = array<i32>} : memref<8x8x128xf32, #tpu.memory_space<vmem>>, vector<1x8x128xf32>,
    %c1_i32 = arith.constant 1 : i32
    %77 = arith.index_cast %c1_i32 : i32 to index
    %c0_33 = arith.constant 0 : index
    %c0_34 = arith.constant 0 : index
    %78 = vector.load %arg1[%77, %c0_33, %c0_34] : memref<8x8x128xf32, #tpu.memory_space<vmem>>, vector<1x8x128xf32>
    %79 = vector.shape_cast %78 : vector<1x8x128xf32> to vector<8x128xf32>
    %80 = arith.truncf %72 : vector<8x128xf32> to vector<8x128xbf16>
    %cst_35 = arith.constant dense<0.000000e+00> : vector<8x256xf32>
    %81 = tpu.matmul %80, %3, %cst_35 {dimension_numbers = #tpu.dot_dimension_numbers<[1], [0], [0], [1], [0, 0, 1, 1], [], []>} : vector<8x128xbf16>, vector<128x256xbf16>, vector<8x256xf32> -> vector<8x256xf32>
    %cst_36 = arith.constant dense<0.000000e+00> : vector<8xf32>
    %82 = vector.multi_reduction <add>, %81, %cst_36 [1] : vector<8x256xf32> to vector<8xf32>
    %83 = vector.shape_cast %82 : vector<8xf32> to vector<8x1xf32>
    %cst_37 = arith.constant 2.560000e+02 : f32
    %84 = vector.broadcast %cst_37 : f32 to vector<8x1xf32>
    %85 = arith.divf %83, %84 : vector<8x1xf32>
    %86 = vector.broadcast %85 : vector<8x1xf32> to vector<8x256xf32>
    %87 = arith.subf %81, %86 : vector<8x256xf32>
    %88 = arith.mulf %87, %87 : vector<8x256xf32>
    %cst_38 = arith.constant dense<0.000000e+00> : vector<8xf32>
    %89 = vector.multi_reduction <add>, %88, %cst_38 [1] : vector<8x256xf32> to vector<8xf32>
    %90 = vector.shape_cast %89 : vector<8xf32> to vector<8x1xf32>
    %cst_39 = arith.constant 2.560000e+02 : f32
    %91 = vector.broadcast %cst_39 : f32 to vector<8x1xf32>
    %92 = arith.divf %90, %91 : vector<8x1xf32>
    %cst_40 = arith.constant 9.99999974E-6 : f32
    %93 = vector.broadcast %cst_40 : f32 to vector<8x1xf32>
    %94 = arith.addf %92, %93 : vector<8x1xf32>
    %95 = math.rsqrt %94 : vector<8x1xf32>
    %96 = vector.broadcast %95 : vector<8x1xf32> to vector<8x256xf32>
    %97 = arith.mulf %87, %96 : vector<8x256xf32>
    %98 = vector.broadcast %5 : vector<1x256xf32> to vector<8x256xf32>
    %99 = arith.mulf %97, %98 : vector<8x256xf32>
    %100 = vector.broadcast %6 : vector<1x256xf32> to vector<8x256xf32>
    %101 = arith.addf %99, %100 : vector<8x256xf32>
    %102 = vector.extract_strided_slice %101 {offsets = [0, 0], sizes = [8, 128], strides = [1, 1]} : vector<8x256xf32> to vector<8x128xf32>
    %103 = vector.extract_strided_slice %101 {offsets = [0, 128], sizes = [8, 128], strides = [1, 1]} : vector<8x256xf32> to vector<8x128xf32>
    %104 = arith.addf %79, %102 : vector<8x128xf32>
    %cst_41 = arith.constant 0.000000e+00 : f32
    %105 = vector.broadcast %cst_41 : f32 to vector<8x128xf32>
    %106 = arith.maximumf %104, %105 : vector<8x128xf32>
    %107 = arith.truncf %106 : vector<8x128xf32> to vector<8x128xbf16>
    %cst_42 = arith.constant dense<0.000000e+00> : vector<8x128xf32>
    %108 = tpu.matmul %107, %4, %cst_42 {dimension_numbers = #tpu.dot_dimension_numbers<[1], [0], [0], [1], [0, 0, 1, 1], [], []>} : vector<8x128xbf16>, vector<128x128xbf16>, vector<8x128xf32> -> vector<8x128xf32>
    %cst_43 = arith.constant dense<0.000000e+00> : vector<8xf32>
    %109 = vector.multi_reduction <add>, %108, %cst_43 [1] : vector<8x128xf32> to vector<8xf32>
    %110 = vector.shape_cast %109 : vector<8xf32> to vector<8x1xf32>
    %cst_44 = arith.constant 1.280000e+02 : f32
    %111 = vector.broadcast %cst_44 : f32 to vector<8x1xf32>
    %112 = arith.divf %110, %111 : vector<8x1xf32>
    %113 = vector.broadcast %112 : vector<8x1xf32> to vector<8x128xf32>
    %114 = arith.subf %108, %113 : vector<8x128xf32>
    %115 = arith.mulf %114, %114 : vector<8x128xf32>
    %cst_45 = arith.constant dense<0.000000e+00> : vector<8xf32>
    %116 = vector.multi_reduction <add>, %115, %cst_45 [1] : vector<8x128xf32> to vector<8xf32>
    %117 = vector.shape_cast %116 : vector<8xf32> to vector<8x1xf32>
    %cst_46 = arith.constant 1.280000e+02 : f32
    %118 = vector.broadcast %cst_46 : f32 to vector<8x1xf32>
    %119 = arith.divf %117, %118 : vector<8x1xf32>
    %cst_47 = arith.constant 9.99999974E-6 : f32
    %120 = vector.broadcast %cst_47 : f32 to vector<8x1xf32>
    %121 = arith.addf %119, %120 : vector<8x1xf32>
    %122 = math.rsqrt %121 : vector<8x1xf32>
    %123 = vector.broadcast %122 : vector<8x1xf32> to vector<8x128xf32>
    %124 = arith.mulf %114, %123 : vector<8x128xf32>
    %125 = vector.broadcast %7 : vector<1x128xf32> to vector<8x128xf32>
    %126 = arith.mulf %124, %125 : vector<8x128xf32>
    %127 = vector.broadcast %8 : vector<1x128xf32> to vector<8x128xf32>
    %128 = arith.addf %126, %127 : vector<8x128xf32>
    %129 = arith.addf %128, %103 : vector<8x128xf32>
    %130 = arith.negf %129 : vector<8x128xf32>
    %131 = math.exp %130 : vector<8x128xf32>
    %cst_48 = arith.constant 1.000000e+00 : f32
    %132 = vector.broadcast %cst_48 : f32 to vector<8x128xf32>
    %133 = arith.addf %132, %131 : vector<8x128xf32>
    %134 = arith.divf %132, %133 : vector<8x128xf32>
    %cst_49 = arith.constant 1.000000e+00 : f32
    %135 = vector.broadcast %cst_49 : f32 to vector<8x128xf32>
    %136 = arith.subf %135, %134 : vector<8x128xf32>
    %137 = arith.mulf %136, %72 : vector<8x128xf32>
    %138 = arith.mulf %134, %106 : vector<8x128xf32>
    %139 = arith.addf %137, %138 : vector<8x128xf32>
    %140 = arith.index_cast %c1_i32 : i32 to index
    %c0_50 = arith.constant 0 : index
    %c0_51 = arith.constant 0 : index
    %141 = vector.load %arg9[%140, %c0_50, %c0_51] : memref<8x8x128xf32, #tpu.memory_space<vmem>>, vector<1x8x128xf32>
    %142 = vector.shape_cast %141 : vector<1x8x128xf32> to vector<8x128xf32>
    %143 = vector.shape_cast %139 : vector<8x128xf32> to vector<1x8x128xf32>
    tpu.vector_store %arg9[%140, %c0_50, %c0_51], %143 {strides = array<i32>} : memref<8x8x128xf32, #tpu.memory_space<vmem>>, vector<1x8x128xf32>,
    %c2_i32 = arith.constant 2 : i32
    %144 = arith.index_cast %c2_i32 : i32 to index
    %c0_52 = arith.constant 0 : index
    %c0_53 = arith.constant 0 : index
    %145 = vector.load %arg1[%144, %c0_52, %c0_53] : memref<8x8x128xf32, #tpu.memory_space<vmem>>, vector<1x8x128xf32>
    %146 = vector.shape_cast %145 : vector<1x8x128xf32> to vector<8x128xf32>
    %147 = arith.truncf %139 : vector<8x128xf32> to vector<8x128xbf16>
    %cst_54 = arith.constant dense<0.000000e+00> : vector<8x256xf32>
    %148 = tpu.matmul %147, %3, %cst_54 {dimension_numbers = #tpu.dot_dimension_numbers<[1], [0], [0], [1], [0, 0, 1, 1], [], []>} : vector<8x128xbf16>, vector<128x256xbf16>, vector<8x256xf32> -> vector<8x256xf32>
    %cst_55 = arith.constant dense<0.000000e+00> : vector<8xf32>
    %149 = vector.multi_reduction <add>, %148, %cst_55 [1] : vector<8x256xf32> to vector<8xf32>
    %150 = vector.shape_cast %149 : vector<8xf32> to vector<8x1xf32>
    %cst_56 = arith.constant 2.560000e+02 : f32
    %151 = vector.broadcast %cst_56 : f32 to vector<8x1xf32>
    %152 = arith.divf %150, %151 : vector<8x1xf32>
    %153 = vector.broadcast %152 : vector<8x1xf32> to vector<8x256xf32>
    %154 = arith.subf %148, %153 : vector<8x256xf32>
    %155 = arith.mulf %154, %154 : vector<8x256xf32>
    %cst_57 = arith.constant dense<0.000000e+00> : vector<8xf32>
    %156 = vector.multi_reduction <add>, %155, %cst_57 [1] : vector<8x256xf32> to vector<8xf32>
    %157 = vector.shape_cast %156 : vector<8xf32> to vector<8x1xf32>
    %cst_58 = arith.constant 2.560000e+02 : f32
    %158 = vector.broadcast %cst_58 : f32 to vector<8x1xf32>
    %159 = arith.divf %157, %158 : vector<8x1xf32>
    %cst_59 = arith.constant 9.99999974E-6 : f32
    %160 = vector.broadcast %cst_59 : f32 to vector<8x1xf32>
    %161 = arith.addf %159, %160 : vector<8x1xf32>
    %162 = math.rsqrt %161 : vector<8x1xf32>
    %163 = vector.broadcast %162 : vector<8x1xf32> to vector<8x256xf32>
    %164 = arith.mulf %154, %163 : vector<8x256xf32>
    %165 = vector.broadcast %5 : vector<1x256xf32> to vector<8x256xf32>
    %166 = arith.mulf %164, %165 : vector<8x256xf32>
    %167 = vector.broadcast %6 : vector<1x256xf32> to vector<8x256xf32>
    %168 = arith.addf %166, %167 : vector<8x256xf32>
    %169 = vector.extract_strided_slice %168 {offsets = [0, 0], sizes = [8, 128], strides = [1, 1]} : vector<8x256xf32> to vector<8x128xf32>
    %170 = vector.extract_strided_slice %168 {offsets = [0, 128], sizes = [8, 128], strides = [1, 1]} : vector<8x256xf32> to vector<8x128xf32>
    %171 = arith.addf %146, %169 : vector<8x128xf32>
    %cst_60 = arith.constant 0.000000e+00 : f32
    %172 = vector.broadcast %cst_60 : f32 to vector<8x128xf32>
    %173 = arith.maximumf %171, %172 : vector<8x128xf32>
    %174 = arith.truncf %173 : vector<8x128xf32> to vector<8x128xbf16>
    %cst_61 = arith.constant dense<0.000000e+00> : vector<8x128xf32>
    %175 = tpu.matmul %174, %4, %cst_61 {dimension_numbers = #tpu.dot_dimension_numbers<[1], [0], [0], [1], [0, 0, 1, 1], [], []>} : vector<8x128xbf16>, vector<128x128xbf16>, vector<8x128xf32> -> vector<8x128xf32>
    %cst_62 = arith.constant dense<0.000000e+00> : vector<8xf32>
    %176 = vector.multi_reduction <add>, %175, %cst_62 [1] : vector<8x128xf32> to vector<8xf32>
    %177 = vector.shape_cast %176 : vector<8xf32> to vector<8x1xf32>
    %cst_63 = arith.constant 1.280000e+02 : f32
    %178 = vector.broadcast %cst_63 : f32 to vector<8x1xf32>
    %179 = arith.divf %177, %178 : vector<8x1xf32>
    %180 = vector.broadcast %179 : vector<8x1xf32> to vector<8x128xf32>
    %181 = arith.subf %175, %180 : vector<8x128xf32>
    %182 = arith.mulf %181, %181 : vector<8x128xf32>
    %cst_64 = arith.constant dense<0.000000e+00> : vector<8xf32>
    %183 = vector.multi_reduction <add>, %182, %cst_64 [1] : vector<8x128xf32> to vector<8xf32>
    %184 = vector.shape_cast %183 : vector<8xf32> to vector<8x1xf32>
    %cst_65 = arith.constant 1.280000e+02 : f32
    %185 = vector.broadcast %cst_65 : f32 to vector<8x1xf32>
    %186 = arith.divf %184, %185 : vector<8x1xf32>
    %cst_66 = arith.constant 9.99999974E-6 : f32
    %187 = vector.broadcast %cst_66 : f32 to vector<8x1xf32>
    %188 = arith.addf %186, %187 : vector<8x1xf32>
    %189 = math.rsqrt %188 : vector<8x1xf32>
    %190 = vector.broadcast %189 : vector<8x1xf32> to vector<8x128xf32>
    %191 = arith.mulf %181, %190 : vector<8x128xf32>
    %192 = vector.broadcast %7 : vector<1x128xf32> to vector<8x128xf32>
    %193 = arith.mulf %191, %192 : vector<8x128xf32>
    %194 = vector.broadcast %8 : vector<1x128xf32> to vector<8x128xf32>
    %195 = arith.addf %193, %194 : vector<8x128xf32>
    %196 = arith.addf %195, %170 : vector<8x128xf32>
    %197 = arith.negf %196 : vector<8x128xf32>
    %198 = math.exp %197 : vector<8x128xf32>
    %cst_67 = arith.constant 1.000000e+00 : f32
    %199 = vector.broadcast %cst_67 : f32 to vector<8x128xf32>
    %200 = arith.addf %199, %198 : vector<8x128xf32>
    %201 = arith.divf %199, %200 : vector<8x128xf32>
    %cst_68 = arith.constant 1.000000e+00 : f32
    %202 = vector.broadcast %cst_68 : f32 to vector<8x128xf32>
    %203 = arith.subf %202, %201 : vector<8x128xf32>
    %204 = arith.mulf %203, %139 : vector<8x128xf32>
    %205 = arith.mulf %201, %173 : vector<8x128xf32>
    %206 = arith.addf %204, %205 : vector<8x128xf32>
    %207 = arith.index_cast %c2_i32 : i32 to index
    %c0_69 = arith.constant 0 : index
    %c0_70 = arith.constant 0 : index
    %208 = vector.load %arg9[%207, %c0_69, %c0_70] : memref<8x8x128xf32, #tpu.memory_space<vmem>>, vector<1x8x128xf32>
    %209 = vector.shape_cast %208 : vector<1x8x128xf32> to vector<8x128xf32>
    %210 = vector.shape_cast %206 : vector<8x128xf32> to vector<1x8x128xf32>
    tpu.vector_store %arg9[%207, %c0_69, %c0_70], %210 {strides = array<i32>} : memref<8x8x128xf32, #tpu.memory_space<vmem>>, vector<1x8x128xf32>,
    %c3_i32 = arith.constant 3 : i32
    %211 = arith.index_cast %c3_i32 : i32 to index
    %c0_71 = arith.constant 0 : index
    %c0_72 = arith.constant 0 : index
    %212 = vector.load %arg1[%211, %c0_71, %c0_72] : memref<8x8x128xf32, #tpu.memory_space<vmem>>, vector<1x8x128xf32>
    %213 = vector.shape_cast %212 : vector<1x8x128xf32> to vector<8x128xf32>
    %214 = arith.truncf %206 : vector<8x128xf32> to vector<8x128xbf16>
    %cst_73 = arith.constant dense<0.000000e+00> : vector<8x256xf32>
    %215 = tpu.matmul %214, %3, %cst_73 {dimension_numbers = #tpu.dot_dimension_numbers<[1], [0], [0], [1], [0, 0, 1, 1], [], []>} : vector<8x128xbf16>, vector<128x256xbf16>, vector<8x256xf32> -> vector<8x256xf32>
    %cst_74 = arith.constant dense<0.000000e+00> : vector<8xf32>
    %216 = vector.multi_reduction <add>, %215, %cst_74 [1] : vector<8x256xf32> to vector<8xf32>
    %217 = vector.shape_cast %216 : vector<8xf32> to vector<8x1xf32>
    %cst_75 = arith.constant 2.560000e+02 : f32
    %218 = vector.broadcast %cst_75 : f32 to vector<8x1xf32>
    %219 = arith.divf %217, %218 : vector<8x1xf32>
    %220 = vector.broadcast %219 : vector<8x1xf32> to vector<8x256xf32>
    %221 = arith.subf %215, %220 : vector<8x256xf32>
    %222 = arith.mulf %221, %221 : vector<8x256xf32>
    %cst_76 = arith.constant dense<0.000000e+00> : vector<8xf32>
    %223 = vector.multi_reduction <add>, %222, %cst_76 [1] : vector<8x256xf32> to vector<8xf32>
    %224 = vector.shape_cast %223 : vector<8xf32> to vector<8x1xf32>
    %cst_77 = arith.constant 2.560000e+02 : f32
    %225 = vector.broadcast %cst_77 : f32 to vector<8x1xf32>
    %226 = arith.divf %224, %225 : vector<8x1xf32>
    %cst_78 = arith.constant 9.99999974E-6 : f32
    %227 = vector.broadcast %cst_78 : f32 to vector<8x1xf32>
    %228 = arith.addf %226, %227 : vector<8x1xf32>
    %229 = math.rsqrt %228 : vector<8x1xf32>
    %230 = vector.broadcast %229 : vector<8x1xf32> to vector<8x256xf32>
    %231 = arith.mulf %221, %230 : vector<8x256xf32>
    %232 = vector.broadcast %5 : vector<1x256xf32> to vector<8x256xf32>
    %233 = arith.mulf %231, %232 : vector<8x256xf32>
    %234 = vector.broadcast %6 : vector<1x256xf32> to vector<8x256xf32>
    %235 = arith.addf %233, %234 : vector<8x256xf32>
    %236 = vector.extract_strided_slice %235 {offsets = [0, 0], sizes = [8, 128], strides = [1, 1]} : vector<8x256xf32> to vector<8x128xf32>
    %237 = vector.extract_strided_slice %235 {offsets = [0, 128], sizes = [8, 128], strides = [1, 1]} : vector<8x256xf32> to vector<8x128xf32>
    %238 = arith.addf %213, %236 : vector<8x128xf32>
    %cst_79 = arith.constant 0.000000e+00 : f32
    %239 = vector.broadcast %cst_79 : f32 to vector<8x128xf32>
    %240 = arith.maximumf %238, %239 : vector<8x128xf32>
    %241 = arith.truncf %240 : vector<8x128xf32> to vector<8x128xbf16>
    %cst_80 = arith.constant dense<0.000000e+00> : vector<8x128xf32>
    %242 = tpu.matmul %241, %4, %cst_80 {dimension_numbers = #tpu.dot_dimension_numbers<[1], [0], [0], [1], [0, 0, 1, 1], [], []>} : vector<8x128xbf16>, vector<128x128xbf16>, vector<8x128xf32> -> vector<8x128xf32>
    %cst_81 = arith.constant dense<0.000000e+00> : vector<8xf32>
    %243 = vector.multi_reduction <add>, %242, %cst_81 [1] : vector<8x128xf32> to vector<8xf32>
    %244 = vector.shape_cast %243 : vector<8xf32> to vector<8x1xf32>
    %cst_82 = arith.constant 1.280000e+02 : f32
    %245 = vector.broadcast %cst_82 : f32 to vector<8x1xf32>
    %246 = arith.divf %244, %245 : vector<8x1xf32>
    %247 = vector.broadcast %246 : vector<8x1xf32> to vector<8x128xf32>
    %248 = arith.subf %242, %247 : vector<8x128xf32>
    %249 = arith.mulf %248, %248 : vector<8x128xf32>
    %cst_83 = arith.constant dense<0.000000e+00> : vector<8xf32>
    %250 = vector.multi_reduction <add>, %249, %cst_83 [1] : vector<8x128xf32> to vector<8xf32>
    %251 = vector.shape_cast %250 : vector<8xf32> to vector<8x1xf32>
    %cst_84 = arith.constant 1.280000e+02 : f32
    %252 = vector.broadcast %cst_84 : f32 to vector<8x1xf32>
    %253 = arith.divf %251, %252 : vector<8x1xf32>
    %cst_85 = arith.constant 9.99999974E-6 : f32
    %254 = vector.broadcast %cst_85 : f32 to vector<8x1xf32>
    %255 = arith.addf %253, %254 : vector<8x1xf32>
    %256 = math.rsqrt %255 : vector<8x1xf32>
    %257 = vector.broadcast %256 : vector<8x1xf32> to vector<8x128xf32>
    %258 = arith.mulf %248, %257 : vector<8x128xf32>
    %259 = vector.broadcast %7 : vector<1x128xf32> to vector<8x128xf32>
    %260 = arith.mulf %258, %259 : vector<8x128xf32>
    %261 = vector.broadcast %8 : vector<1x128xf32> to vector<8x128xf32>
    %262 = arith.addf %260, %261 : vector<8x128xf32>
    %263 = arith.addf %262, %237 : vector<8x128xf32>
    %264 = arith.negf %263 : vector<8x128xf32>
    %265 = math.exp %264 : vector<8x128xf32>
    %cst_86 = arith.constant 1.000000e+00 : f32
    %266 = vector.broadcast %cst_86 : f32 to vector<8x128xf32>
    %267 = arith.addf %266, %265 : vector<8x128xf32>
    %268 = arith.divf %266, %267 : vector<8x128xf32>
    %cst_87 = arith.constant 1.000000e+00 : f32
    %269 = vector.broadcast %cst_87 : f32 to vector<8x128xf32>
    %270 = arith.subf %269, %268 : vector<8x128xf32>
    %271 = arith.mulf %270, %206 : vector<8x128xf32>
    %272 = arith.mulf %268, %240 : vector<8x128xf32>
    %273 = arith.addf %271, %272 : vector<8x128xf32>
    %274 = arith.index_cast %c3_i32 : i32 to index
    %c0_88 = arith.constant 0 : index
    %c0_89 = arith.constant 0 : index
    %275 = vector.load %arg9[%274, %c0_88, %c0_89] : memref<8x8x128xf32, #tpu.memory_space<vmem>>, vector<1x8x128xf32>
    %276 = vector.shape_cast %275 : vector<1x8x128xf32> to vector<8x128xf32>
    %277 = vector.shape_cast %273 : vector<8x128xf32> to vector<1x8x128xf32>
    tpu.vector_store %arg9[%274, %c0_88, %c0_89], %277 {strides = array<i32>} : memref<8x8x128xf32, #tpu.memory_space<vmem>>, vector<1x8x128xf32>,
    %c4_i32 = arith.constant 4 : i32
    %278 = arith.index_cast %c4_i32 : i32 to index
    %c0_90 = arith.constant 0 : index
    %c0_91 = arith.constant 0 : index
    %279 = vector.load %arg1[%278, %c0_90, %c0_91] : memref<8x8x128xf32, #tpu.memory_space<vmem>>, vector<1x8x128xf32>
    %280 = vector.shape_cast %279 : vector<1x8x128xf32> to vector<8x128xf32>
    %281 = arith.truncf %273 : vector<8x128xf32> to vector<8x128xbf16>
    %cst_92 = arith.constant dense<0.000000e+00> : vector<8x256xf32>
    %282 = tpu.matmul %281, %3, %cst_92 {dimension_numbers = #tpu.dot_dimension_numbers<[1], [0], [0], [1], [0, 0, 1, 1], [], []>} : vector<8x128xbf16>, vector<128x256xbf16>, vector<8x256xf32> -> vector<8x256xf32>
    %cst_93 = arith.constant dense<0.000000e+00> : vector<8xf32>
    %283 = vector.multi_reduction <add>, %282, %cst_93 [1] : vector<8x256xf32> to vector<8xf32>
    %284 = vector.shape_cast %283 : vector<8xf32> to vector<8x1xf32>
    %cst_94 = arith.constant 2.560000e+02 : f32
    %285 = vector.broadcast %cst_94 : f32 to vector<8x1xf32>
    %286 = arith.divf %284, %285 : vector<8x1xf32>
    %287 = vector.broadcast %286 : vector<8x1xf32> to vector<8x256xf32>
    %288 = arith.subf %282, %287 : vector<8x256xf32>
    %289 = arith.mulf %288, %288 : vector<8x256xf32>
    %cst_95 = arith.constant dense<0.000000e+00> : vector<8xf32>
    %290 = vector.multi_reduction <add>, %289, %cst_95 [1] : vector<8x256xf32> to vector<8xf32>
    %291 = vector.shape_cast %290 : vector<8xf32> to vector<8x1xf32>
    %cst_96 = arith.constant 2.560000e+02 : f32
    %292 = vector.broadcast %cst_96 : f32 to vector<8x1xf32>
    %293 = arith.divf %291, %292 : vector<8x1xf32>
    %cst_97 = arith.constant 9.99999974E-6 : f32
    %294 = vector.broadcast %cst_97 : f32 to vector<8x1xf32>
    %295 = arith.addf %293, %294 : vector<8x1xf32>
    %296 = math.rsqrt %295 : vector<8x1xf32>
    %297 = vector.broadcast %296 : vector<8x1xf32> to vector<8x256xf32>
    %298 = arith.mulf %288, %297 : vector<8x256xf32>
    %299 = vector.broadcast %5 : vector<1x256xf32> to vector<8x256xf32>
    %300 = arith.mulf %298, %299 : vector<8x256xf32>
    %301 = vector.broadcast %6 : vector<1x256xf32> to vector<8x256xf32>
    %302 = arith.addf %300, %301 : vector<8x256xf32>
    %303 = vector.extract_strided_slice %302 {offsets = [0, 0], sizes = [8, 128], strides = [1, 1]} : vector<8x256xf32> to vector<8x128xf32>
    %304 = vector.extract_strided_slice %302 {offsets = [0, 128], sizes = [8, 128], strides = [1, 1]} : vector<8x256xf32> to vector<8x128xf32>
    %305 = arith.addf %280, %303 : vector<8x128xf32>
    %cst_98 = arith.constant 0.000000e+00 : f32
    %306 = vector.broadcast %cst_98 : f32 to vector<8x128xf32>
    %307 = arith.maximumf %305, %306 : vector<8x128xf32>
    %308 = arith.truncf %307 : vector<8x128xf32> to vector<8x128xbf16>
    %cst_99 = arith.constant dense<0.000000e+00> : vector<8x128xf32>
    %309 = tpu.matmul %308, %4, %cst_99 {dimension_numbers = #tpu.dot_dimension_numbers<[1], [0], [0], [1], [0, 0, 1, 1], [], []>} : vector<8x128xbf16>, vector<128x128xbf16>, vector<8x128xf32> -> vector<8x128xf32>
    %cst_100 = arith.constant dense<0.000000e+00> : vector<8xf32>
    %310 = vector.multi_reduction <add>, %309, %cst_100 [1] : vector<8x128xf32> to vector<8xf32>
    %311 = vector.shape_cast %310 : vector<8xf32> to vector<8x1xf32>
    %cst_101 = arith.constant 1.280000e+02 : f32
    %312 = vector.broadcast %cst_101 : f32 to vector<8x1xf32>
    %313 = arith.divf %311, %312 : vector<8x1xf32>
    %314 = vector.broadcast %313 : vector<8x1xf32> to vector<8x128xf32>
    %315 = arith.subf %309, %314 : vector<8x128xf32>
    %316 = arith.mulf %315, %315 : vector<8x128xf32>
    %cst_102 = arith.constant dense<0.000000e+00> : vector<8xf32>
    %317 = vector.multi_reduction <add>, %316, %cst_102 [1] : vector<8x128xf32> to vector<8xf32>
    %318 = vector.shape_cast %317 : vector<8xf32> to vector<8x1xf32>
    %cst_103 = arith.constant 1.280000e+02 : f32
    %319 = vector.broadcast %cst_103 : f32 to vector<8x1xf32>
    %320 = arith.divf %318, %319 : vector<8x1xf32>
    %cst_104 = arith.constant 9.99999974E-6 : f32
    %321 = vector.broadcast %cst_104 : f32 to vector<8x1xf32>
    %322 = arith.addf %320, %321 : vector<8x1xf32>
    %323 = math.rsqrt %322 : vector<8x1xf32>
    %324 = vector.broadcast %323 : vector<8x1xf32> to vector<8x128xf32>
    %325 = arith.mulf %315, %324 : vector<8x128xf32>
    %326 = vector.broadcast %7 : vector<1x128xf32> to vector<8x128xf32>
    %327 = arith.mulf %325, %326 : vector<8x128xf32>
    %328 = vector.broadcast %8 : vector<1x128xf32> to vector<8x128xf32>
    %329 = arith.addf %327, %328 : vector<8x128xf32>
    %330 = arith.addf %329, %304 : vector<8x128xf32>
    %331 = arith.negf %330 : vector<8x128xf32>
    %332 = math.exp %331 : vector<8x128xf32>
    %cst_105 = arith.constant 1.000000e+00 : f32
    %333 = vector.broadcast %cst_105 : f32 to vector<8x128xf32>
    %334 = arith.addf %333, %332 : vector<8x128xf32>
    %335 = arith.divf %333, %334 : vector<8x128xf32>
    %cst_106 = arith.constant 1.000000e+00 : f32
    %336 = vector.broadcast %cst_106 : f32 to vector<8x128xf32>
    %337 = arith.subf %336, %335 : vector<8x128xf32>
    %338 = arith.mulf %337, %273 : vector<8x128xf32>
    %339 = arith.mulf %335, %307 : vector<8x128xf32>
    %340 = arith.addf %338, %339 : vector<8x128xf32>
    %341 = arith.index_cast %c4_i32 : i32 to index
    %c0_107 = arith.constant 0 : index
    %c0_108 = arith.constant 0 : index
    %342 = vector.load %arg9[%341, %c0_107, %c0_108] : memref<8x8x128xf32, #tpu.memory_space<vmem>>, vector<1x8x128xf32>
    %343 = vector.shape_cast %342 : vector<1x8x128xf32> to vector<8x128xf32>
    %344 = vector.shape_cast %340 : vector<8x128xf32> to vector<1x8x128xf32>
    tpu.vector_store %arg9[%341, %c0_107, %c0_108], %344 {strides = array<i32>} : memref<8x8x128xf32, #tpu.memory_space<vmem>>, vector<1x8x128xf32>,
    %c5_i32 = arith.constant 5 : i32
    %345 = arith.index_cast %c5_i32 : i32 to index
    %c0_109 = arith.constant 0 : index
    %c0_110 = arith.constant 0 : index
    %346 = vector.load %arg1[%345, %c0_109, %c0_110] : memref<8x8x128xf32, #tpu.memory_space<vmem>>, vector<1x8x128xf32>
    %347 = vector.shape_cast %346 : vector<1x8x128xf32> to vector<8x128xf32>
    %348 = arith.truncf %340 : vector<8x128xf32> to vector<8x128xbf16>
    %cst_111 = arith.constant dense<0.000000e+00> : vector<8x256xf32>
    %349 = tpu.matmul %348, %3, %cst_111 {dimension_numbers = #tpu.dot_dimension_numbers<[1], [0], [0], [1], [0, 0, 1, 1], [], []>} : vector<8x128xbf16>, vector<128x256xbf16>, vector<8x256xf32> -> vector<8x256xf32>
    %cst_112 = arith.constant dense<0.000000e+00> : vector<8xf32>
    %350 = vector.multi_reduction <add>, %349, %cst_112 [1] : vector<8x256xf32> to vector<8xf32>
    %351 = vector.shape_cast %350 : vector<8xf32> to vector<8x1xf32>
    %cst_113 = arith.constant 2.560000e+02 : f32
    %352 = vector.broadcast %cst_113 : f32 to vector<8x1xf32>
    %353 = arith.divf %351, %352 : vector<8x1xf32>
    %354 = vector.broadcast %353 : vector<8x1xf32> to vector<8x256xf32>
    %355 = arith.subf %349, %354 : vector<8x256xf32>
    %356 = arith.mulf %355, %355 : vector<8x256xf32>
    %cst_114 = arith.constant dense<0.000000e+00> : vector<8xf32>
    %357 = vector.multi_reduction <add>, %356, %cst_114 [1] : vector<8x256xf32> to vector<8xf32>
    %358 = vector.shape_cast %357 : vector<8xf32> to vector<8x1xf32>
    %cst_115 = arith.constant 2.560000e+02 : f32
    %359 = vector.broadcast %cst_115 : f32 to vector<8x1xf32>
    %360 = arith.divf %358, %359 : vector<8x1xf32>
    %cst_116 = arith.constant 9.99999974E-6 : f32
    %361 = vector.broadcast %cst_116 : f32 to vector<8x1xf32>
    %362 = arith.addf %360, %361 : vector<8x1xf32>
    %363 = math.rsqrt %362 : vector<8x1xf32>
    %364 = vector.broadcast %363 : vector<8x1xf32> to vector<8x256xf32>
    %365 = arith.mulf %355, %364 : vector<8x256xf32>
    %366 = vector.broadcast %5 : vector<1x256xf32> to vector<8x256xf32>
    %367 = arith.mulf %365, %366 : vector<8x256xf32>
    %368 = vector.broadcast %6 : vector<1x256xf32> to vector<8x256xf32>
    %369 = arith.addf %367, %368 : vector<8x256xf32>
    %370 = vector.extract_strided_slice %369 {offsets = [0, 0], sizes = [8, 128], strides = [1, 1]} : vector<8x256xf32> to vector<8x128xf32>
    %371 = vector.extract_strided_slice %369 {offsets = [0, 128], sizes = [8, 128], strides = [1, 1]} : vector<8x256xf32> to vector<8x128xf32>
    %372 = arith.addf %347, %370 : vector<8x128xf32>
    %cst_117 = arith.constant 0.000000e+00 : f32
    %373 = vector.broadcast %cst_117 : f32 to vector<8x128xf32>
    %374 = arith.maximumf %372, %373 : vector<8x128xf32>
    %375 = arith.truncf %374 : vector<8x128xf32> to vector<8x128xbf16>
    %cst_118 = arith.constant dense<0.000000e+00> : vector<8x128xf32>
    %376 = tpu.matmul %375, %4, %cst_118 {dimension_numbers = #tpu.dot_dimension_numbers<[1], [0], [0], [1], [0, 0, 1, 1], [], []>} : vector<8x128xbf16>, vector<128x128xbf16>, vector<8x128xf32> -> vector<8x128xf32>
    %cst_119 = arith.constant dense<0.000000e+00> : vector<8xf32>
    %377 = vector.multi_reduction <add>, %376, %cst_119 [1] : vector<8x128xf32> to vector<8xf32>
    %378 = vector.shape_cast %377 : vector<8xf32> to vector<8x1xf32>
    %cst_120 = arith.constant 1.280000e+02 : f32
    %379 = vector.broadcast %cst_120 : f32 to vector<8x1xf32>
    %380 = arith.divf %378, %379 : vector<8x1xf32>
    %381 = vector.broadcast %380 : vector<8x1xf32> to vector<8x128xf32>
    %382 = arith.subf %376, %381 : vector<8x128xf32>
    %383 = arith.mulf %382, %382 : vector<8x128xf32>
    %cst_121 = arith.constant dense<0.000000e+00> : vector<8xf32>
    %384 = vector.multi_reduction <add>, %383, %cst_121 [1] : vector<8x128xf32> to vector<8xf32>
    %385 = vector.shape_cast %384 : vector<8xf32> to vector<8x1xf32>
    %cst_122 = arith.constant 1.280000e+02 : f32
    %386 = vector.broadcast %cst_122 : f32 to vector<8x1xf32>
    %387 = arith.divf %385, %386 : vector<8x1xf32>
    %cst_123 = arith.constant 9.99999974E-6 : f32
    %388 = vector.broadcast %cst_123 : f32 to vector<8x1xf32>
    %389 = arith.addf %387, %388 : vector<8x1xf32>
    %390 = math.rsqrt %389 : vector<8x1xf32>
    %391 = vector.broadcast %390 : vector<8x1xf32> to vector<8x128xf32>
    %392 = arith.mulf %382, %391 : vector<8x128xf32>
    %393 = vector.broadcast %7 : vector<1x128xf32> to vector<8x128xf32>
    %394 = arith.mulf %392, %393 : vector<8x128xf32>
    %395 = vector.broadcast %8 : vector<1x128xf32> to vector<8x128xf32>
    %396 = arith.addf %394, %395 : vector<8x128xf32>
    %397 = arith.addf %396, %371 : vector<8x128xf32>
    %398 = arith.negf %397 : vector<8x128xf32>
    %399 = math.exp %398 : vector<8x128xf32>
    %cst_124 = arith.constant 1.000000e+00 : f32
    %400 = vector.broadcast %cst_124 : f32 to vector<8x128xf32>
    %401 = arith.addf %400, %399 : vector<8x128xf32>
    %402 = arith.divf %400, %401 : vector<8x128xf32>
    %cst_125 = arith.constant 1.000000e+00 : f32
    %403 = vector.broadcast %cst_125 : f32 to vector<8x128xf32>
    %404 = arith.subf %403, %402 : vector<8x128xf32>
    %405 = arith.mulf %404, %340 : vector<8x128xf32>
    %406 = arith.mulf %402, %374 : vector<8x128xf32>
    %407 = arith.addf %405, %406 : vector<8x128xf32>
    %408 = arith.index_cast %c5_i32 : i32 to index
    %c0_126 = arith.constant 0 : index
    %c0_127 = arith.constant 0 : index
    %409 = vector.load %arg9[%408, %c0_126, %c0_127] : memref<8x8x128xf32, #tpu.memory_space<vmem>>, vector<1x8x128xf32>
    %410 = vector.shape_cast %409 : vector<1x8x128xf32> to vector<8x128xf32>
    %411 = vector.shape_cast %407 : vector<8x128xf32> to vector<1x8x128xf32>
    tpu.vector_store %arg9[%408, %c0_126, %c0_127], %411 {strides = array<i32>} : memref<8x8x128xf32, #tpu.memory_space<vmem>>, vector<1x8x128xf32>,
    %c6_i32 = arith.constant 6 : i32
    %412 = arith.index_cast %c6_i32 : i32 to index
    %c0_128 = arith.constant 0 : index
    %c0_129 = arith.constant 0 : index
    %413 = vector.load %arg1[%412, %c0_128, %c0_129] : memref<8x8x128xf32, #tpu.memory_space<vmem>>, vector<1x8x128xf32>
    %414 = vector.shape_cast %413 : vector<1x8x128xf32> to vector<8x128xf32>
    %415 = arith.truncf %407 : vector<8x128xf32> to vector<8x128xbf16>
    %cst_130 = arith.constant dense<0.000000e+00> : vector<8x256xf32>
    %416 = tpu.matmul %415, %3, %cst_130 {dimension_numbers = #tpu.dot_dimension_numbers<[1], [0], [0], [1], [0, 0, 1, 1], [], []>} : vector<8x128xbf16>, vector<128x256xbf16>, vector<8x256xf32> -> vector<8x256xf32>
    %cst_131 = arith.constant dense<0.000000e+00> : vector<8xf32>
    %417 = vector.multi_reduction <add>, %416, %cst_131 [1] : vector<8x256xf32> to vector<8xf32>
    %418 = vector.shape_cast %417 : vector<8xf32> to vector<8x1xf32>
    %cst_132 = arith.constant 2.560000e+02 : f32
    %419 = vector.broadcast %cst_132 : f32 to vector<8x1xf32>
    %420 = arith.divf %418, %419 : vector<8x1xf32>
    %421 = vector.broadcast %420 : vector<8x1xf32> to vector<8x256xf32>
    %422 = arith.subf %416, %421 : vector<8x256xf32>
    %423 = arith.mulf %422, %422 : vector<8x256xf32>
    %cst_133 = arith.constant dense<0.000000e+00> : vector<8xf32>
    %424 = vector.multi_reduction <add>, %423, %cst_133 [1] : vector<8x256xf32> to vector<8xf32>
    %425 = vector.shape_cast %424 : vector<8xf32> to vector<8x1xf32>
    %cst_134 = arith.constant 2.560000e+02 : f32
    %426 = vector.broadcast %cst_134 : f32 to vector<8x1xf32>
    %427 = arith.divf %425, %426 : vector<8x1xf32>
    %cst_135 = arith.constant 9.99999974E-6 : f32
    %428 = vector.broadcast %cst_135 : f32 to vector<8x1xf32>
    %429 = arith.addf %427, %428 : vector<8x1xf32>
    %430 = math.rsqrt %429 : vector<8x1xf32>
    %431 = vector.broadcast %430 : vector<8x1xf32> to vector<8x256xf32>
    %432 = arith.mulf %422, %431 : vector<8x256xf32>
    %433 = vector.broadcast %5 : vector<1x256xf32> to vector<8x256xf32>
    %434 = arith.mulf %432, %433 : vector<8x256xf32>
    %435 = vector.broadcast %6 : vector<1x256xf32> to vector<8x256xf32>
    %436 = arith.addf %434, %435 : vector<8x256xf32>
    %437 = vector.extract_strided_slice %436 {offsets = [0, 0], sizes = [8, 128], strides = [1, 1]} : vector<8x256xf32> to vector<8x128xf32>
    %438 = vector.extract_strided_slice %436 {offsets = [0, 128], sizes = [8, 128], strides = [1, 1]} : vector<8x256xf32> to vector<8x128xf32>
    %439 = arith.addf %414, %437 : vector<8x128xf32>
    %cst_136 = arith.constant 0.000000e+00 : f32
    %440 = vector.broadcast %cst_136 : f32 to vector<8x128xf32>
    %441 = arith.maximumf %439, %440 : vector<8x128xf32>
    %442 = arith.truncf %441 : vector<8x128xf32> to vector<8x128xbf16>
    %cst_137 = arith.constant dense<0.000000e+00> : vector<8x128xf32>
    %443 = tpu.matmul %442, %4, %cst_137 {dimension_numbers = #tpu.dot_dimension_numbers<[1], [0], [0], [1], [0, 0, 1, 1], [], []>} : vector<8x128xbf16>, vector<128x128xbf16>, vector<8x128xf32> -> vector<8x128xf32>
    %cst_138 = arith.constant dense<0.000000e+00> : vector<8xf32>
    %444 = vector.multi_reduction <add>, %443, %cst_138 [1] : vector<8x128xf32> to vector<8xf32>
    %445 = vector.shape_cast %444 : vector<8xf32> to vector<8x1xf32>
    %cst_139 = arith.constant 1.280000e+02 : f32
    %446 = vector.broadcast %cst_139 : f32 to vector<8x1xf32>
    %447 = arith.divf %445, %446 : vector<8x1xf32>
    %448 = vector.broadcast %447 : vector<8x1xf32> to vector<8x128xf32>
    %449 = arith.subf %443, %448 : vector<8x128xf32>
    %450 = arith.mulf %449, %449 : vector<8x128xf32>
    %cst_140 = arith.constant dense<0.000000e+00> : vector<8xf32>
    %451 = vector.multi_reduction <add>, %450, %cst_140 [1] : vector<8x128xf32> to vector<8xf32>
    %452 = vector.shape_cast %451 : vector<8xf32> to vector<8x1xf32>
    %cst_141 = arith.constant 1.280000e+02 : f32
    %453 = vector.broadcast %cst_141 : f32 to vector<8x1xf32>
    %454 = arith.divf %452, %453 : vector<8x1xf32>
    %cst_142 = arith.constant 9.99999974E-6 : f32
    %455 = vector.broadcast %cst_142 : f32 to vector<8x1xf32>
    %456 = arith.addf %454, %455 : vector<8x1xf32>
    %457 = math.rsqrt %456 : vector<8x1xf32>
    %458 = vector.broadcast %457 : vector<8x1xf32> to vector<8x128xf32>
    %459 = arith.mulf %449, %458 : vector<8x128xf32>
    %460 = vector.broadcast %7 : vector<1x128xf32> to vector<8x128xf32>
    %461 = arith.mulf %459, %460 : vector<8x128xf32>
    %462 = vector.broadcast %8 : vector<1x128xf32> to vector<8x128xf32>
    %463 = arith.addf %461, %462 : vector<8x128xf32>
    %464 = arith.addf %463, %438 : vector<8x128xf32>
    %465 = arith.negf %464 : vector<8x128xf32>
    %466 = math.exp %465 : vector<8x128xf32>
    %cst_143 = arith.constant 1.000000e+00 : f32
    %467 = vector.broadcast %cst_143 : f32 to vector<8x128xf32>
    %468 = arith.addf %467, %466 : vector<8x128xf32>
    %469 = arith.divf %467, %468 : vector<8x128xf32>
    %cst_144 = arith.constant 1.000000e+00 : f32
    %470 = vector.broadcast %cst_144 : f32 to vector<8x128xf32>
    %471 = arith.subf %470, %469 : vector<8x128xf32>
    %472 = arith.mulf %471, %407 : vector<8x128xf32>
    %473 = arith.mulf %469, %441 : vector<8x128xf32>
    %474 = arith.addf %472, %473 : vector<8x128xf32>
    %475 = arith.index_cast %c6_i32 : i32 to index
    %c0_145 = arith.constant 0 : index
    %c0_146 = arith.constant 0 : index
    %476 = vector.load %arg9[%475, %c0_145, %c0_146] : memref<8x8x128xf32, #tpu.memory_space<vmem>>, vector<1x8x128xf32>
    %477 = vector.shape_cast %476 : vector<1x8x128xf32> to vector<8x128xf32>
    %478 = vector.shape_cast %474 : vector<8x128xf32> to vector<1x8x128xf32>
    tpu.vector_store %arg9[%475, %c0_145, %c0_146], %478 {strides = array<i32>} : memref<8x8x128xf32, #tpu.memory_space<vmem>>, vector<1x8x128xf32>,
    %c7_i32 = arith.constant 7 : i32
    %479 = arith.index_cast %c7_i32 : i32 to index
    %c0_147 = arith.constant 0 : index
    %c0_148 = arith.constant 0 : index
    %480 = vector.load %arg1[%479, %c0_147, %c0_148] : memref<8x8x128xf32, #tpu.memory_space<vmem>>, vector<1x8x128xf32>
    %481 = vector.shape_cast %480 : vector<1x8x128xf32> to vector<8x128xf32>
    %482 = arith.truncf %474 : vector<8x128xf32> to vector<8x128xbf16>
    %cst_149 = arith.constant dense<0.000000e+00> : vector<8x256xf32>
    %483 = tpu.matmul %482, %3, %cst_149 {dimension_numbers = #tpu.dot_dimension_numbers<[1], [0], [0], [1], [0, 0, 1, 1], [], []>} : vector<8x128xbf16>, vector<128x256xbf16>, vector<8x256xf32> -> vector<8x256xf32>
    %cst_150 = arith.constant dense<0.000000e+00> : vector<8xf32>
    %484 = vector.multi_reduction <add>, %483, %cst_150 [1] : vector<8x256xf32> to vector<8xf32>
    %485 = vector.shape_cast %484 : vector<8xf32> to vector<8x1xf32>
    %cst_151 = arith.constant 2.560000e+02 : f32
    %486 = vector.broadcast %cst_151 : f32 to vector<8x1xf32>
    %487 = arith.divf %485, %486 : vector<8x1xf32>
    %488 = vector.broadcast %487 : vector<8x1xf32> to vector<8x256xf32>
    %489 = arith.subf %483, %488 : vector<8x256xf32>
    %490 = arith.mulf %489, %489 : vector<8x256xf32>
    %cst_152 = arith.constant dense<0.000000e+00> : vector<8xf32>
    %491 = vector.multi_reduction <add>, %490, %cst_152 [1] : vector<8x256xf32> to vector<8xf32>
    %492 = vector.shape_cast %491 : vector<8xf32> to vector<8x1xf32>
    %cst_153 = arith.constant 2.560000e+02 : f32
    %493 = vector.broadcast %cst_153 : f32 to vector<8x1xf32>
    %494 = arith.divf %492, %493 : vector<8x1xf32>
    %cst_154 = arith.constant 9.99999974E-6 : f32
    %495 = vector.broadcast %cst_154 : f32 to vector<8x1xf32>
    %496 = arith.addf %494, %495 : vector<8x1xf32>
    %497 = math.rsqrt %496 : vector<8x1xf32>
    %498 = vector.broadcast %497 : vector<8x1xf32> to vector<8x256xf32>
    %499 = arith.mulf %489, %498 : vector<8x256xf32>
    %500 = vector.broadcast %5 : vector<1x256xf32> to vector<8x256xf32>
    %501 = arith.mulf %499, %500 : vector<8x256xf32>
    %502 = vector.broadcast %6 : vector<1x256xf32> to vector<8x256xf32>
    %503 = arith.addf %501, %502 : vector<8x256xf32>
    %504 = vector.extract_strided_slice %503 {offsets = [0, 0], sizes = [8, 128], strides = [1, 1]} : vector<8x256xf32> to vector<8x128xf32>
    %505 = vector.extract_strided_slice %503 {offsets = [0, 128], sizes = [8, 128], strides = [1, 1]} : vector<8x256xf32> to vector<8x128xf32>
    %506 = arith.addf %481, %504 : vector<8x128xf32>
    %cst_155 = arith.constant 0.000000e+00 : f32
    %507 = vector.broadcast %cst_155 : f32 to vector<8x128xf32>
    %508 = arith.maximumf %506, %507 : vector<8x128xf32>
    %509 = arith.truncf %508 : vector<8x128xf32> to vector<8x128xbf16>
    %cst_156 = arith.constant dense<0.000000e+00> : vector<8x128xf32>
    %510 = tpu.matmul %509, %4, %cst_156 {dimension_numbers = #tpu.dot_dimension_numbers<[1], [0], [0], [1], [0, 0, 1, 1], [], []>} : vector<8x128xbf16>, vector<128x128xbf16>, vector<8x128xf32> -> vector<8x128xf32>
    %cst_157 = arith.constant dense<0.000000e+00> : vector<8xf32>
    %511 = vector.multi_reduction <add>, %510, %cst_157 [1] : vector<8x128xf32> to vector<8xf32>
    %512 = vector.shape_cast %511 : vector<8xf32> to vector<8x1xf32>
    %cst_158 = arith.constant 1.280000e+02 : f32
    %513 = vector.broadcast %cst_158 : f32 to vector<8x1xf32>
    %514 = arith.divf %512, %513 : vector<8x1xf32>
    %515 = vector.broadcast %514 : vector<8x1xf32> to vector<8x128xf32>
    %516 = arith.subf %510, %515 : vector<8x128xf32>
    %517 = arith.mulf %516, %516 : vector<8x128xf32>
    %cst_159 = arith.constant dense<0.000000e+00> : vector<8xf32>
    %518 = vector.multi_reduction <add>, %517, %cst_159 [1] : vector<8x128xf32> to vector<8xf32>
    %519 = vector.shape_cast %518 : vector<8xf32> to vector<8x1xf32>
    %cst_160 = arith.constant 1.280000e+02 : f32
    %520 = vector.broadcast %cst_160 : f32 to vector<8x1xf32>
    %521 = arith.divf %519, %520 : vector<8x1xf32>
    %cst_161 = arith.constant 9.99999974E-6 : f32
    %522 = vector.broadcast %cst_161 : f32 to vector<8x1xf32>
    %523 = arith.addf %521, %522 : vector<8x1xf32>
    %524 = math.rsqrt %523 : vector<8x1xf32>
    %525 = vector.broadcast %524 : vector<8x1xf32> to vector<8x128xf32>
    %526 = arith.mulf %516, %525 : vector<8x128xf32>
    %527 = vector.broadcast %7 : vector<1x128xf32> to vector<8x128xf32>
    %528 = arith.mulf %526, %527 : vector<8x128xf32>
    %529 = vector.broadcast %8 : vector<1x128xf32> to vector<8x128xf32>
    %530 = arith.addf %528, %529 : vector<8x128xf32>
    %531 = arith.addf %530, %505 : vector<8x128xf32>
    %532 = arith.negf %531 : vector<8x128xf32>
    %533 = math.exp %532 : vector<8x128xf32>
    %cst_162 = arith.constant 1.000000e+00 : f32
    %534 = vector.broadcast %cst_162 : f32 to vector<8x128xf32>
    %535 = arith.addf %534, %533 : vector<8x128xf32>
    %536 = arith.divf %534, %535 : vector<8x128xf32>
    %cst_163 = arith.constant 1.000000e+00 : f32
    %537 = vector.broadcast %cst_163 : f32 to vector<8x128xf32>
    %538 = arith.subf %537, %536 : vector<8x128xf32>
    %539 = arith.mulf %538, %474 : vector<8x128xf32>
    %540 = arith.mulf %536, %508 : vector<8x128xf32>
    %541 = arith.addf %539, %540 : vector<8x128xf32>
    %542 = arith.index_cast %c7_i32 : i32 to index
    %c0_164 = arith.constant 0 : index
    %c0_165 = arith.constant 0 : index
    %543 = vector.load %arg9[%542, %c0_164, %c0_165] : memref<8x8x128xf32, #tpu.memory_space<vmem>>, vector<1x8x128xf32>
    %544 = vector.shape_cast %543 : vector<1x8x128xf32> to vector<8x128xf32>
    %545 = vector.shape_cast %541 : vector<8x128xf32> to vector<1x8x128xf32>
    tpu.vector_store %arg9[%542, %c0_164, %c0_165], %545 {strides = array<i32>} : memref<8x8x128xf32, #tpu.memory_space<vmem>>, vector<1x8x128xf32>,
    %c8_i32 = arith.constant 8 : i32
    %c0_166 = arith.constant 0 : index
    %c0_167 = arith.constant 0 : index
    %546 = vector.load %arg10[%c0_166, %c0_167] : memref<8x128xf32, #tpu.memory_space<vmem>>, vector<8x128xf32>
    tpu.vector_store %arg10[%c0_166, %c0_167], %541 {strides = array<i32>} : memref<8x128xf32, #tpu.memory_space<vmem>>, vector<8x128xf32>,
    return
  }
  func.func @transform_0(%arg0: i32) -> (i32, i32, i32) {
    %c0_i32 = arith.constant 0 : i32
    %c0_i32_0 = arith.constant 0 : i32
    %c0_i32_1 = arith.constant 0 : i32
    return %arg0, %c0_i32, %c0_i32_0 : i32, i32, i32
  }
  func.func @transform_1(%arg0: i32) -> (i32, i32) {
    %c0_i32 = arith.constant 0 : i32
    %c0_i32_0 = arith.constant 0 : i32
    %c0_i32_1 = arith.constant 0 : i32
    return %c0_i32, %c0_i32_0 : i32, i32
  }
  func.func @transform_2(%arg0: i32) -> (i32, i32) {
    %c0_i32 = arith.constant 0 : i32
    %c0_i32_0 = arith.constant 0 : i32
    %c0_i32_1 = arith.constant 0 : i32
    return %c0_i32, %c0_i32_0 : i32, i32
  }
  func.func @transform_3(%arg0: i32) -> (i32, i32) {
    %c0_i32 = arith.constant 0 : i32
    %c0_i32_0 = arith.constant 0 : i32
    %c0_i32_1 = arith.constant 0 : i32
    return %c0_i32, %c0_i32_0 : i32, i32
  }
  func.func @transform_4(%arg0: i32) -> (i32, i32) {
    %c0_i32 = arith.constant 0 : i32
    %c0_i32_0 = arith.constant 0 : i32
    %c0_i32_1 = arith.constant 0 : i32
    return %c0_i32, %c0_i32_0 : i32, i32
  }
  func.func @transform_5(%arg0: i32) -> (i32, i32) {
    %c0_i32 = arith.constant 0 : i32
    %c0_i32_0 = arith.constant 0 : i32
    %c0_i32_1 = arith.constant 0 : i32
    return %c0_i32, %c0_i32_0 : i32, i32
  }
  func.func @transform_6(%arg0: i32) -> (i32, i32) {
    %c0_i32 = arith.constant 0 : i32
    %c0_i32_0 = arith.constant 0 : i32
    %c0_i32_1 = arith.constant 0 : i32
    return %c0_i32, %c0_i32_0 : i32, i32
  }
  func.func @transform_7(%arg0: i32) -> (i32, i32) {
    %c0_i32 = arith.constant 0 : i32
    %c0_i32_0 = arith.constant 0 : i32
    %c0_i32_1 = arith.constant 0 : i32
    return %c0_i32, %c0_i32_0 : i32, i32
  }
  func.func @transform_8(%arg0: i32) -> (i32, i32, i32) {
    %c0_i32 = arith.constant 0 : i32
    %c0_i32_0 = arith.constant 0 : i32
    %c0_i32_1 = arith.constant 0 : i32
    return %arg0, %c0_i32, %c0_i32_0 : i32, i32, i32
  }
}

module attributes {stable_mosaic.version = 11 : i64} {
  func.func @integrator_block_kernel(%arg0: i32, %arg1: memref<8x8x128xf32, #tpu.memory_space<vmem>>, %arg2: memref<8x128xf32, #tpu.memory_space<vmem>>, %arg3: memref<128x256xbf16, #tpu.memory_space<vmem>>, %arg4: memref<1x256xf32, #tpu.memory_space<vmem>>, %arg5: memref<1x256xf32, #tpu.memory_space<vmem>>, %arg6: memref<128x128xbf16, #tpu.memory_space<vmem>>, %arg7: memref<1x128xf32, #tpu.memory_space<vmem>>, %arg8: memref<1x128xf32, #tpu.memory_space<vmem>>, %arg9: memref<8x8x128xf32, #tpu.memory_space<vmem>>, %arg10: memref<8x128xf32, #tpu.memory_space<vmem>>) attributes {dimension_semantics = [#tpu.dimension_semantics<arbitrary>], iteration_bounds = array<i64: 2>, scalar_prefetch = 0 : i64, scratch_operands = 1 : i64, tpu.core_type = #tpu.core_type<tc>, window_params = [{transform_indices = @transform_0, window_bounds = array<i64: 8, 8, 128>}, {pipeline_mode = #tpu.pipeline_mode<synchronous>, transform_indices = @transform_1, window_bounds = array<i64: 8, 128>}, {pipeline_mode = #tpu.pipeline_mode<synchronous>, transform_indices = @transform_2, window_bounds = array<i64: 128, 256>}, {pipeline_mode = #tpu.pipeline_mode<synchronous>, transform_indices = @transform_3, window_bounds = array<i64: 1, 256>}, {pipeline_mode = #tpu.pipeline_mode<synchronous>, transform_indices = @transform_4, window_bounds = array<i64: 1, 256>}, {pipeline_mode = #tpu.pipeline_mode<synchronous>, transform_indices = @transform_5, window_bounds = array<i64: 128, 128>}, {pipeline_mode = #tpu.pipeline_mode<synchronous>, transform_indices = @transform_6, window_bounds = array<i64: 1, 128>}, {pipeline_mode = #tpu.pipeline_mode<synchronous>, transform_indices = @transform_7, window_bounds = array<i64: 1, 128>}, {transform_indices = @transform_8, window_bounds = array<i64: 8, 8, 128>}]} {
    %c0_i32 = arith.constant 0 : i32
    %0 = arith.cmpi eq, %arg0, %c0_i32 : i32
    %1 = arith.extui %0 : i1 to i32
    %c0_i32_0 = arith.constant 0 : i32
    %2 = arith.cmpi ne, %1, %c0_i32_0 : i32
    scf.if %2 {
      %c0_168 = arith.constant 0 : index
      %c0_169 = arith.constant 0 : index
      %547 = vector.load %arg2[%c0_168, %c0_169] : memref<8x128xf32, #tpu.memory_space<vmem>>, vector<8x128xf32>
      %c0_170 = arith.constant 0 : index
      %c0_171 = arith.constant 0 : index
      %548 = vector.load %arg10[%c0_170, %c0_171] : memref<8x128xf32, #tpu.memory_space<vmem>>, vector<8x128xf32>
      tpu.vector_store %arg10[%c0_170, %c0_171], %547 {strides = array<i32>} : memref<8x128xf32, #tpu.memory_space<vmem>>, vector<8x128xf32>,
    } else {
    }
    %c0 = arith.constant 0 : index
    %c0_1 = arith.constant 0 : index
    %3 = vector.load %arg3[%c0, %c0_1] : memref<128x256xbf16, #tpu.memory_space<vmem>>, vector<128x256xbf16>
    %c0_2 = arith.constant 0 : index
    %c0_3 = arith.constant 0 : index
    %4 = vector.load %arg6[%c0_2, %c0_3] : memref<128x128xbf16, #tpu.memory_space<vmem>>, vector<128x128xbf16>
    %c0_4 = arith.constant 0 : index
    %c0_5 = arith.constant 0 : index
    %5 = vector.load %arg4[%c0_4, %c0_5] : memref<1x256xf32, #tpu.memory_space<vmem>>, vector<1x256xf32>
    %c0_6 = arith.constant 0 : index
    %c0_7 = arith.constant 0 : index
    %6 = vector.load %arg5[%c0_6, %c0_7] : memref<1x256xf32, #tpu.memory_space<vmem>>, vector<1x256xf32>
    %c0_8 = arith.constant 0 : index
    %c0_9 = arith.constant 0 : index
    %7 = vector.load %arg7[%c0_8, %c0_9] : memref<1x128xf32, #tpu.memory_space<vmem>>, vector<1x128xf32>
    %c0_10 = arith.constant 0 : index
    %c0_11 = arith.constant 0 : index
    %8 = vector.load %arg8[%c0_10, %c0_11] : memref<1x128xf32, #tpu.memory_space<vmem>>, vector<1x128xf32>
    %c0_12 = arith.constant 0 : index
    %c0_13 = arith.constant 0 : index
    %9 = vector.load %arg10[%c0_12, %c0_13] : memref<8x128xf32, #tpu.memory_space<vmem>>, vector<8x128xf32>
    %c0_i32_14 = arith.constant 0 : i32
    %10 = arith.index_cast %c0_i32_14 : i32 to index
    %c0_15 = arith.constant 0 : index
    %c0_16 = arith.constant 0 : index
    %11 = vector.load %arg1[%10, %c0_15, %c0_16] : memref<8x8x128xf32, #tpu.memory_space<vmem>>, vector<1x8x128xf32>
    %12 = vector.shape_cast %11 : vector<1x8x128xf32> to vector<8x128xf32>
    %13 = arith.truncf %9 : vector<8x128xf32> to vector<8x128xbf16>
    %cst = arith.constant dense<0.000000e+00> : vector<8x256xf32>
    %14 = tpu.matmul %13, %3, %cst {dimension_numbers = #tpu.dot_dimension_numbers<[1], [0], [0], [1], [0, 0, 1, 1], [], []>} : vector<8x128xbf16>, vector<128x256xbf16>, vector<8x256xf32> -> vector<8x256xf32>
    %cst_17 = arith.constant dense<0.000000e+00> : vector<8xf32>
    %15 = vector.multi_reduction <add>, %14, %cst_17 [1] : vector<8x256xf32> to vector<8xf32>
    %16 = vector.shape_cast %15 : vector<8xf32> to vector<8x1xf32>
    %cst_18 = arith.constant 2.560000e+02 : f32
    %17 = vector.broadcast %cst_18 : f32 to vector<8x1xf32>
    %18 = arith.divf %16, %17 : vector<8x1xf32>
    %19 = vector.broadcast %18 : vector<8x1xf32> to vector<8x256xf32>
    %20 = arith.subf %14, %19 : vector<8x256xf32>
    %21 = arith.mulf %20, %20 : vector<8x256xf32>
    %cst_19 = arith.constant dense<0.000000e+00> : vector<8xf32>
    %22 = vector.multi_reduction <add>, %21, %cst_19 [1] : vector<8x256xf32> to vector<8xf32>
    %23 = vector.shape_cast %22 : vector<8xf32> to vector<8x1xf32>
    %cst_20 = arith.constant 2.560000e+02 : f32
    %24 = vector.broadcast %cst_20 : f32 to vector<8x1xf32>
    %25 = arith.divf %23, %24 : vector<8x1xf32>
    %cst_21 = arith.constant 9.99999974E-6 : f32
    %26 = vector.broadcast %cst_21 : f32 to vector<8x1xf32>
    %27 = arith.addf %25, %26 : vector<8x1xf32>
    %28 = math.rsqrt %27 : vector<8x1xf32>
    %29 = vector.broadcast %28 : vector<8x1xf32> to vector<8x256xf32>
    %30 = arith.mulf %20, %29 : vector<8x256xf32>
    %31 = vector.broadcast %5 : vector<1x256xf32> to vector<8x256xf32>
    %32 = arith.mulf %30, %31 : vector<8x256xf32>
    %33 = vector.broadcast %6 : vector<1x256xf32> to vector<8x256xf32>
    %34 = arith.addf %32, %33 : vector<8x256xf32>
    %35 = vector.extract_strided_slice %34 {offsets = [0, 0], sizes = [8, 128], strides = [1, 1]} : vector<8x256xf32> to vector<8x128xf32>
    %36 = vector.extract_strided_slice %34 {offsets = [0, 128], sizes = [8, 128], strides = [1, 1]} : vector<8x256xf32> to vector<8x128xf32>
    %37 = arith.addf %12, %35 : vector<8x128xf32>
    %cst_22 = arith.constant 0.000000e+00 : f32
    %38 = vector.broadcast %cst_22 : f32 to vector<8x128xf32>
    %39 = arith.maximumf %37, %38 : vector<8x128xf32>
    %40 = arith.truncf %39 : vector<8x128xf32> to vector<8x128xbf16>
    %cst_23 = arith.constant dense<0.000000e+00> : vector<8x128xf32>
    %41 = tpu.matmul %40, %4, %cst_23 {dimension_numbers = #tpu.dot_dimension_numbers<[1], [0], [0], [1], [0, 0, 1, 1], [], []>} : vector<8x128xbf16>, vector<128x128xbf16>, vector<8x128xf32> -> vector<8x128xf32>
    %cst_24 = arith.constant dense<0.000000e+00> : vector<8xf32>
    %42 = vector.multi_reduction <add>, %41, %cst_24 [1] : vector<8x128xf32> to vector<8xf32>
    %43 = vector.shape_cast %42 : vector<8xf32> to vector<8x1xf32>
    %cst_25 = arith.constant 1.280000e+02 : f32
    %44 = vector.broadcast %cst_25 : f32 to vector<8x1xf32>
    %45 = arith.divf %43, %44 : vector<8x1xf32>
    %46 = vector.broadcast %45 : vector<8x1xf32> to vector<8x128xf32>
    %47 = arith.subf %41, %46 : vector<8x128xf32>
    %48 = arith.mulf %47, %47 : vector<8x128xf32>
    %cst_26 = arith.constant dense<0.000000e+00> : vector<8xf32>
    %49 = vector.multi_reduction <add>, %48, %cst_26 [1] : vector<8x128xf32> to vector<8xf32>
    %50 = vector.shape_cast %49 : vector<8xf32> to vector<8x1xf32>
    %cst_27 = arith.constant 1.280000e+02 : f32
    %51 = vector.broadcast %cst_27 : f32 to vector<8x1xf32>
    %52 = arith.divf %50, %51 : vector<8x1xf32>
    %cst_28 = arith.constant 9.99999974E-6 : f32
    %53 = vector.broadcast %cst_28 : f32 to vector<8x1xf32>
    %54 = arith.addf %52, %53 : vector<8x1xf32>
    %55 = math.rsqrt %54 : vector<8x1xf32>
    %56 = vector.broadcast %55 : vector<8x1xf32> to vector<8x128xf32>
    %57 = arith.mulf %47, %56 : vector<8x128xf32>
    %58 = vector.broadcast %7 : vector<1x128xf32> to vector<8x128xf32>
    %59 = arith.mulf %57, %58 : vector<8x128xf32>
    %60 = vector.broadcast %8 : vector<1x128xf32> to vector<8x128xf32>
    %61 = arith.addf %59, %60 : vector<8x128xf32>
    %62 = arith.addf %61, %36 : vector<8x128xf32>
    %63 = arith.negf %62 : vector<8x128xf32>
    %64 = math.exp %63 : vector<8x128xf32>
    %cst_29 = arith.constant 1.000000e+00 : f32
    %65 = vector.broadcast %cst_29 : f32 to vector<8x128xf32>
    %66 = arith.addf %65, %64 : vector<8x128xf32>
    %67 = arith.divf %65, %66 : vector<8x128xf32>
    %cst_30 = arith.constant 1.000000e+00 : f32
    %68 = vector.broadcast %cst_30 : f32 to vector<8x128xf32>
    %69 = arith.subf %68, %67 : vector<8x128xf32>
    %70 = arith.mulf %69, %9 : vector<8x128xf32>
    %71 = arith.mulf %67, %39 : vector<8x128xf32>
    %72 = arith.addf %70, %71 : vector<8x128xf32>
    %73 = arith.index_cast %c0_i32_14 : i32 to index
    %c0_31 = arith.constant 0 : index
    %c0_32 = arith.constant 0 : index
    %74 = vector.load %arg9[%73, %c0_31, %c0_32] : memref<8x8x128xf32, #tpu.memory_space<vmem>>, vector<1x8x128xf32>
    %75 = vector.shape_cast %74 : vector<1x8x128xf32> to vector<8x128xf32>
    %76 = vector.shape_cast %72 : vector<8x128xf32> to vector<1x8x128xf32>
    tpu.vector_store %arg9[%73, %c0_31, %c0_32], %76 {strides = array<i32>} : memref<8x8x128xf32, #tpu.memory_space<vmem>>, vector<1x8x128xf32>,
    %c1_i32 = arith.constant 1 : i32
    %77 = arith.index_cast %c1_i32 : i32 to index
    %c0_33 = arith.constant 0 : index
    %c0_34 = arith.constant 0 : index
    %78 = vector.load %arg1[%77, %c0_33, %c0_34] : memref<8x8x128xf32, #tpu.memory_space<vmem>>, vector<1x8x128xf32>
    %79 = vector.shape_cast %78 : vector<1x8x128xf32> to vector<8x128xf32>
    %80 = arith.truncf %72 : vector<8x128xf32> to vector<8x128xbf16>
    %cst_35 = arith.constant dense<0.000000e+00> : vector<8x256xf32>
    %81 = tpu.matmul %80, %3, %cst_35 {dimension_numbers = #tpu.dot_dimension_numbers<[1], [0], [0], [1], [0, 0, 1, 1], [], []>} : vector<8x128xbf16>, vector<128x256xbf16>, vector<8x256xf32> -> vector<8x256xf32>
    %cst_36 = arith.constant dense<0.000000e+00> : vector<8xf32>
    %82 = vector.multi_reduction <add>, %81, %cst_36 [1] : vector<8x256xf32> to vector<8xf32>
    %83 = vector.shape_cast %82 : vector<8xf32> to vector<8x1xf32>
    %cst_37 = arith.constant 2.560000e+02 : f32
    %84 = vector.broadcast %cst_37 : f32 to vector<8x1xf32>
    %85 = arith.divf %83, %84 : vector<8x1xf32>
    %86 = vector.broadcast %85 : vector<8x1xf32> to vector<8x256xf32>
    %87 = arith.subf %81, %86 : vector<8x256xf32>
    %88 = arith.mulf %87, %87 : vector<8x256xf32>
    %cst_38 = arith.constant dense<0.000000e+00> : vector<8xf32>
    %89 = vector.multi_reduction <add>, %88, %cst_38 [1] : vector<8x256xf32> to vector<8xf32>
    %90 = vector.shape_cast %89 : vector<8xf32> to vector<8x1xf32>
    %cst_39 = arith.constant 2.560000e+02 : f32
    %91 = vector.broadcast %cst_39 : f32 to vector<8x1xf32>
    %92 = arith.divf %90, %91 : vector<8x1xf32>
    %cst_40 = arith.constant 9.99999974E-6 : f32
    %93 = vector.broadcast %cst_40 : f32 to vector<8x1xf32>
    %94 = arith.addf %92, %93 : vector<8x1xf32>
    %95 = math.rsqrt %94 : vector<8x1xf32>
    %96 = vector.broadcast %95 : vector<8x1xf32> to vector<8x256xf32>
    %97 = arith.mulf %87, %96 : vector<8x256xf32>
    %98 = vector.broadcast %5 : vector<1x256xf32> to vector<8x256xf32>
    %99 = arith.mulf %97, %98 : vector<8x256xf32>
    %100 = vector.broadcast %6 : vector<1x256xf32> to vector<8x256xf32>
    %101 = arith.addf %99, %100 : vector<8x256xf32>
    %102 = vector.extract_strided_slice %101 {offsets = [0, 0], sizes = [8, 128], strides = [1, 1]} : vector<8x256xf32> to vector<8x128xf32>
    %103 = vector.extract_strided_slice %101 {offsets = [0, 128], sizes = [8, 128], strides = [1, 1]} : vector<8x256xf32> to vector<8x128xf32>
    %104 = arith.addf %79, %102 : vector<8x128xf32>
    %cst_41 = arith.constant 0.000000e+00 : f32
    %105 = vector.broadcast %cst_41 : f32 to vector<8x128xf32>
    %106 = arith.maximumf %104, %105 : vector<8x128xf32>
    %107 = arith.truncf %106 : vector<8x128xf32> to vector<8x128xbf16>
    %cst_42 = arith.constant dense<0.000000e+00> : vector<8x128xf32>
    %108 = tpu.matmul %107, %4, %cst_42 {dimension_numbers = #tpu.dot_dimension_numbers<[1], [0], [0], [1], [0, 0, 1, 1], [], []>} : vector<8x128xbf16>, vector<128x128xbf16>, vector<8x128xf32> -> vector<8x128xf32>
    %cst_43 = arith.constant dense<0.000000e+00> : vector<8xf32>
    %109 = vector.multi_reduction <add>, %108, %cst_43 [1] : vector<8x128xf32> to vector<8xf32>
    %110 = vector.shape_cast %109 : vector<8xf32> to vector<8x1xf32>
    %cst_44 = arith.constant 1.280000e+02 : f32
    %111 = vector.broadcast %cst_44 : f32 to vector<8x1xf32>
    %112 = arith.divf %110, %111 : vector<8x1xf32>
    %113 = vector.broadcast %112 : vector<8x1xf32> to vector<8x128xf32>
    %114 = arith.subf %108, %113 : vector<8x128xf32>
    %115 = arith.mulf %114, %114 : vector<8x128xf32>
    %cst_45 = arith.constant dense<0.000000e+00> : vector<8xf32>
    %116 = vector.multi_reduction <add>, %115, %cst_45 [1] : vector<8x128xf32> to vector<8xf32>
    %117 = vector.shape_cast %116 : vector<8xf32> to vector<8x1xf32>
    %cst_46 = arith.constant 1.280000e+02 : f32
    %118 = vector.broadcast %cst_46 : f32 to vector<8x1xf32>
    %119 = arith.divf %117, %118 : vector<8x1xf32>
    %cst_47 = arith.constant 9.99999974E-6 : f32
    %120 = vector.broadcast %cst_47 : f32 to vector<8x1xf32>
    %121 = arith.addf %119, %120 : vector<8x1xf32>
    %122 = math.rsqrt %121 : vector<8x1xf32>
    %123 = vector.broadcast %122 : vector<8x1xf32> to vector<8x128xf32>
    %124 = arith.mulf %114, %123 : vector<8x128xf32>
    %125 = vector.broadcast %7 : vector<1x128xf32> to vector<8x128xf32>
    %126 = arith.mulf %124, %125 : vector<8x128xf32>
    %127 = vector.broadcast %8 : vector<1x128xf32> to vector<8x128xf32>
    %128 = arith.addf %126, %127 : vector<8x128xf32>
    %129 = arith.addf %128, %103 : vector<8x128xf32>
    %130 = arith.negf %129 : vector<8x128xf32>
    %131 = math.exp %130 : vector<8x128xf32>
    %cst_48 = arith.constant 1.000000e+00 : f32
    %132 = vector.broadcast %cst_48 : f32 to vector<8x128xf32>
    %133 = arith.addf %132, %131 : vector<8x128xf32>
    %134 = arith.divf %132, %133 : vector<8x128xf32>
    %cst_49 = arith.constant 1.000000e+00 : f32
    %135 = vector.broadcast %cst_49 : f32 to vector<8x128xf32>
    %136 = arith.subf %135, %134 : vector<8x128xf32>
    %137 = arith.mulf %136, %72 : vector<8x128xf32>
    %138 = arith.mulf %134, %106 : vector<8x128xf32>
    %139 = arith.addf %137, %138 : vector<8x128xf32>
    %140 = arith.index_cast %c1_i32 : i32 to index
    %c0_50 = arith.constant 0 : index
    %c0_51 = arith.constant 0 : index
    %141 = vector.load %arg9[%140, %c0_50, %c0_51] : memref<8x8x128xf32, #tpu.memory_space<vmem>>, vector<1x8x128xf32>
    %142 = vector.shape_cast %141 : vector<1x8x128xf32> to vector<8x128xf32>
    %143 = vector.shape_cast %139 : vector<8x128xf32> to vector<1x8x128xf32>
    tpu.vector_store %arg9[%140, %c0_50, %c0_51], %143 {strides = array<i32>} : memref<8x8x128xf32, #tpu.memory_space<vmem>>, vector<1x8x128xf32>,
    %c2_i32 = arith.constant 2 : i32
    %144 = arith.index_cast %c2_i32 : i32 to index
    %c0_52 = arith.constant 0 : index
    %c0_53 = arith.constant 0 : index
    %145 = vector.load %arg1[%144, %c0_52, %c0_53] : memref<8x8x128xf32, #tpu.memory_space<vmem>>, vector<1x8x128xf32>
    %146 = vector.shape_cast %145 : vector<1x8x128xf32> to vector<8x128xf32>
    %147 = arith.truncf %139 : vector<8x128xf32> to vector<8x128xbf16>
    %cst_54 = arith.constant dense<0.000000e+00> : vector<8x256xf32>
    %148 = tpu.matmul %147, %3, %cst_54 {dimension_numbers = #tpu.dot_dimension_numbers<[1], [0], [0], [1], [0, 0, 1, 1], [], []>} : vector<8x128xbf16>, vector<128x256xbf16>, vector<8x256xf32> -> vector<8x256xf32>
    %cst_55 = arith.constant dense<0.000000e+00> : vector<8xf32>
    %149 = vector.multi_reduction <add>, %148, %cst_55 [1] : vector<8x256xf32> to vector<8xf32>
    %150 = vector.shape_cast %149 : vector<8xf32> to vector<8x1xf32>
    %cst_56 = arith.constant 2.560000e+02 : f32
    %151 = vector.broadcast %cst_56 : f32 to vector<8x1xf32>
    %152 = arith.divf %150, %151 : vector<8x1xf32>
    %153 = vector.broadcast %152 : vector<8x1xf32> to vector<8x256xf32>
    %154 = arith.subf %148, %153 : vector<8x256xf32>
    %155 = arith.mulf %154, %154 : vector<8x256xf32>
    %cst_57 = arith.constant dense<0.000000e+00> : vector<8xf32>
    %156 = vector.multi_reduction <add>, %155, %cst_57 [1] : vector<8x256xf32> to vector<8xf32>
    %157 = vector.shape_cast %156 : vector<8xf32> to vector<8x1xf32>
    %cst_58 = arith.constant 2.560000e+02 : f32
    %158 = vector.broadcast %cst_58 : f32 to vector<8x1xf32>
    %159 = arith.divf %157, %158 : vector<8x1xf32>
    %cst_59 = arith.constant 9.99999974E-6 : f32
    %160 = vector.broadcast %cst_59 : f32 to vector<8x1xf32>
    %161 = arith.addf %159, %160 : vector<8x1xf32>
    %162 = math.rsqrt %161 : vector<8x1xf32>
    %163 = vector.broadcast %162 : vector<8x1xf32> to vector<8x256xf32>
    %164 = arith.mulf %154, %163 : vector<8x256xf32>
    %165 = vector.broadcast %5 : vector<1x256xf32> to vector<8x256xf32>
    %166 = arith.mulf %164, %165 : vector<8x256xf32>
    %167 = vector.broadcast %6 : vector<1x256xf32> to vector<8x256xf32>
    %168 = arith.addf %166, %167 : vector<8x256xf32>
    %169 = vector.extract_strided_slice %168 {offsets = [0, 0], sizes = [8, 128], strides = [1, 1]} : vector<8x256xf32> to vector<8x128xf32>
    %170 = vector.extract_strided_slice %168 {offsets = [0, 128], sizes = [8, 128], strides = [1, 1]} : vector<8x256xf32> to vector<8x128xf32>
    %171 = arith.addf %146, %169 : vector<8x128xf32>
    %cst_60 = arith.constant 0.000000e+00 : f32
    %172 = vector.broadcast %cst_60 : f32 to vector<8x128xf32>
    %173 = arith.maximumf %171, %172 : vector<8x128xf32>
    %174 = arith.truncf %173 : vector<8x128xf32> to vector<8x128xbf16>
    %cst_61 = arith.constant dense<0.000000e+00> : vector<8x128xf32>
    %175 = tpu.matmul %174, %4, %cst_61 {dimension_numbers = #tpu.dot_dimension_numbers<[1], [0], [0], [1], [0, 0, 1, 1], [], []>} : vector<8x128xbf16>, vector<128x128xbf16>, vector<8x128xf32> -> vector<8x128xf32>
    %cst_62 = arith.constant dense<0.000000e+00> : vector<8xf32>
    %176 = vector.multi_reduction <add>, %175, %cst_62 [1] : vector<8x128xf32> to vector<8xf32>
    %177 = vector.shape_cast %176 : vector<8xf32> to vector<8x1xf32>
    %cst_63 = arith.constant 1.280000e+02 : f32
    %178 = vector.broadcast %cst_63 : f32 to vector<8x1xf32>
    %179 = arith.divf %177, %178 : vector<8x1xf32>
    %180 = vector.broadcast %179 : vector<8x1xf32> to vector<8x128xf32>
    %181 = arith.subf %175, %180 : vector<8x128xf32>
    %182 = arith.mulf %181, %181 : vector<8x128xf32>
    %cst_64 = arith.constant dense<0.000000e+00> : vector<8xf32>
    %183 = vector.multi_reduction <add>, %182, %cst_64 [1] : vector<8x128xf32> to vector<8xf32>
    %184 = vector.shape_cast %183 : vector<8xf32> to vector<8x1xf32>
    %cst_65 = arith.constant 1.280000e+02 : f32
    %185 = vector.broadcast %cst_65 : f32 to vector<8x1xf32>
    %186 = arith.divf %184, %185 : vector<8x1xf32>
    %cst_66 = arith.constant 9.99999974E-6 : f32
    %187 = vector.broadcast %cst_66 : f32 to vector<8x1xf32>
    %188 = arith.addf %186, %187 : vector<8x1xf32>
    %189 = math.rsqrt %188 : vector<8x1xf32>
    %190 = vector.broadcast %189 : vector<8x1xf32> to vector<8x128xf32>
    %191 = arith.mulf %181, %190 : vector<8x128xf32>
    %192 = vector.broadcast %7 : vector<1x128xf32> to vector<8x128xf32>
    %193 = arith.mulf %191, %192 : vector<8x128xf32>
    %194 = vector.broadcast %8 : vector<1x128xf32> to vector<8x128xf32>
    %195 = arith.addf %193, %194 : vector<8x128xf32>
    %196 = arith.addf %195, %170 : vector<8x128xf32>
    %197 = arith.negf %196 : vector<8x128xf32>
    %198 = math.exp %197 : vector<8x128xf32>
    %cst_67 = arith.constant 1.000000e+00 : f32
    %199 = vector.broadcast %cst_67 : f32 to vector<8x128xf32>
    %200 = arith.addf %199, %198 : vector<8x128xf32>
    %201 = arith.divf %199, %200 : vector<8x128xf32>
    %cst_68 = arith.constant 1.000000e+00 : f32
    %202 = vector.broadcast %cst_68 : f32 to vector<8x128xf32>
    %203 = arith.subf %202, %201 : vector<8x128xf32>
    %204 = arith.mulf %203, %139 : vector<8x128xf32>
    %205 = arith.mulf %201, %173 : vector<8x128xf32>
    %206 = arith.addf %204, %205 : vector<8x128xf32>
    %207 = arith.index_cast %c2_i32 : i32 to index
    %c0_69 = arith.constant 0 : index
    %c0_70 = arith.constant 0 : index
    %208 = vector.load %arg9[%207, %c0_69, %c0_70] : memref<8x8x128xf32, #tpu.memory_space<vmem>>, vector<1x8x128xf32>
    %209 = vector.shape_cast %208 : vector<1x8x128xf32> to vector<8x128xf32>
    %210 = vector.shape_cast %206 : vector<8x128xf32> to vector<1x8x128xf32>
    tpu.vector_store %arg9[%207, %c0_69, %c0_70], %210 {strides = array<i32>} : memref<8x8x128xf32, #tpu.memory_space<vmem>>, vector<1x8x128xf32>,
    %c3_i32 = arith.constant 3 : i32
    %211 = arith.index_cast %c3_i32 : i32 to index
    %c0_71 = arith.constant 0 : index
    %c0_72 = arith.constant 0 : index
    %212 = vector.load %arg1[%211, %c0_71, %c0_72] : memref<8x8x128xf32, #tpu.memory_space<vmem>>, vector<1x8x128xf32>
    %213 = vector.shape_cast %212 : vector<1x8x128xf32> to vector<8x128xf32>
    %214 = arith.truncf %206 : vector<8x128xf32> to vector<8x128xbf16>
    %cst_73 = arith.constant dense<0.000000e+00> : vector<8x256xf32>
    %215 = tpu.matmul %214, %3, %cst_73 {dimension_numbers = #tpu.dot_dimension_numbers<[1], [0], [0], [1], [0, 0, 1, 1], [], []>} : vector<8x128xbf16>, vector<128x256xbf16>, vector<8x256xf32> -> vector<8x256xf32>
    %cst_74 = arith.constant dense<0.000000e+00> : vector<8xf32>
    %216 = vector.multi_reduction <add>, %215, %cst_74 [1] : vector<8x256xf32> to vector<8xf32>
    %217 = vector.shape_cast %216 : vector<8xf32> to vector<8x1xf32>
    %cst_75 = arith.constant 2.560000e+02 : f32
    %218 = vector.broadcast %cst_75 : f32 to vector<8x1xf32>
    %219 = arith.divf %217, %218 : vector<8x1xf32>
    %220 = vector.broadcast %219 : vector<8x1xf32> to vector<8x256xf32>
    %221 = arith.subf %215, %220 : vector<8x256xf32>
    %222 = arith.mulf %221, %221 : vector<8x256xf32>
    %cst_76 = arith.constant dense<0.000000e+00> : vector<8xf32>
    %223 = vector.multi_reduction <add>, %222, %cst_76 [1] : vector<8x256xf32> to vector<8xf32>
    %224 = vector.shape_cast %223 : vector<8xf32> to vector<8x1xf32>
    %cst_77 = arith.constant 2.560000e+02 : f32
    %225 = vector.broadcast %cst_77 : f32 to vector<8x1xf32>
    %226 = arith.divf %224, %225 : vector<8x1xf32>
    %cst_78 = arith.constant 9.99999974E-6 : f32
    %227 = vector.broadcast %cst_78 : f32 to vector<8x1xf32>
    %228 = arith.addf %226, %227 : vector<8x1xf32>
    %229 = math.rsqrt %228 : vector<8x1xf32>
    %230 = vector.broadcast %229 : vector<8x1xf32> to vector<8x256xf32>
    %231 = arith.mulf %221, %230 : vector<8x256xf32>
    %232 = vector.broadcast %5 : vector<1x256xf32> to vector<8x256xf32>
    %233 = arith.mulf %231, %232 : vector<8x256xf32>
    %234 = vector.broadcast %6 : vector<1x256xf32> to vector<8x256xf32>
    %235 = arith.addf %233, %234 : vector<8x256xf32>
    %236 = vector.extract_strided_slice %235 {offsets = [0, 0], sizes = [8, 128], strides = [1, 1]} : vector<8x256xf32> to vector<8x128xf32>
    %237 = vector.extract_strided_slice %235 {offsets = [0, 128], sizes = [8, 128], strides = [1, 1]} : vector<8x256xf32> to vector<8x128xf32>
    %238 = arith.addf %213, %236 : vector<8x128xf32>
    %cst_79 = arith.constant 0.000000e+00 : f32
    %239 = vector.broadcast %cst_79 : f32 to vector<8x128xf32>
    %240 = arith.maximumf %238, %239 : vector<8x128xf32>
    %241 = arith.truncf %240 : vector<8x128xf32> to vector<8x128xbf16>
    %cst_80 = arith.constant dense<0.000000e+00> : vector<8x128xf32>
    %242 = tpu.matmul %241, %4, %cst_80 {dimension_numbers = #tpu.dot_dimension_numbers<[1], [0], [0], [1], [0, 0, 1, 1], [], []>} : vector<8x128xbf16>, vector<128x128xbf16>, vector<8x128xf32> -> vector<8x128xf32>
    %cst_81 = arith.constant dense<0.000000e+00> : vector<8xf32>
    %243 = vector.multi_reduction <add>, %242, %cst_81 [1] : vector<8x128xf32> to vector<8xf32>
    %244 = vector.shape_cast %243 : vector<8xf32> to vector<8x1xf32>
    %cst_82 = arith.constant 1.280000e+02 : f32
    %245 = vector.broadcast %cst_82 : f32 to vector<8x1xf32>
    %246 = arith.divf %244, %245 : vector<8x1xf32>
    %247 = vector.broadcast %246 : vector<8x1xf32> to vector<8x128xf32>
    %248 = arith.subf %242, %247 : vector<8x128xf32>
    %249 = arith.mulf %248, %248 : vector<8x128xf32>
    %cst_83 = arith.constant dense<0.000000e+00> : vector<8xf32>
    %250 = vector.multi_reduction <add>, %249, %cst_83 [1] : vector<8x128xf32> to vector<8xf32>
    %251 = vector.shape_cast %250 : vector<8xf32> to vector<8x1xf32>
    %cst_84 = arith.constant 1.280000e+02 : f32
    %252 = vector.broadcast %cst_84 : f32 to vector<8x1xf32>
    %253 = arith.divf %251, %252 : vector<8x1xf32>
    %cst_85 = arith.constant 9.99999974E-6 : f32
    %254 = vector.broadcast %cst_85 : f32 to vector<8x1xf32>
    %255 = arith.addf %253, %254 : vector<8x1xf32>
    %256 = math.rsqrt %255 : vector<8x1xf32>
    %257 = vector.broadcast %256 : vector<8x1xf32> to vector<8x128xf32>
    %258 = arith.mulf %248, %257 : vector<8x128xf32>
    %259 = vector.broadcast %7 : vector<1x128xf32> to vector<8x128xf32>
    %260 = arith.mulf %258, %259 : vector<8x128xf32>
    %261 = vector.broadcast %8 : vector<1x128xf32> to vector<8x128xf32>
    %262 = arith.addf %260, %261 : vector<8x128xf32>
    %263 = arith.addf %262, %237 : vector<8x128xf32>
    %264 = arith.negf %263 : vector<8x128xf32>
    %265 = math.exp %264 : vector<8x128xf32>
    %cst_86 = arith.constant 1.000000e+00 : f32
    %266 = vector.broadcast %cst_86 : f32 to vector<8x128xf32>
    %267 = arith.addf %266, %265 : vector<8x128xf32>
    %268 = arith.divf %266, %267 : vector<8x128xf32>
    %cst_87 = arith.constant 1.000000e+00 : f32
    %269 = vector.broadcast %cst_87 : f32 to vector<8x128xf32>
    %270 = arith.subf %269, %268 : vector<8x128xf32>
    %271 = arith.mulf %270, %206 : vector<8x128xf32>
    %272 = arith.mulf %268, %240 : vector<8x128xf32>
    %273 = arith.addf %271, %272 : vector<8x128xf32>
    %274 = arith.index_cast %c3_i32 : i32 to index
    %c0_88 = arith.constant 0 : index
    %c0_89 = arith.constant 0 : index
    %275 = vector.load %arg9[%274, %c0_88, %c0_89] : memref<8x8x128xf32, #tpu.memory_space<vmem>>, vector<1x8x128xf32>
    %276 = vector.shape_cast %275 : vector<1x8x128xf32> to vector<8x128xf32>
    %277 = vector.shape_cast %273 : vector<8x128xf32> to vector<1x8x128xf32>
    tpu.vector_store %arg9[%274, %c0_88, %c0_89], %277 {strides = array<i32>} : memref<8x8x128xf32, #tpu.memory_space<vmem>>, vector<1x8x128xf32>,
    %c4_i32 = arith.constant 4 : i32
    %278 = arith.index_cast %c4_i32 : i32 to index
    %c0_90 = arith.constant 0 : index
    %c0_91 = arith.constant 0 : index
    %279 = vector.load %arg1[%278, %c0_90, %c0_91] : memref<8x8x128xf32, #tpu.memory_space<vmem>>, vector<1x8x128xf32>
    %280 = vector.shape_cast %279 : vector<1x8x128xf32> to vector<8x128xf32>
    %281 = arith.truncf %273 : vector<8x128xf32> to vector<8x128xbf16>
    %cst_92 = arith.constant dense<0.000000e+00> : vector<8x256xf32>
    %282 = tpu.matmul %281, %3, %cst_92 {dimension_numbers = #tpu.dot_dimension_numbers<[1], [0], [0], [1], [0, 0, 1, 1], [], []>} : vector<8x128xbf16>, vector<128x256xbf16>, vector<8x256xf32> -> vector<8x256xf32>
    %cst_93 = arith.constant dense<0.000000e+00> : vector<8xf32>
    %283 = vector.multi_reduction <add>, %282, %cst_93 [1] : vector<8x256xf32> to vector<8xf32>
    %284 = vector.shape_cast %283 : vector<8xf32> to vector<8x1xf32>
    %cst_94 = arith.constant 2.560000e+02 : f32
    %285 = vector.broadcast %cst_94 : f32 to vector<8x1xf32>
    %286 = arith.divf %284, %285 : vector<8x1xf32>
    %287 = vector.broadcast %286 : vector<8x1xf32> to vector<8x256xf32>
    %288 = arith.subf %282, %287 : vector<8x256xf32>
    %289 = arith.mulf %288, %288 : vector<8x256xf32>
    %cst_95 = arith.constant dense<0.000000e+00> : vector<8xf32>
    %290 = vector.multi_reduction <add>, %289, %cst_95 [1] : vector<8x256xf32> to vector<8xf32>
    %291 = vector.shape_cast %290 : vector<8xf32> to vector<8x1xf32>
    %cst_96 = arith.constant 2.560000e+02 : f32
    %292 = vector.broadcast %cst_96 : f32 to vector<8x1xf32>
    %293 = arith.divf %291, %292 : vector<8x1xf32>
    %cst_97 = arith.constant 9.99999974E-6 : f32
    %294 = vector.broadcast %cst_97 : f32 to vector<8x1xf32>
    %295 = arith.addf %293, %294 : vector<8x1xf32>
    %296 = math.rsqrt %295 : vector<8x1xf32>
    %297 = vector.broadcast %296 : vector<8x1xf32> to vector<8x256xf32>
    %298 = arith.mulf %288, %297 : vector<8x256xf32>
    %299 = vector.broadcast %5 : vector<1x256xf32> to vector<8x256xf32>
    %300 = arith.mulf %298, %299 : vector<8x256xf32>
    %301 = vector.broadcast %6 : vector<1x256xf32> to vector<8x256xf32>
    %302 = arith.addf %300, %301 : vector<8x256xf32>
    %303 = vector.extract_strided_slice %302 {offsets = [0, 0], sizes = [8, 128], strides = [1, 1]} : vector<8x256xf32> to vector<8x128xf32>
    %304 = vector.extract_strided_slice %302 {offsets = [0, 128], sizes = [8, 128], strides = [1, 1]} : vector<8x256xf32> to vector<8x128xf32>
    %305 = arith.addf %280, %303 : vector<8x128xf32>
    %cst_98 = arith.constant 0.000000e+00 : f32
    %306 = vector.broadcast %cst_98 : f32 to vector<8x128xf32>
    %307 = arith.maximumf %305, %306 : vector<8x128xf32>
    %308 = arith.truncf %307 : vector<8x128xf32> to vector<8x128xbf16>
    %cst_99 = arith.constant dense<0.000000e+00> : vector<8x128xf32>
    %309 = tpu.matmul %308, %4, %cst_99 {dimension_numbers = #tpu.dot_dimension_numbers<[1], [0], [0], [1], [0, 0, 1, 1], [], []>} : vector<8x128xbf16>, vector<128x128xbf16>, vector<8x128xf32> -> vector<8x128xf32>
    %cst_100 = arith.constant dense<0.000000e+00> : vector<8xf32>
    %310 = vector.multi_reduction <add>, %309, %cst_100 [1] : vector<8x128xf32> to vector<8xf32>
    %311 = vector.shape_cast %310 : vector<8xf32> to vector<8x1xf32>
    %cst_101 = arith.constant 1.280000e+02 : f32
    %312 = vector.broadcast %cst_101 : f32 to vector<8x1xf32>
    %313 = arith.divf %311, %312 : vector<8x1xf32>
    %314 = vector.broadcast %313 : vector<8x1xf32> to vector<8x128xf32>
    %315 = arith.subf %309, %314 : vector<8x128xf32>
    %316 = arith.mulf %315, %315 : vector<8x128xf32>
    %cst_102 = arith.constant dense<0.000000e+00> : vector<8xf32>
    %317 = vector.multi_reduction <add>, %316, %cst_102 [1] : vector<8x128xf32> to vector<8xf32>
    %318 = vector.shape_cast %317 : vector<8xf32> to vector<8x1xf32>
    %cst_103 = arith.constant 1.280000e+02 : f32
    %319 = vector.broadcast %cst_103 : f32 to vector<8x1xf32>
    %320 = arith.divf %318, %319 : vector<8x1xf32>
    %cst_104 = arith.constant 9.99999974E-6 : f32
    %321 = vector.broadcast %cst_104 : f32 to vector<8x1xf32>
    %322 = arith.addf %320, %321 : vector<8x1xf32>
    %323 = math.rsqrt %322 : vector<8x1xf32>
    %324 = vector.broadcast %323 : vector<8x1xf32> to vector<8x128xf32>
    %325 = arith.mulf %315, %324 : vector<8x128xf32>
    %326 = vector.broadcast %7 : vector<1x128xf32> to vector<8x128xf32>
    %327 = arith.mulf %325, %326 : vector<8x128xf32>
    %328 = vector.broadcast %8 : vector<1x128xf32> to vector<8x128xf32>
    %329 = arith.addf %327, %328 : vector<8x128xf32>
    %330 = arith.addf %329, %304 : vector<8x128xf32>
    %331 = arith.negf %330 : vector<8x128xf32>
    %332 = math.exp %331 : vector<8x128xf32>
    %cst_105 = arith.constant 1.000000e+00 : f32
    %333 = vector.broadcast %cst_105 : f32 to vector<8x128xf32>
    %334 = arith.addf %333, %332 : vector<8x128xf32>
    %335 = arith.divf %333, %334 : vector<8x128xf32>
    %cst_106 = arith.constant 1.000000e+00 : f32
    %336 = vector.broadcast %cst_106 : f32 to vector<8x128xf32>
    %337 = arith.subf %336, %335 : vector<8x128xf32>
    %338 = arith.mulf %337, %273 : vector<8x128xf32>
    %339 = arith.mulf %335, %307 : vector<8x128xf32>
    %340 = arith.addf %338, %339 : vector<8x128xf32>
    %341 = arith.index_cast %c4_i32 : i32 to index
    %c0_107 = arith.constant 0 : index
    %c0_108 = arith.constant 0 : index
    %342 = vector.load %arg9[%341, %c0_107, %c0_108] : memref<8x8x128xf32, #tpu.memory_space<vmem>>, vector<1x8x128xf32>
    %343 = vector.shape_cast %342 : vector<1x8x128xf32> to vector<8x128xf32>
    %344 = vector.shape_cast %340 : vector<8x128xf32> to vector<1x8x128xf32>
    tpu.vector_store %arg9[%341, %c0_107, %c0_108], %344 {strides = array<i32>} : memref<8x8x128xf32, #tpu.memory_space<vmem>>, vector<1x8x128xf32>,
    %c5_i32 = arith.constant 5 : i32
    %345 = arith.index_cast %c5_i32 : i32 to index
    %c0_109 = arith.constant 0 : index
    %c0_110 = arith.constant 0 : index
    %346 = vector.load %arg1[%345, %c0_109, %c0_110] : memref<8x8x128xf32, #tpu.memory_space<vmem>>, vector<1x8x128xf32>
    %347 = vector.shape_cast %346 : vector<1x8x128xf32> to vector<8x128xf32>
    %348 = arith.truncf %340 : vector<8x128xf32> to vector<8x128xbf16>
    %cst_111 = arith.constant dense<0.000000e+00> : vector<8x256xf32>
    %349 = tpu.matmul %348, %3, %cst_111 {dimension_numbers = #tpu.dot_dimension_numbers<[1], [0], [0], [1], [0, 0, 1, 1], [], []>} : vector<8x128xbf16>, vector<128x256xbf16>, vector<8x256xf32> -> vector<8x256xf32>
    %cst_112 = arith.constant dense<0.000000e+00> : vector<8xf32>
    %350 = vector.multi_reduction <add>, %349, %cst_112 [1] : vector<8x256xf32> to vector<8xf32>
    %351 = vector.shape_cast %350 : vector<8xf32> to vector<8x1xf32>
    %cst_113 = arith.constant 2.560000e+02 : f32
    %352 = vector.broadcast %cst_113 : f32 to vector<8x1xf32>
    %353 = arith.divf %351, %352 : vector<8x1xf32>
    %354 = vector.broadcast %353 : vector<8x1xf32> to vector<8x256xf32>
    %355 = arith.subf %349, %354 : vector<8x256xf32>
    %356 = arith.mulf %355, %355 : vector<8x256xf32>
    %cst_114 = arith.constant dense<0.000000e+00> : vector<8xf32>
    %357 = vector.multi_reduction <add>, %356, %cst_114 [1] : vector<8x256xf32> to vector<8xf32>
    %358 = vector.shape_cast %357 : vector<8xf32> to vector<8x1xf32>
    %cst_115 = arith.constant 2.560000e+02 : f32
    %359 = vector.broadcast %cst_115 : f32 to vector<8x1xf32>
    %360 = arith.divf %358, %359 : vector<8x1xf32>
    %cst_116 = arith.constant 9.99999974E-6 : f32
    %361 = vector.broadcast %cst_116 : f32 to vector<8x1xf32>
    %362 = arith.addf %360, %361 : vector<8x1xf32>
    %363 = math.rsqrt %362 : vector<8x1xf32>
    %364 = vector.broadcast %363 : vector<8x1xf32> to vector<8x256xf32>
    %365 = arith.mulf %355, %364 : vector<8x256xf32>
    %366 = vector.broadcast %5 : vector<1x256xf32> to vector<8x256xf32>
    %367 = arith.mulf %365, %366 : vector<8x256xf32>
    %368 = vector.broadcast %6 : vector<1x256xf32> to vector<8x256xf32>
    %369 = arith.addf %367, %368 : vector<8x256xf32>
    %370 = vector.extract_strided_slice %369 {offsets = [0, 0], sizes = [8, 128], strides = [1, 1]} : vector<8x256xf32> to vector<8x128xf32>
    %371 = vector.extract_strided_slice %369 {offsets = [0, 128], sizes = [8, 128], strides = [1, 1]} : vector<8x256xf32> to vector<8x128xf32>
    %372 = arith.addf %347, %370 : vector<8x128xf32>
    %cst_117 = arith.constant 0.000000e+00 : f32
    %373 = vector.broadcast %cst_117 : f32 to vector<8x128xf32>
    %374 = arith.maximumf %372, %373 : vector<8x128xf32>
    %375 = arith.truncf %374 : vector<8x128xf32> to vector<8x128xbf16>
    %cst_118 = arith.constant dense<0.000000e+00> : vector<8x128xf32>
    %376 = tpu.matmul %375, %4, %cst_118 {dimension_numbers = #tpu.dot_dimension_numbers<[1], [0], [0], [1], [0, 0, 1, 1], [], []>} : vector<8x128xbf16>, vector<128x128xbf16>, vector<8x128xf32> -> vector<8x128xf32>
    %cst_119 = arith.constant dense<0.000000e+00> : vector<8xf32>
    %377 = vector.multi_reduction <add>, %376, %cst_119 [1] : vector<8x128xf32> to vector<8xf32>
    %378 = vector.shape_cast %377 : vector<8xf32> to vector<8x1xf32>
    %cst_120 = arith.constant 1.280000e+02 : f32
    %379 = vector.broadcast %cst_120 : f32 to vector<8x1xf32>
    %380 = arith.divf %378, %379 : vector<8x1xf32>
    %381 = vector.broadcast %380 : vector<8x1xf32> to vector<8x128xf32>
    %382 = arith.subf %376, %381 : vector<8x128xf32>
    %383 = arith.mulf %382, %382 : vector<8x128xf32>
    %cst_121 = arith.constant dense<0.000000e+00> : vector<8xf32>
    %384 = vector.multi_reduction <add>, %383, %cst_121 [1] : vector<8x128xf32> to vector<8xf32>
    %385 = vector.shape_cast %384 : vector<8xf32> to vector<8x1xf32>
    %cst_122 = arith.constant 1.280000e+02 : f32
    %386 = vector.broadcast %cst_122 : f32 to vector<8x1xf32>
    %387 = arith.divf %385, %386 : vector<8x1xf32>
    %cst_123 = arith.constant 9.99999974E-6 : f32
    %388 = vector.broadcast %cst_123 : f32 to vector<8x1xf32>
    %389 = arith.addf %387, %388 : vector<8x1xf32>
    %390 = math.rsqrt %389 : vector<8x1xf32>
    %391 = vector.broadcast %390 : vector<8x1xf32> to vector<8x128xf32>
    %392 = arith.mulf %382, %391 : vector<8x128xf32>
    %393 = vector.broadcast %7 : vector<1x128xf32> to vector<8x128xf32>
    %394 = arith.mulf %392, %393 : vector<8x128xf32>
    %395 = vector.broadcast %8 : vector<1x128xf32> to vector<8x128xf32>
    %396 = arith.addf %394, %395 : vector<8x128xf32>
    %397 = arith.addf %396, %371 : vector<8x128xf32>
    %398 = arith.negf %397 : vector<8x128xf32>
    %399 = math.exp %398 : vector<8x128xf32>
    %cst_124 = arith.constant 1.000000e+00 : f32
    %400 = vector.broadcast %cst_124 : f32 to vector<8x128xf32>
    %401 = arith.addf %400, %399 : vector<8x128xf32>
    %402 = arith.divf %400, %401 : vector<8x128xf32>
    %cst_125 = arith.constant 1.000000e+00 : f32
    %403 = vector.broadcast %cst_125 : f32 to vector<8x128xf32>
    %404 = arith.subf %403, %402 : vector<8x128xf32>
    %405 = arith.mulf %404, %340 : vector<8x128xf32>
    %406 = arith.mulf %402, %374 : vector<8x128xf32>
    %407 = arith.addf %405, %406 : vector<8x128xf32>
    %408 = arith.index_cast %c5_i32 : i32 to index
    %c0_126 = arith.constant 0 : index
    %c0_127 = arith.constant 0 : index
    %409 = vector.load %arg9[%408, %c0_126, %c0_127] : memref<8x8x128xf32, #tpu.memory_space<vmem>>, vector<1x8x128xf32>
    %410 = vector.shape_cast %409 : vector<1x8x128xf32> to vector<8x128xf32>
    %411 = vector.shape_cast %407 : vector<8x128xf32> to vector<1x8x128xf32>
    tpu.vector_store %arg9[%408, %c0_126, %c0_127], %411 {strides = array<i32>} : memref<8x8x128xf32, #tpu.memory_space<vmem>>, vector<1x8x128xf32>,
    %c6_i32 = arith.constant 6 : i32
    %412 = arith.index_cast %c6_i32 : i32 to index
    %c0_128 = arith.constant 0 : index
    %c0_129 = arith.constant 0 : index
    %413 = vector.load %arg1[%412, %c0_128, %c0_129] : memref<8x8x128xf32, #tpu.memory_space<vmem>>, vector<1x8x128xf32>
    %414 = vector.shape_cast %413 : vector<1x8x128xf32> to vector<8x128xf32>
    %415 = arith.truncf %407 : vector<8x128xf32> to vector<8x128xbf16>
    %cst_130 = arith.constant dense<0.000000e+00> : vector<8x256xf32>
    %416 = tpu.matmul %415, %3, %cst_130 {dimension_numbers = #tpu.dot_dimension_numbers<[1], [0], [0], [1], [0, 0, 1, 1], [], []>} : vector<8x128xbf16>, vector<128x256xbf16>, vector<8x256xf32> -> vector<8x256xf32>
    %cst_131 = arith.constant dense<0.000000e+00> : vector<8xf32>
    %417 = vector.multi_reduction <add>, %416, %cst_131 [1] : vector<8x256xf32> to vector<8xf32>
    %418 = vector.shape_cast %417 : vector<8xf32> to vector<8x1xf32>
    %cst_132 = arith.constant 2.560000e+02 : f32
    %419 = vector.broadcast %cst_132 : f32 to vector<8x1xf32>
    %420 = arith.divf %418, %419 : vector<8x1xf32>
    %421 = vector.broadcast %420 : vector<8x1xf32> to vector<8x256xf32>
    %422 = arith.subf %416, %421 : vector<8x256xf32>
    %423 = arith.mulf %422, %422 : vector<8x256xf32>
    %cst_133 = arith.constant dense<0.000000e+00> : vector<8xf32>
    %424 = vector.multi_reduction <add>, %423, %cst_133 [1] : vector<8x256xf32> to vector<8xf32>
    %425 = vector.shape_cast %424 : vector<8xf32> to vector<8x1xf32>
    %cst_134 = arith.constant 2.560000e+02 : f32
    %426 = vector.broadcast %cst_134 : f32 to vector<8x1xf32>
    %427 = arith.divf %425, %426 : vector<8x1xf32>
    %cst_135 = arith.constant 9.99999974E-6 : f32
    %428 = vector.broadcast %cst_135 : f32 to vector<8x1xf32>
    %429 = arith.addf %427, %428 : vector<8x1xf32>
    %430 = math.rsqrt %429 : vector<8x1xf32>
    %431 = vector.broadcast %430 : vector<8x1xf32> to vector<8x256xf32>
    %432 = arith.mulf %422, %431 : vector<8x256xf32>
    %433 = vector.broadcast %5 : vector<1x256xf32> to vector<8x256xf32>
    %434 = arith.mulf %432, %433 : vector<8x256xf32>
    %435 = vector.broadcast %6 : vector<1x256xf32> to vector<8x256xf32>
    %436 = arith.addf %434, %435 : vector<8x256xf32>
    %437 = vector.extract_strided_slice %436 {offsets = [0, 0], sizes = [8, 128], strides = [1, 1]} : vector<8x256xf32> to vector<8x128xf32>
    %438 = vector.extract_strided_slice %436 {offsets = [0, 128], sizes = [8, 128], strides = [1, 1]} : vector<8x256xf32> to vector<8x128xf32>
    %439 = arith.addf %414, %437 : vector<8x128xf32>
    %cst_136 = arith.constant 0.000000e+00 : f32
    %440 = vector.broadcast %cst_136 : f32 to vector<8x128xf32>
    %441 = arith.maximumf %439, %440 : vector<8x128xf32>
    %442 = arith.truncf %441 : vector<8x128xf32> to vector<8x128xbf16>
    %cst_137 = arith.constant dense<0.000000e+00> : vector<8x128xf32>
    %443 = tpu.matmul %442, %4, %cst_137 {dimension_numbers = #tpu.dot_dimension_numbers<[1], [0], [0], [1], [0, 0, 1, 1], [], []>} : vector<8x128xbf16>, vector<128x128xbf16>, vector<8x128xf32> -> vector<8x128xf32>
    %cst_138 = arith.constant dense<0.000000e+00> : vector<8xf32>
    %444 = vector.multi_reduction <add>, %443, %cst_138 [1] : vector<8x128xf32> to vector<8xf32>
    %445 = vector.shape_cast %444 : vector<8xf32> to vector<8x1xf32>
    %cst_139 = arith.constant 1.280000e+02 : f32
    %446 = vector.broadcast %cst_139 : f32 to vector<8x1xf32>
    %447 = arith.divf %445, %446 : vector<8x1xf32>
    %448 = vector.broadcast %447 : vector<8x1xf32> to vector<8x128xf32>
    %449 = arith.subf %443, %448 : vector<8x128xf32>
    %450 = arith.mulf %449, %449 : vector<8x128xf32>
    %cst_140 = arith.constant dense<0.000000e+00> : vector<8xf32>
    %451 = vector.multi_reduction <add>, %450, %cst_140 [1] : vector<8x128xf32> to vector<8xf32>
    %452 = vector.shape_cast %451 : vector<8xf32> to vector<8x1xf32>
    %cst_141 = arith.constant 1.280000e+02 : f32
    %453 = vector.broadcast %cst_141 : f32 to vector<8x1xf32>
    %454 = arith.divf %452, %453 : vector<8x1xf32>
    %cst_142 = arith.constant 9.99999974E-6 : f32
    %455 = vector.broadcast %cst_142 : f32 to vector<8x1xf32>
    %456 = arith.addf %454, %455 : vector<8x1xf32>
    %457 = math.rsqrt %456 : vector<8x1xf32>
    %458 = vector.broadcast %457 : vector<8x1xf32> to vector<8x128xf32>
    %459 = arith.mulf %449, %458 : vector<8x128xf32>
    %460 = vector.broadcast %7 : vector<1x128xf32> to vector<8x128xf32>
    %461 = arith.mulf %459, %460 : vector<8x128xf32>
    %462 = vector.broadcast %8 : vector<1x128xf32> to vector<8x128xf32>
    %463 = arith.addf %461, %462 : vector<8x128xf32>
    %464 = arith.addf %463, %438 : vector<8x128xf32>
    %465 = arith.negf %464 : vector<8x128xf32>
    %466 = math.exp %465 : vector<8x128xf32>
    %cst_143 = arith.constant 1.000000e+00 : f32
    %467 = vector.broadcast %cst_143 : f32 to vector<8x128xf32>
    %468 = arith.addf %467, %466 : vector<8x128xf32>
    %469 = arith.divf %467, %468 : vector<8x128xf32>
    %cst_144 = arith.constant 1.000000e+00 : f32
    %470 = vector.broadcast %cst_144 : f32 to vector<8x128xf32>
    %471 = arith.subf %470, %469 : vector<8x128xf32>
    %472 = arith.mulf %471, %407 : vector<8x128xf32>
    %473 = arith.mulf %469, %441 : vector<8x128xf32>
    %474 = arith.addf %472, %473 : vector<8x128xf32>
    %475 = arith.index_cast %c6_i32 : i32 to index
    %c0_145 = arith.constant 0 : index
    %c0_146 = arith.constant 0 : index
    %476 = vector.load %arg9[%475, %c0_145, %c0_146] : memref<8x8x128xf32, #tpu.memory_space<vmem>>, vector<1x8x128xf32>
    %477 = vector.shape_cast %476 : vector<1x8x128xf32> to vector<8x128xf32>
    %478 = vector.shape_cast %474 : vector<8x128xf32> to vector<1x8x128xf32>
    tpu.vector_store %arg9[%475, %c0_145, %c0_146], %478 {strides = array<i32>} : memref<8x8x128xf32, #tpu.memory_space<vmem>>, vector<1x8x128xf32>,
    %c7_i32 = arith.constant 7 : i32
    %479 = arith.index_cast %c7_i32 : i32 to index
    %c0_147 = arith.constant 0 : index
    %c0_148 = arith.constant 0 : index
    %480 = vector.load %arg1[%479, %c0_147, %c0_148] : memref<8x8x128xf32, #tpu.memory_space<vmem>>, vector<1x8x128xf32>
    %481 = vector.shape_cast %480 : vector<1x8x128xf32> to vector<8x128xf32>
    %482 = arith.truncf %474 : vector<8x128xf32> to vector<8x128xbf16>
    %cst_149 = arith.constant dense<0.000000e+00> : vector<8x256xf32>
    %483 = tpu.matmul %482, %3, %cst_149 {dimension_numbers = #tpu.dot_dimension_numbers<[1], [0], [0], [1], [0, 0, 1, 1], [], []>} : vector<8x128xbf16>, vector<128x256xbf16>, vector<8x256xf32> -> vector<8x256xf32>
    %cst_150 = arith.constant dense<0.000000e+00> : vector<8xf32>
    %484 = vector.multi_reduction <add>, %483, %cst_150 [1] : vector<8x256xf32> to vector<8xf32>
    %485 = vector.shape_cast %484 : vector<8xf32> to vector<8x1xf32>
    %cst_151 = arith.constant 2.560000e+02 : f32
    %486 = vector.broadcast %cst_151 : f32 to vector<8x1xf32>
    %487 = arith.divf %485, %486 : vector<8x1xf32>
    %488 = vector.broadcast %487 : vector<8x1xf32> to vector<8x256xf32>
    %489 = arith.subf %483, %488 : vector<8x256xf32>
    %490 = arith.mulf %489, %489 : vector<8x256xf32>
    %cst_152 = arith.constant dense<0.000000e+00> : vector<8xf32>
    %491 = vector.multi_reduction <add>, %490, %cst_152 [1] : vector<8x256xf32> to vector<8xf32>
    %492 = vector.shape_cast %491 : vector<8xf32> to vector<8x1xf32>
    %cst_153 = arith.constant 2.560000e+02 : f32
    %493 = vector.broadcast %cst_153 : f32 to vector<8x1xf32>
    %494 = arith.divf %492, %493 : vector<8x1xf32>
    %cst_154 = arith.constant 9.99999974E-6 : f32
    %495 = vector.broadcast %cst_154 : f32 to vector<8x1xf32>
    %496 = arith.addf %494, %495 : vector<8x1xf32>
    %497 = math.rsqrt %496 : vector<8x1xf32>
    %498 = vector.broadcast %497 : vector<8x1xf32> to vector<8x256xf32>
    %499 = arith.mulf %489, %498 : vector<8x256xf32>
    %500 = vector.broadcast %5 : vector<1x256xf32> to vector<8x256xf32>
    %501 = arith.mulf %499, %500 : vector<8x256xf32>
    %502 = vector.broadcast %6 : vector<1x256xf32> to vector<8x256xf32>
    %503 = arith.addf %501, %502 : vector<8x256xf32>
    %504 = vector.extract_strided_slice %503 {offsets = [0, 0], sizes = [8, 128], strides = [1, 1]} : vector<8x256xf32> to vector<8x128xf32>
    %505 = vector.extract_strided_slice %503 {offsets = [0, 128], sizes = [8, 128], strides = [1, 1]} : vector<8x256xf32> to vector<8x128xf32>
    %506 = arith.addf %481, %504 : vector<8x128xf32>
    %cst_155 = arith.constant 0.000000e+00 : f32
    %507 = vector.broadcast %cst_155 : f32 to vector<8x128xf32>
    %508 = arith.maximumf %506, %507 : vector<8x128xf32>
    %509 = arith.truncf %508 : vector<8x128xf32> to vector<8x128xbf16>
    %cst_156 = arith.constant dense<0.000000e+00> : vector<8x128xf32>
    %510 = tpu.matmul %509, %4, %cst_156 {dimension_numbers = #tpu.dot_dimension_numbers<[1], [0], [0], [1], [0, 0, 1, 1], [], []>} : vector<8x128xbf16>, vector<128x128xbf16>, vector<8x128xf32> -> vector<8x128xf32>
    %cst_157 = arith.constant dense<0.000000e+00> : vector<8xf32>
    %511 = vector.multi_reduction <add>, %510, %cst_157 [1] : vector<8x128xf32> to vector<8xf32>
    %512 = vector.shape_cast %511 : vector<8xf32> to vector<8x1xf32>
    %cst_158 = arith.constant 1.280000e+02 : f32
    %513 = vector.broadcast %cst_158 : f32 to vector<8x1xf32>
    %514 = arith.divf %512, %513 : vector<8x1xf32>
    %515 = vector.broadcast %514 : vector<8x1xf32> to vector<8x128xf32>
    %516 = arith.subf %510, %515 : vector<8x128xf32>
    %517 = arith.mulf %516, %516 : vector<8x128xf32>
    %cst_159 = arith.constant dense<0.000000e+00> : vector<8xf32>
    %518 = vector.multi_reduction <add>, %517, %cst_159 [1] : vector<8x128xf32> to vector<8xf32>
    %519 = vector.shape_cast %518 : vector<8xf32> to vector<8x1xf32>
    %cst_160 = arith.constant 1.280000e+02 : f32
    %520 = vector.broadcast %cst_160 : f32 to vector<8x1xf32>
    %521 = arith.divf %519, %520 : vector<8x1xf32>
    %cst_161 = arith.constant 9.99999974E-6 : f32
    %522 = vector.broadcast %cst_161 : f32 to vector<8x1xf32>
    %523 = arith.addf %521, %522 : vector<8x1xf32>
    %524 = math.rsqrt %523 : vector<8x1xf32>
    %525 = vector.broadcast %524 : vector<8x1xf32> to vector<8x128xf32>
    %526 = arith.mulf %516, %525 : vector<8x128xf32>
    %527 = vector.broadcast %7 : vector<1x128xf32> to vector<8x128xf32>
    %528 = arith.mulf %526, %527 : vector<8x128xf32>
    %529 = vector.broadcast %8 : vector<1x128xf32> to vector<8x128xf32>
    %530 = arith.addf %528, %529 : vector<8x128xf32>
    %531 = arith.addf %530, %505 : vector<8x128xf32>
    %532 = arith.negf %531 : vector<8x128xf32>
    %533 = math.exp %532 : vector<8x128xf32>
    %cst_162 = arith.constant 1.000000e+00 : f32
    %534 = vector.broadcast %cst_162 : f32 to vector<8x128xf32>
    %535 = arith.addf %534, %533 : vector<8x128xf32>
    %536 = arith.divf %534, %535 : vector<8x128xf32>
    %cst_163 = arith.constant 1.000000e+00 : f32
    %537 = vector.broadcast %cst_163 : f32 to vector<8x128xf32>
    %538 = arith.subf %537, %536 : vector<8x128xf32>
    %539 = arith.mulf %538, %474 : vector<8x128xf32>
    %540 = arith.mulf %536, %508 : vector<8x128xf32>
    %541 = arith.addf %539, %540 : vector<8x128xf32>
    %542 = arith.index_cast %c7_i32 : i32 to index
    %c0_164 = arith.constant 0 : index
    %c0_165 = arith.constant 0 : index
    %543 = vector.load %arg9[%542, %c0_164, %c0_165] : memref<8x8x128xf32, #tpu.memory_space<vmem>>, vector<1x8x128xf32>
    %544 = vector.shape_cast %543 : vector<1x8x128xf32> to vector<8x128xf32>
    %545 = vector.shape_cast %541 : vector<8x128xf32> to vector<1x8x128xf32>
    tpu.vector_store %arg9[%542, %c0_164, %c0_165], %545 {strides = array<i32>} : memref<8x8x128xf32, #tpu.memory_space<vmem>>, vector<1x8x128xf32>,
    %c8_i32 = arith.constant 8 : i32
    %c0_166 = arith.constant 0 : index
    %c0_167 = arith.constant 0 : index
    %546 = vector.load %arg10[%c0_166, %c0_167] : memref<8x128xf32, #tpu.memory_space<vmem>>, vector<8x128xf32>
    tpu.vector_store %arg10[%c0_166, %c0_167], %541 {strides = array<i32>} : memref<8x128xf32, #tpu.memory_space<vmem>>, vector<8x128xf32>,
    return
  }
  func.func @transform_0(%arg0: i32) -> (i32, i32, i32) {
    %c0_i32 = arith.constant 0 : i32
    %c0_i32_0 = arith.constant 0 : i32
    %c0_i32_1 = arith.constant 0 : i32
    return %arg0, %c0_i32, %c0_i32_0 : i32, i32, i32
  }
  func.func @transform_1(%arg0: i32) -> (i32, i32) {
    %c0_i32 = arith.constant 0 : i32
    %c0_i32_0 = arith.constant 0 : i32
    %c0_i32_1 = arith.constant 0 : i32
    return %c0_i32, %c0_i32_0 : i32, i32
  }
  func.func @transform_2(%arg0: i32) -> (i32, i32) {
    %c0_i32 = arith.constant 0 : i32
    %c0_i32_0 = arith.constant 0 : i32
    %c0_i32_1 = arith.constant 0 : i32
    return %c0_i32, %c0_i32_0 : i32, i32
  }
  func.func @transform_3(%arg0: i32) -> (i32, i32) {
    %c0_i32 = arith.constant 0 : i32
    %c0_i32_0 = arith.constant 0 : i32
    %c0_i32_1 = arith.constant 0 : i32
    return %c0_i32, %c0_i32_0 : i32, i32
  }
  func.func @transform_4(%arg0: i32) -> (i32, i32) {
    %c0_i32 = arith.constant 0 : i32
    %c0_i32_0 = arith.constant 0 : i32
    %c0_i32_1 = arith.constant 0 : i32
    return %c0_i32, %c0_i32_0 : i32, i32
  }
  func.func @transform_5(%arg0: i32) -> (i32, i32) {
    %c0_i32 = arith.constant 0 : i32
    %c0_i32_0 = arith.constant 0 : i32
    %c0_i32_1 = arith.constant 0 : i32
    return %c0_i32, %c0_i32_0 : i32, i32
  }
  func.func @transform_6(%arg0: i32) -> (i32, i32) {
    %c0_i32 = arith.constant 0 : i32
    %c0_i32_0 = arith.constant 0 : i32
    %c0_i32_1 = arith.constant 0 : i32
    return %c0_i32, %c0_i32_0 : i32, i32
  }
  func.func @transform_7(%arg0: i32) -> (i32, i32) {
    %c0_i32 = arith.constant 0 : i32
    %c0_i32_0 = arith.constant 0 : i32
    %c0_i32_1 = arith.constant 0 : i32
    return %c0_i32, %c0_i32_0 : i32, i32
  }
  func.func @transform_8(%arg0: i32) -> (i32, i32, i32) {
    %c0_i32 = arith.constant 0 : i32
    %c0_i32_0 = arith.constant 0 : i32
    %c0_i32_1 = arith.constant 0 : i32
    return %arg0, %c0_i32, %c0_i32_0 : i32, i32, i32
  }
}

</mosaic_0001>

<bundles_post_ra>
// kernel: tpu_custom_call.1
= control target key start
LH: loop header
LB: loop body
LE: loop exit
PB: predicated region body
PF: predicated region fallthrough
CT: control target
= control target key end

     0   :  { %s3298_s0 = inlined_call_operand.hbm [shape: f32[16,8,128], index: 0, kind: input, shape index: {}]   ;;  %s3299_s1 = inlined_call_operand.hbm [shape: f32[8,128], index: 1, kind: input, shape index: {}]   ;;  %s3300_s2 = inlined_call_operand.hbm [shape: bf16[128,256], index: 2, kind: input, shape index: {}]   ;;  %s3301_s3 = inlined_call_operand.vmem [shape: f32[1,256], index: 3, kind: input, shape index: {}]   ;;  %s3302_s4 = inlined_call_operand.vmem [shape: f32[1,256], index: 4, kind: input, shape index: {}]   ;;  %s3303_s5 = inlined_call_operand.hbm [shape: bf16[128,128], index: 5, kind: input, shape index: {}]   ;;  %s3304_s6 = inlined_call_operand.vmem [shape: f32[1,128], index: 6, kind: input, shape index: {}]   ;;  %s3305_s7 = inlined_call_operand.vmem [shape: f32[1,128], index: 7, kind: input, shape index: {}]   ;;  %s3306_s8 = inlined_call_operand.hbm [shape: f32[16,8,128], index: 8, kind: output, shape index: {}]  }
   0x1   :  { %3311 = sst [smem:[#allocation16_spill]] %s3299_s1 }
   0x2   :  { %13 = vsyncpa [#allocation4], 0 }
   0x3   :  { %15 = vsyncpa [#allocation4 + $0x1], 0 }
   0x4   :  { %16 = vsyncpa [#allocation7], 0 }
   0x5   :  { %17 = vsyncpa [#allocation10], 0 }
   0x6   :  { %18 = vsyncpa [#allocation5], 0 }
   0x7   :  { %20 = vsyncpa [#allocation5 + $0x1], 0  ;;  %s2515_s27 = smov 0   ;;  %s2517_s28 = smov 0  }
   0x8   :  { %s2519_s29 = smov 0   ;;  %s2521_s30 = smov 0  }
   0x9 LB: > { %s2536_s9 = sadd.s32 4294967295, %s2454_s30   ;;  %s1755_s10 = sadd.s32 4294967294, %s2454_s30   ;;  %s2454_s30 = sphi %s2521_s30, %s3334_s30   ;;  %s2450_s29 = sphi %s2519_s29, %s3333_s29   ;;  %s2446_s28 = sphi %s2517_s28, %s3332_s28   ;;  %s2442_s27 = sphi %s2515_s27, %s3331_s27  }
   0xa   : > { %p46_p0 = scmp.ne.s32.totalorder %s2446_s28, %s2442_s27  ;;  %p3307_p1 = scmp.eq.s32.totalorder %s2536_s9, 0 }
   0xb   : > { %p223_p3 = scmp.eq.s32.totalorder %s1755_s10, 1  ;;  %p1756_p5 = scmp.ge.s32.totalorder %s2454_s30, 1 }
   0xc   : > { %p2545_p4 = por %p3307_p1, %p46_p0  ;;  %p230_p7 = scmp.lt.s32.totalorder %s2454_s30, 3 }
   0xd   : > { %p2550_p6 = por %p223_p3, %p46_p0  ;;  %s2456_s14 = smov [#allocation6]  }
   0xe   : > { %s3312_s11 = scalar_select %p2545_p4, 1, 0 }
   0xf   : > { %s3313_s12 = scalar_select %p2550_p6, 1, 0 }
  0x10   : > { %p2556_p9 = pnand %p1756_p5, %p230_p7  ;;  %s243_s15 = sshll.u32 %s2456_s14, 4  ;;  %s244_s15 = int_to_ptr.vmem [resolvable:$true] %s243_s15 }
  0x11   : > { %s2457_s16 = smov [#allocation8]   ;;  %s2458_s19 = smov [#allocation9]  }
  0x12   : > { %s3314_s13 = scalar_select %p2556_p9, 1, 0 }
  0x13   : > { %p2074_p11 = pneg %p2556_p9  ;;  %s253_s17 = sshll.u32 %s2457_s16, 4  ;;  %s2569_s17 = int_to_ptr.vmem [resolvable:$true] %s253_s17 }
  0x14   : > { %s2571_s20 = sshll.u32 %s2458_s19, 4  ;;  %s3316_s1 = sld [smem:[#allocation16_spill]]  ;;  %s273_s20 = int_to_ptr.vmem [resolvable:$true] %s2571_s20 }
  0x15   : > { %p2565_p12 = pnand %p2074_p11, %p3307_p1 }
  0x17   : > { %p2581_p0 = pneg %p2565_p12 }
  0x1a   : > { %s2266_s23 = scalar_lea.hbm %s3316_s1, 128 }
  0x1b   : > { %p2267_p13 = scmp.ne.s32.totalorder %s3316_s1, %s2266_s23  ;;  %p2273_p7 = scmp.lt.u32.totalorder %s2266_s23, %s3316_s1 }
  0x1d   : > { %p2269_p3 = pnand %p2581_p0, %p2267_p13 }
  0x1f   : > { %p2270_p5 = pneg %p2269_p3 }
  0x21   : > { %p2275_p11 = pnand %p2273_p7, %p2270_p5 }
  0x23   : > { %2278 = shalt.err (!%p2275_p11)
}
  0x24   : > { %s2279_s16 = scalar_lea.vmem %s244_s15, 128  ;;  %p2287_p2 = scmp.lt.s32.totalorder %s244_s15, %s244_s15 }
  0x25   : > { %p2280_p10 = scmp.ne.s32.totalorder %s244_s15, %s2279_s16  ;;  %p2288_p6 = scmp.lt.s32.totalorder %s2279_s16, %s2279_s16 }
  0x27   : > { %p2282_p8 = pnand %p2280_p10, %p2581_p0  ;;  %p2289_p4 = por %p2288_p6, %p2287_p2 }
  0x29   : > { %p2283_p1 = pneg %p2282_p8 }
  0x2b   : > { %p2290_p9 = pnand %p2289_p4, %p2283_p1 }
  0x2d   : > { %2293 = shalt.err (!%p2290_p9)
}
  0x2e   : > { %2077 = dma.hbm_to_vmem [thread:$0]  (!%p2565_p12), %s3316_s1, 128, %s244_s15, [#allocation7]  }
  0x2f   : > { %s2294_s24 = scalar_lea.hbm %s3300_s2, 2048 }
  0x30   : > { %p2295_p8 = scmp.ne.s32.totalorder %s3300_s2, %s2294_s24  ;;  %p2301_p1 = scmp.lt.u32.totalorder %s2294_s24, %s3300_s2 }
  0x32   : > { %p2297_p10 = pnand %p2295_p8, %p2581_p0 }
  0x34   : > { %p2298_p2 = pneg %p2297_p10 }
  0x36   : > { %p2303_p4 = pnand %p2301_p1, %p2298_p2 }
  0x38   : > { %2306 = shalt.err (!%p2303_p4)
}
  0x39   : > { %s2307_s15 = scalar_lea.vmem %s2569_s17, 2048  ;;  %p2315_p3 = scmp.lt.s32.totalorder %s2569_s17, %s2569_s17 }
  0x3a   : > { %p2308_p6 = scmp.ne.s32.totalorder %s2569_s17, %s2307_s15  ;;  %p2316_p5 = scmp.lt.s32.totalorder %s2307_s15, %s2307_s15 }
  0x3c   : > { %p2310_p9 = pnand %p2308_p6, %p2581_p0  ;;  %p2317_p7 = por %p2316_p5, %p2315_p3 }
  0x3e   : > { %p2311_p13 = pneg %p2310_p9 }
  0x40   : > { %p2318_p11 = pnand %p2317_p7, %p2311_p13 }
  0x42   : > { %2321 = shalt.err (!%p2318_p11)
}
  0x43   : > { %s3310_s19 = smov 128   ;;  %s2460_s21 = smov 8  }
  0x44   : > { %2080 = dma.hbm_to_vmem [thread:$0]  (!%p2565_p12), %s3300_s2, 2048, %s2569_s17, [#allocation7], %s3310_s19, %s3310_s19, %s2460_s21  }
  0x45   : > { %s2322_s10 = scalar_lea.hbm %s3303_s5, 1024 }
  0x46   : > { %p2323_p8 = scmp.ne.s32.totalorder %s3303_s5, %s2322_s10  ;;  %p2329_p1 = scmp.lt.u32.totalorder %s2322_s10, %s3303_s5 }
  0x48   : > { %p2325_p10 = pnand %p2323_p8, %p2581_p0 }
  0x4a   : > { %p2326_p2 = pneg %p2325_p10 }
  0x4c   : > { %p2331_p4 = pnand %p2329_p1, %p2326_p2 }
  0x4e   : > { %2334 = shalt.err (!%p2331_p4)
}
  0x4f   : > { %s2335_s22 = scalar_lea.vmem %s273_s20, 1024  ;;  %p2343_p3 = scmp.lt.s32.totalorder %s273_s20, %s273_s20 }
  0x50   : > { %p2336_p6 = scmp.ne.s32.totalorder %s273_s20, %s2335_s22  ;;  %p2344_p5 = scmp.lt.s32.totalorder %s2335_s22, %s2335_s22 }
  0x52   : > { %p2338_p9 = pnand %p2336_p6, %p2581_p0  ;;  %p2345_p7 = por %p2344_p5, %p2343_p3 }
  0x54   : > { %p2339_p13 = pneg %p2338_p9 }
  0x56   : > { %p2346_p11 = pnand %p2345_p7, %p2339_p13 }
  0x58   : > { %2349 = shalt.err (!%p2346_p11)
}
  0x59   : > { %s2461_s17 = smov 64   ;;  %s2462_s1 = smov 4  }
  0x5a   : > { %2083 = dma.hbm_to_vmem [thread:$0]  (!%p2565_p12), %s3303_s5, 1024, %s273_s20, [#allocation10], %s2461_s17, %s2461_s17, %s2462_s1  }
  0x5b   : > { %s2643_s24 = sadd.s32 1, %s2454_s30   ;;  %s33_s10 = sadd.s32 1, %s2450_s29 }
  0x5c   : > { %s30_s25 = ssub.s32 %s2454_s30, %s2643_s24  ;;  %p40_p8 = scmp.ne.s32.totalorder %s2450_s29, %s2446_s28 }
  0x5d   : > { %p31_p0 = scmp.eq.s32.totalorder %s30_s25, 0  ;;  %p41_p10 = scmp.eq.s32.totalorder %s2454_s30, 0 }
  0x5e   : > { %p2095_p2 = scmp.lt.s32.totalorder %s2454_s30, 2  ;;  %p3318_p4 = scmp.eq.s32.totalorder %s2536_s9, 1 }
  0x5f   : > { %s2653_s14 = scalar_select %p31_p0, %s2450_s29, %s33_s10  }
  0x60   : > { %p42_p1 = por %p41_p10, %p40_p8  ;;  %p2657_p6 = por %p3318_p4, %p40_p8 }
  0x61   : > { %s292_s18 = sand.u32 1, %s2450_s29   ;;  %s1824_s15 = sshll.u32 %s2454_s30, 10 }
  0x62   : > { %s1761_s20 = sshll.u32 %s292_s18, 6  ;;  %s2666_s1 = scalar_lea.hbm %s3298_s0, %s1824_s15 }
  0x63   : > { %s296_s26 = scalar_lea.vmem [#allocation3], %s1761_s20  ;;  %p2668_p12 = pnand %p2095_p2, %p42_p1 }
  0x64   : > { %s303_s23 = sshll.u32 %s296_s26, 4  ;;  %s2674_s10 = scalar_lea.sflag [#allocation4], %s292_s18  ;;  %s2672_s23 = int_to_ptr.vmem [resolvable:$true] %s303_s23 }
  0x65   : > { %s2350_s19 = scalar_lea.hbm %s2666_s1, 1024  ;;  %p2352_p13 = pneg %p2668_p12 }
  0x66   : > { %p2351_p9 = scmp.ne.s32.totalorder %s2666_s1, %s2350_s19  ;;  %s2355_s22 = scalar_lea.hbm %s3298_s0, 2048 }
  0x67   : > { %p2356_p7 = scmp.lt.u32.totalorder %s2666_s1, %s3298_s0  ;;  %p2357_p11 = scmp.lt.u32.totalorder %s2355_s22, %s2350_s19 }
  0x68   : > { %p2353_p3 = pnand %p2352_p13, %p2351_p9  ;;  %p2359_p8 = scmp.lt.u32.totalorder %s2350_s19, %s2666_s1 }
  0x69   : > { %p2358_p0 = por %p2357_p11, %p2356_p7 }
  0x6a   : > { %p2354_p5 = pneg %p2353_p3 }
  0x6b   : > { %p2360_p10 = por %p2359_p8, %p2358_p0 }
  0x6d   : > { %p2361_p2 = pnand %p2360_p10, %p2354_p5 }
  0x6f   : > { %2364 = shalt.err (!%p2361_p2)
}
  0x70   : > { %s2365_s18 = scalar_lea.vmem %s2672_s23, 1024  ;;  %s2463_s15 = smov [#allocation3]  }
  0x71   : > { %p2366_p1 = scmp.ne.s32.totalorder %s2672_s23, %s2365_s18  ;;  %s2370_s20 = sshll.u32 %s2463_s15, 4  ;;  %s2371_s20 = int_to_ptr.vmem [resolvable:$false] %s2370_s20 }
  0x72   : > { %s2372_s17 = scalar_lea.vmem %s2371_s20, 2048  ;;  %p2373_p3 = scmp.lt.s32.totalorder %s2672_s23, %s2371_s20 }
  0x73   : > { %p2368_p4 = pnand %p2366_p1, %p2352_p13  ;;  %p2374_p7 = scmp.lt.s32.totalorder %s2372_s17, %s2365_s18 }
  0x75   : > { %p2369_p9 = pneg %p2368_p4  ;;  %p2375_p11 = por %p2374_p7, %p2373_p3 }
  0x77   : > { %p2376_p0 = pnand %p2375_p11, %p2369_p9 }
  0x79   : > { %2379 = shalt.err (!%p2376_p0)
}
  0x7a   : > { %s3321_s19 = smov 128   ;;  %p3322_p13 = scmp.ne.s32.totalorder %s3314_s13, 0 }
  0x7b   : > { %2087 = dma.hbm_to_vmem [thread:$0]  (!%p2668_p12), %s2666_s1, 1024, %s2672_s23, %s2674_s10, %s3321_s19, %s3321_s19, %s2460_s21  }
  0x7c   : > { %315 = sbr.rel (%p3322_p13) target bundleno = 8938 (0x22ea), region = 52  ;;  %s2708_s22 = sand.u32 (!%p3322_p13), 1, %s2446_s28  }
  0x7d   : > { %s1765_s26 = sshll.u32 (!%p3322_p13), %s2708_s22, 6  ;;  %s318_s18 = scalar_lea.sflag (!%p3322_p13), [#allocation4], %s2708_s22 }
  0x7e   : > { %s2712_s15 = scalar_lea.vmem (!%p3322_p13), [#allocation3], %s1765_s26  ;;  %p3323_p5 = scmp.ne.s32.totalorder (!%p3322_p13), %s3312_s11, 0 }
  0x83   : > { %2425 = dma.done.wait (%p3323_p5), %s318_s18, 1024  }
  0x84   : > { %2427 = vsyncadd (%p3323_p5), %s318_s18, 4294966272  ;;  %p3324_p12 = scmp.eq.s32.totalorder %s2536_s9, 0 }
  0x86   : > { %2429 = dma.done.wait (%p3324_p12), [#allocation7], 2176   ;;  %p3325_p8 = pmov %p3324_p12 }
  0x88   : > { %2431 = vsyncadd (%p3325_p8), [#allocation7], 4294965120  ;;  %p3326_p10 = pmov %p3325_p8 }
  0x89   : > { %p3327_p2 = pmov %p3325_p8 }
  0x8a   : > { %2433 = dma.done.wait (%p3326_p10), [#allocation10], 1024  }
  0x8b   : > { %2435 = vsyncadd (%p3327_p2), [#allocation10], 4294966272  ;;  %s2726_s13 = scalar_lea.vmem [#allocation11], %s1765_s26  ;;  %p3328_p1 = scmp.ne.s32.totalorder %s2536_s9, 0 }
  0x8c   : > { %v373_v0 = vld [vmem:[#allocation6] sm:$0xff] (!%p3328_p1) }
  0x8d   : > { %372 = sbr.rel (%p3328_p1) target bundleno = 148 (0x94), region = 72  ;;  %374 = vst [vmem:[#allocation2] sm:$0xff] (!%p3328_p1), %v373_v0 }
  0x94 PF: > { %v2730_v1 = vld [vmem:[#allocation8 + $0x4] ss:$8 sps:$4 sm:$0xff]   ;;  %v2732_v2 = vld [vmem:[#allocation8] ss:$8 sps:$4 sm:$0xff]   ;;  %v2464_v3 = vmov 0   ;;  %v2777_v18 = vld [vmem:[#allocation2] sm:$0xff]  ;;  %v553_v43 = vlaneseq }
  0x95   : > { %526 = vmatprep.mubr.bf16.mxu0 %v2464_v3  ;;  %494 = vmatprep.subr.bf16.mxu0 %v2730_v1  ;;  %v2736_v4 = vld [vmem:[#allocation8 + $0x14] ss:$8 sps:$4 sm:$0xff]   ;;  %v2739_v5 = vld [vmem:[#allocation8 + $0x10] ss:$8 sps:$4 sm:$0xff]   ;;  %v2742_v6 = vld [vmem:[#allocation8 + $0x24] ss:$8 sps:$4 sm:$0xff]   ;;  %v413_v19 = vpack.c.bf16 %v2777_v18, %v2777_v18 }
  0x96   : > { %495 = vmatpush1.bf16.msra.mxu0 %v2732_v2  ;;  %v2745_v7 = vld [vmem:[#allocation8 + $0x20] ss:$8 sps:$4 sm:$0xff]   ;;  %v2748_v8 = vld [vmem:[#allocation8 + $0x34] ss:$8 sps:$4 sm:$0xff]   ;;  %v2750_v9 = vld [vmem:[#allocation8 + $0x30] ss:$8 sps:$4 sm:$0xff]  }
  0x97   : > { %496 = vmatprep.subr.bf16.mxu0 %v2736_v4  ;;  %v2752_v10 = vld [vmem:[#allocation8 + $0x44] ss:$8 sps:$4 sm:$0xff]   ;;  %v2756_v11 = vld [vmem:[#allocation8 + $0x40] ss:$8 sps:$4 sm:$0xff]   ;;  %v2760_v12 = vld [vmem:[#allocation8 + $0x54] ss:$8 sps:$4 sm:$0xff]  }
  0x98   : > { %v2763_v13 = vld [vmem:[#allocation8 + $0x50] ss:$8 sps:$4 sm:$0xff]   ;;  %v2766_v14 = vld [vmem:[#allocation8 + $0x64] ss:$8 sps:$4 sm:$0xff]   ;;  %v2769_v15 = vld [vmem:[#allocation8 + $0x60] ss:$8 sps:$4 sm:$0xff]  }
  0x99   : > { %v2772_v16 = vld [vmem:[#allocation8 + $0x74] ss:$8 sps:$4 sm:$0xff]   ;;  %v2775_v17 = vld [vmem:[#allocation8 + $0x70] ss:$8 sps:$4 sm:$0xff]   ;;  %v2801_v25 = vld [vmem:[#allocation9] sm:$0xff]   ;;  %v2465_v26 = vmov 0.0  }
  0x9a   : > { %497 = vmatpush1.bf16.msra.mxu0 %v2739_v5  ;;  %1898 = vmatprep.subr.bf16.mxu1 %v2465_v26  ;;  %v2810_v34 = vld [vmem:[#allocation9 + $0x8] sm:$0xff]   ;;  %v2814_v35 = vld [vmem:[#allocation9 + $0x10] sm:$0xff]   ;;  %v2818_v36 = vld [vmem:[#allocation9 + $0x18] sm:$0xff]   ;;  %vm2466_vm0 = vmmov 0   ;;  %v554_v45 = vshrl.u32 %v553_v43, 7  ;;  %s1653_s21 = sshll.u32 %s2726_s13, 4  ;;  %s3253_s21 = int_to_ptr.vmem [resolvable:$true] %s1653_s21 }
  0x9b   : > { %498 = vmatprep.subr.bf16.mxu0 %v2742_v6  ;;  %1899 = vmatpush3.bf16.msra.mxu1 %v2801_v25  ;;  %v2822_v37 = vld [vmem:[#allocation9 + $0x20] sm:$0xff]   ;;  %v2826_v38 = vld [vmem:[#allocation9 + $0x28] sm:$0xff]   ;;  %v2830_v39 = vld [vmem:[#allocation9 + $0x30] sm:$0xff]   ;;  %s1640_s10 = scalar_lea.sflag [#allocation5], %s2708_s22  ;;  %s2380_s20 = scalar_lea.vmem %s3253_s21, 1024 }
  0x9c   : > { %1900 = vmatprep.subr.bf16.mxu1 %v2465_v26  ;;  %v2833_v40 = vld [vmem:[#allocation9 + $0x38] sm:$0xff]   ;;  %1914 = vmatprep.mubr.msk.bf16.mxu1 %vm2466_vm0, %v2465_v26  ;;  %v555_v46 = vsub.s32 0, %v554_v45  ;;  %v407_v47 = vld [vmem:[%s3301_s3] sm:$0x3]  ;;  %p2381_p4 = scmp.ne.s32.totalorder %s3253_s21, %s2380_s20 }
  0x9d   : > { %v408_v48 = vld [vmem:[%s3302_s4] sm:$0x3]  ;;  %v412_v54 = vld [vmem:[%s2712_s15] sm:$0xff] }
  0x9e   : > { %499 = vmatpush1.bf16.msra.mxu0 %v2745_v7  ;;  %v2846_v49 = vrot.slane %v407_v47, %v555_v46  ;;  %v2848_v52 = vrot.slane %v408_v48, %v555_v46  ;;  %p2382_p9 = pnand %p2381_p4, %p2657_p6 }
  0x9f   : > { %500 = vmatprep.subr.bf16.mxu0 %v2748_v8  ;;  %1901 = vmatpush3.bf16.msra.mxu1 %v2810_v34 }
  0xa0   : > { %1902 = vmatprep.subr.bf16.mxu1 %v2465_v26  ;;  %p2383_p3 = pneg %p2382_p9 }
  0xa2   : > { %501 = vmatpush1.bf16.msra.mxu0 %v2750_v9 }
  0xa3   : > { %502 = vmatprep.subr.bf16.mxu0 %v2752_v10  ;;  %1903 = vmatpush3.bf16.msra.mxu1 %v2814_v35 }
  0xa4   : > { %1904 = vmatprep.subr.bf16.mxu1 %v2465_v26 }
  0xa6   : > { %503 = vmatpush1.bf16.msra.mxu0 %v2756_v11 }
  0xa7   : > { %504 = vmatprep.subr.bf16.mxu0 %v2760_v12  ;;  %1905 = vmatpush3.bf16.msra.mxu1 %v2818_v36 }
  0xa8   : > { %1906 = vmatprep.subr.bf16.mxu1 %v2465_v26 }
  0xaa   : > { %505 = vmatpush1.bf16.msra.mxu0 %v2763_v13 }
  0xab   : > { %506 = vmatprep.subr.bf16.mxu0 %v2766_v14  ;;  %1907 = vmatpush3.bf16.msra.mxu1 %v2822_v37 }
  0xac   : > { %1908 = vmatprep.subr.bf16.mxu1 %v2465_v26 }
  0xae   : > { %507 = vmatpush1.bf16.msra.mxu0 %v2769_v15 }
  0xaf   : > { %508 = vmatprep.subr.bf16.mxu0 %v2772_v16  ;;  %1909 = vmatpush3.bf16.msra.mxu1 %v2826_v38 }
  0xb0   : > { %1910 = vmatprep.subr.bf16.mxu1 %v2465_v26 }
  0xb2   : > { %509 = vmatpush1.bf16.msra.mxu0 %v2775_v17 }
  0xb3   : > { %710 = vmatprep.subr.bf16.mxu0 %v2730_v1  ;;  %1911 = vmatpush3.bf16.msra.mxu1 %v2830_v39 }
  0xb4   : > { %1912 = vmatprep.subr.bf16.mxu1 %v2465_v26 }
  0xb5   : > { %527 = vmatmul.mubr.bf16.vlgmr.msra.gmra.mrb[0].mxu0 %v413_v19 }
  0xb6   : > { %711 = vmatpush1.bf16.msra.mxu0 %v2732_v2  ;;  %742 = vmatprep.mubr.bf16.mxu0 %v2464_v3 }
  0xb7   : > { %712 = vmatprep.subr.bf16.mxu0 %v2736_v4  ;;  %1913 = vmatpush3.bf16.msra.mxu1 %v2833_v40 }
  0xb8   : > { %1918 = vmatprep.subr.bf16.mxu1 %v2465_v26 }
  0xba   : > { %713 = vmatpush1.bf16.msra.mxu0 %v2739_v5 }
  0xbb   : > { %714 = vmatprep.subr.bf16.mxu0 %v2742_v6 }
  0xbe   : > { %715 = vmatpush1.bf16.msra.mxu0 %v2745_v7 }
  0xbf   : > { %716 = vmatprep.subr.bf16.mxu0 %v2748_v8 }
  0xc2   : > { %717 = vmatpush1.bf16.msra.mxu0 %v2750_v9 }
  0xc3   : > { %718 = vmatprep.subr.bf16.mxu0 %v2752_v10 }
  0xc6   : > { %719 = vmatpush1.bf16.msra.mxu0 %v2756_v11 }
  0xc7   : > { %720 = vmatprep.subr.bf16.mxu0 %v2760_v12 }
  0xca   : > { %721 = vmatpush1.bf16.msra.mxu0 %v2763_v13 }
  0xcb   : > { %722 = vmatprep.subr.bf16.mxu0 %v2766_v14 }
  0xce   : > { %723 = vmatpush1.bf16.msra.mxu0 %v2769_v15 }
  0xcf   : > { %724 = vmatprep.subr.bf16.mxu0 %v2772_v16 }
  0xd2   : > { %725 = vmatpush1.bf16.msra.mxu0 %v2775_v17 }
  0xd3   : > { %843 = vmatprep.subr.bf16.mxu0 %v2730_v1 }
 0x188   : > { %v528_v20 = vpop.f32.mrb[0].mxu0 }
 0x189   : > { %v530_v21 = vpop.f32.mrb[1].mxu0 }
 0x18a   : > { %v532_v22 = vpop.f32.mrb[2].mxu0  ;;  %v535_v23 = vadd.f32 %v530_v21, %v528_v20 }
 0x18b   : > { %v533_v24 = vpop.f32.mrb[3].mxu0 }
 0x18c   : > { %536 = vadd.xlane.f32.xlu0 %v535_v23  ;;  %v559_v24 = vsub.s32 1, %v554_v45 }
 0x219   : > { %v537_v27 = vpop.xlane.xlu0 %536 }
 0x21a   : > { %v539_v28 = vmul.f32 0.00390625, %v537_v27  ;;  %v2871_v27 = vrot.slane %v407_v47, %v559_v24 }
 0x21c   : > { %v540_v29 = vsub.f32 %v528_v20, %v539_v28  ;;  %v2806_v30 = vsub.f32 %v530_v21, %v539_v28 }
 0x21e   : > { %v542_v31 = vmul.f32 %v540_v29, %v540_v29  ;;  %v543_v32 = vmul.f32 %v2806_v30, %v2806_v30 }
 0x220   : > { %v544_v33 = vadd.f32 %v543_v32, %v542_v31  ;;  %v2877_v31 = vld [vmem:[%s3304_s6] ss:$0 sm:$0xff]  ;;  %v2879_v32 = vrot.slane %v408_v48, %v559_v24 }
 0x222   : > { %545 = vadd.xlane.f32.xlu0 %v544_v33 }
 0x2af   : > { %v546_v41 = vpop.xlane.xlu0 %545 }
 0x2b0   : > { %v547_v42 = vmul.f32 0.00390625, %v546_v41 }
 0x2b2   : > { %v548_v44 = vadd.f32 1e-05, %v547_v42  ;;  %v2885_v42 = vld [vmem:[%s3305_s7] ss:$0 sm:$0xff] }
 0x2b4   : > { %2176 = vrsqrt.f32 %v548_v44 }
 0x2be   : > { %v2177_v50 = vpop.eup %2176 }
 0x2bf   : > { %v550_v51 = vmul.f32 %v2177_v50, %v540_v29  ;;  %v551_v28 = vmul.f32 %v2177_v50, %v2806_v30 }
 0x2c1   : > { %v563_v53 = vmul.f32 %v2846_v49, %v550_v51  ;;  %v564_v33 = vmul.f32 %v2871_v27, %v551_v28 }
 0x2c3   : > { %v576_v55 = vadd.f32 %v2848_v52, %v563_v53  ;;  %v577_v30 = vadd.f32 %v2879_v32, %v564_v33 }
 0x2c5   : > { %v578_v56 = vadd.f32 %v576_v55, %v412_v54 }
 0x2c7   : > { %v579_v57 = vmax.f32 %v578_v56, 0.0 }
 0x2c9   : > { %v580_v58 = vpack.c.bf16 %v579_v57, %v579_v57 }
 0x2cb   : > { %1915 = vmatmul.mubr.bf16.vlgmr.msra.gmra.mrb[0].mxu1 %v580_v58 }
 0x2cc   : > { %1919 = vmatpush3.bf16.msra.mxu1 %v2801_v25  ;;  %1934 = vmatprep.mubr.msk.bf16.mxu1 %vm2466_vm0, %v2465_v26 }
 0x2cd   : > { %1920 = vmatprep.subr.bf16.mxu1 %v2465_v26 }
 0x2d0   : > { %1921 = vmatpush3.bf16.msra.mxu1 %v2810_v34 }
 0x2d1   : > { %1922 = vmatprep.subr.bf16.mxu1 %v2465_v26 }
 0x2d4   : > { %1923 = vmatpush3.bf16.msra.mxu1 %v2814_v35 }
 0x2d5   : > { %1924 = vmatprep.subr.bf16.mxu1 %v2465_v26 }
 0x2d8   : > { %1925 = vmatpush3.bf16.msra.mxu1 %v2818_v36 }
 0x2d9   : > { %1926 = vmatprep.subr.bf16.mxu1 %v2465_v26 }
 0x2dc   : > { %1927 = vmatpush3.bf16.msra.mxu1 %v2822_v37 }
 0x2dd   : > { %1928 = vmatprep.subr.bf16.mxu1 %v2465_v26 }
 0x2e0   : > { %1929 = vmatpush3.bf16.msra.mxu1 %v2826_v38 }
 0x2e1   : > { %1930 = vmatprep.subr.bf16.mxu1 %v2465_v26 }
 0x2e4   : > { %1931 = vmatpush3.bf16.msra.mxu1 %v2830_v39 }
 0x2e5   : > { %1932 = vmatprep.subr.bf16.mxu1 %v2465_v26 }
 0x2e8   : > { %1933 = vmatpush3.bf16.msra.mxu1 %v2833_v40 }
 0x2e9   : > { %1938 = vmatprep.subr.bf16.mxu1 %v2465_v26 }
 0x39e   : > { %v663_v59 = vpop.f32.mrb[0].mxu1 }
 0x39f   : > { %669 = vadd.xlane.f32.xlu1 %v663_v59  ;;  %v1916_v60 = vpop.f32.mrb[1].mxu1 }
 0x3a0   : > { %v666_v61 = vpop.f32.mrb[2].mxu1 }
 0x3a1   : > { %v1917_v62 = vpop.f32.mrb[3].mxu1 }
 0x42c   : > { %v670_v63 = vpop.xlane.xlu1 %669 }
 0x42d   : > { %v672_v0 = vmul.f32 0.0078125, %v670_v63 }
 0x42f   : > { %v673_v19 = vsub.f32 %v663_v59, %v672_v0 }
 0x431   : > { %v674_v20 = vmul.f32 %v673_v19, %v673_v19 }
 0x433   : > { %675 = vadd.xlane.f32.xlu1 %v674_v20 }
 0x4c0   : > { %v676_v21 = vpop.xlane.xlu1 %675 }
 0x4c1   : > { %v677_v22 = vmul.f32 0.0078125, %v676_v21 }
 0x4c3   : > { %v678_v23 = vadd.f32 1e-05, %v677_v22 }
 0x4c5   : > { %2178 = vrsqrt.f32 %v678_v23 }
 0x4cf   : > { %v2179_v29 = vpop.eup %2178 }
 0x4d0   : > { %v680_v41 = vmul.f32 %v2179_v29, %v673_v19 }
 0x4d2   : > { %v687_v43 = vmul.f32 %v2877_v31, %v680_v41  ;;  %v1798_v41 = vld [vmem:[%s2712_s15 + $0x8] sm:$0xff] }
 0x4d4   : > { %v694_v44 = vadd.f32 %v2885_v42, %v687_v43 }
 0x4d6   : > { %v695_v45 = vadd.f32 %v694_v44, %v577_v30 }
 0x4d8   : > { %v1797_v46 = vmul.f32 -1.442695, %v695_v45 }
 0x4da   : > { %2180 = vpow2.f32 %v1797_v46 }
 0x4e4   : > { %v2181_v47 = vpop.eup %2180 }
 0x4e5   : > { %v699_v48 = vadd.f32 1.0, %v2181_v47 }
 0x4e7   : > { %2182 = vrcp.f32 %v699_v48 }
 0x4f1   : > { %v2183_v50 = vpop.eup %2182 }
 0x4f2   : > { %v702_v51 = vsub.f32 1.0, %v2183_v50  ;;  %v704_v54 = vmul.f32 %v2183_v50, %v579_v57 }
 0x4f4   : > { %v703_v53 = vmul.f32 %v702_v51, %v2777_v18 }
 0x4f6   : > { %v2891_v55 = vadd.f32 %v704_v54, %v703_v53 }
 0x4f8   : > { %706 = vst [vmem:[%s2726_s13] sm:$0xff] %v2891_v55  ;;  %v709_v56 = vpack.c.bf16 %v2891_v55, %v2891_v55 }
 0x4fa   : > { %743 = vmatmul.mubr.bf16.vlgmr.msra.gmra.mrb[4].mxu0 %v709_v56 }
 0x4fb   : > { %844 = vmatpush1.bf16.msra.mxu0 %v2732_v2  ;;  %875 = vmatprep.mubr.bf16.mxu0 %v2464_v3 }
 0x4fc   : > { %845 = vmatprep.subr.bf16.mxu0 %v2736_v4 }
 0x4ff   : > { %846 = vmatpush1.bf16.msra.mxu0 %v2739_v5 }
 0x500   : > { %847 = vmatprep.subr.bf16.mxu0 %v2742_v6 }
 0x503   : > { %848 = vmatpush1.bf16.msra.mxu0 %v2745_v7 }
 0x504   : > { %849 = vmatprep.subr.bf16.mxu0 %v2748_v8 }
 0x507   : > { %850 = vmatpush1.bf16.msra.mxu0 %v2750_v9 }
 0x508   : > { %851 = vmatprep.subr.bf16.mxu0 %v2752_v10 }
 0x50b   : > { %852 = vmatpush1.bf16.msra.mxu0 %v2756_v11 }
 0x50c   : > { %853 = vmatprep.subr.bf16.mxu0 %v2760_v12 }
 0x50f   : > { %854 = vmatpush1.bf16.msra.mxu0 %v2763_v13 }
 0x510   : > { %855 = vmatprep.subr.bf16.mxu0 %v2766_v14 }
 0x513   : > { %856 = vmatpush1.bf16.msra.mxu0 %v2769_v15 }
 0x514   : > { %857 = vmatprep.subr.bf16.mxu0 %v2772_v16 }
 0x517   : > { %858 = vmatpush1.bf16.msra.mxu0 %v2775_v17 }
 0x518   : > { %976 = vmatprep.subr.bf16.mxu0 %v2730_v1 }
 0x5cd   : > { %v744_v18 = vpop.f32.mrb[4].mxu0 }
 0x5ce   : > { %v746_v57 = vpop.f32.mrb[5].mxu0 }
 0x5cf   : > { %v748_v58 = vpop.f32.mrb[6].mxu0  ;;  %v751_v59 = vadd.f32 %v746_v57, %v744_v18 }
 0x5d0   : > { %v749_v60 = vpop.f32.mrb[7].mxu0 }
 0x5d1   : > { %752 = vadd.xlane.f32.xlu0 %v751_v59 }
 0x65e   : > { %v753_v61 = vpop.xlane.xlu0 %752 }
 0x65f   : > { %v754_v62 = vmul.f32 0.00390625, %v753_v61 }
 0x661   : > { %v755_v63 = vsub.f32 %v744_v18, %v754_v62  ;;  %v756_v0 = vsub.f32 %v746_v57, %v754_v62 }
 0x663   : > { %v757_v19 = vmul.f32 %v755_v63, %v755_v63  ;;  %v758_v20 = vmul.f32 %v756_v0, %v756_v0 }
 0x665   : > { %v759_v21 = vadd.f32 %v758_v20, %v757_v19 }
 0x667   : > { %760 = vadd.xlane.f32.xlu1 %v759_v21 }
 0x6f4   : > { %v761_v22 = vpop.xlane.xlu1 %760 }
 0x6f5   : > { %v762_v23 = vmul.f32 0.00390625, %v761_v22 }
 0x6f7   : > { %v763_v24 = vadd.f32 1e-05, %v762_v23 }
 0x6f9   : > { %2184 = vrsqrt.f32 %v763_v24 }
 0x703   : > { %v2185_v28 = vpop.eup %2184 }
 0x704   : > { %v765_v29 = vmul.f32 %v2185_v28, %v755_v63  ;;  %v766_v59 = vmul.f32 %v2185_v28, %v756_v0 }
 0x706   : > { %v767_v33 = vmul.f32 %v765_v29, %v2846_v49  ;;  %v768_v61 = vmul.f32 %v766_v59, %v2871_v27 }
 0x708   : > { %v769_v43 = vadd.f32 %v767_v33, %v2848_v52  ;;  %v770_v19 = vadd.f32 %v768_v61, %v2879_v32 }
 0x70a   : > { %v771_v30 = vadd.f32 %v1798_v41, %v769_v43 }
 0x70c   : > { %v772_v44 = vmax.f32 %v771_v30, 0.0 }
 0x70e   : > { %v773_v45 = vpack.c.bf16 %v772_v44, %v772_v44 }
 0x710   : > { %1935 = vmatmul.mubr.bf16.vlgmr.msra.gmra.mrb[4].mxu1 %v773_v45 }
 0x711   : > { %1939 = vmatpush3.bf16.msra.mxu1 %v2801_v25  ;;  %1954 = vmatprep.mubr.msk.bf16.mxu1 %vm2466_vm0, %v2465_v26 }
 0x712   : > { %1940 = vmatprep.subr.bf16.mxu1 %v2465_v26 }
 0x715   : > { %1941 = vmatpush3.bf16.msra.mxu1 %v2810_v34 }
 0x716   : > { %1942 = vmatprep.subr.bf16.mxu1 %v2465_v26 }
 0x719   : > { %1943 = vmatpush3.bf16.msra.mxu1 %v2814_v35 }
 0x71a   : > { %1944 = vmatprep.subr.bf16.mxu1 %v2465_v26 }
 0x71d   : > { %1945 = vmatpush3.bf16.msra.mxu1 %v2818_v36 }
 0x71e   : > { %1946 = vmatprep.subr.bf16.mxu1 %v2465_v26 }
 0x721   : > { %1947 = vmatpush3.bf16.msra.mxu1 %v2822_v37 }
 0x722   : > { %1948 = vmatprep.subr.bf16.mxu1 %v2465_v26 }
 0x725   : > { %1949 = vmatpush3.bf16.msra.mxu1 %v2826_v38 }
 0x726   : > { %1950 = vmatprep.subr.bf16.mxu1 %v2465_v26 }
 0x729   : > { %1951 = vmatpush3.bf16.msra.mxu1 %v2830_v39 }
 0x72a   : > { %1952 = vmatprep.subr.bf16.mxu1 %v2465_v26 }
 0x72d   : > { %1953 = vmatpush3.bf16.msra.mxu1 %v2833_v40 }
 0x72e   : > { %1958 = vmatprep.subr.bf16.mxu1 %v2465_v26 }
 0x7e3   : > { %v808_v46 = vpop.f32.mrb[4].mxu1 }
 0x7e4   : > { %814 = vadd.xlane.f32.xlu0 %v808_v46  ;;  %v1936_v47 = vpop.f32.mrb[5].mxu1 }
 0x7e5   : > { %v811_v48 = vpop.f32.mrb[6].mxu1 }
 0x7e6   : > { %v1937_v50 = vpop.f32.mrb[7].mxu1 }
 0x871   : > { %v815_v51 = vpop.xlane.xlu0 %814 }
 0x872   : > { %v816_v53 = vmul.f32 0.0078125, %v815_v51 }
 0x874   : > { %v817_v54 = vsub.f32 %v808_v46, %v816_v53 }
 0x876   : > { %v818_v56 = vmul.f32 %v817_v54, %v817_v54 }
 0x878   : > { %819 = vadd.xlane.f32.xlu1 %v818_v56 }
 0x905   : > { %v820_v18 = vpop.xlane.xlu1 %819 }
 0x906   : > { %v821_v57 = vmul.f32 0.0078125, %v820_v18 }
 0x908   : > { %v822_v58 = vadd.f32 1e-05, %v821_v57 }
 0x90a   : > { %2186 = vrsqrt.f32 %v822_v58 }
 0x914   : > { %v2187_v60 = vpop.eup %2186 }
 0x915   : > { %v824_v62 = vmul.f32 %v2187_v60, %v817_v54 }
 0x917   : > { %v825_v63 = vmul.f32 %v2877_v31, %v824_v62  ;;  %v1801_v62 = vld [vmem:[%s2712_s15 + $0x10] sm:$0xff] }
 0x919   : > { %v826_v20 = vadd.f32 %v2885_v42, %v825_v63 }
 0x91b   : > { %v827_v21 = vadd.f32 %v826_v20, %v770_v19 }
 0x91d   : > { %v1799_v22 = vmul.f32 -1.442695, %v827_v21 }
 0x91f   : > { %2188 = vpow2.f32 %v1799_v22 }
 0x929   : > { %v2189_v23 = vpop.eup %2188 }
 0x92a   : > { %v831_v24 = vadd.f32 1.0, %v2189_v23 }
 0x92c   : > { %2190 = vrcp.f32 %v831_v24 }
 0x936   : > { %v2191_v29 = vpop.eup %2190 }
 0x937   : > { %v834_v33 = vsub.f32 1.0, %v2191_v29  ;;  %v836_v28 = vmul.f32 %v2191_v29, %v772_v44 }
 0x939   : > { %v835_v0 = vmul.f32 %v834_v33, %v2891_v55 }
 0x93b   : > { %v2940_v41 = vadd.f32 %v836_v28, %v835_v0 }
 0x93d   : > { %1800 = vst [vmem:[%s2726_s13 + $0x8] sm:$0xff] %v2940_v41  ;;  %v842_v43 = vpack.c.bf16 %v2940_v41, %v2940_v41 }
 0x93f   : > { %876 = vmatmul.mubr.bf16.vlgmr.msra.gmra.mrb[8].mxu0 %v842_v43 }
 0x940   : > { %977 = vmatpush1.bf16.msra.mxu0 %v2732_v2  ;;  %1008 = vmatprep.mubr.bf16.mxu0 %v2464_v3 }
 0x941   : > { %978 = vmatprep.subr.bf16.mxu0 %v2736_v4 }
 0x944   : > { %979 = vmatpush1.bf16.msra.mxu0 %v2739_v5 }
 0x945   : > { %980 = vmatprep.subr.bf16.mxu0 %v2742_v6 }
 0x948   : > { %981 = vmatpush1.bf16.msra.mxu0 %v2745_v7 }
 0x949   : > { %982 = vmatprep.subr.bf16.mxu0 %v2748_v8 }
 0x94c   : > { %983 = vmatpush1.bf16.msra.mxu0 %v2750_v9 }
 0x94d   : > { %984 = vmatprep.subr.bf16.mxu0 %v2752_v10 }
 0x950   : > { %985 = vmatpush1.bf16.msra.mxu0 %v2756_v11 }
 0x951   : > { %986 = vmatprep.subr.bf16.mxu0 %v2760_v12 }
 0x954   : > { %987 = vmatpush1.bf16.msra.mxu0 %v2763_v13 }
 0x955   : > { %988 = vmatprep.subr.bf16.mxu0 %v2766_v14 }
 0x958   : > { %989 = vmatpush1.bf16.msra.mxu0 %v2769_v15 }
 0x959   : > { %990 = vmatprep.subr.bf16.mxu0 %v2772_v16 }
 0x95c   : > { %991 = vmatpush1.bf16.msra.mxu0 %v2775_v17 }
 0x95d   : > { %1109 = vmatprep.subr.bf16.mxu0 %v2730_v1 }
 0xa12   : > { %v877_v55 = vpop.f32.mrb[8].mxu0 }
 0xa13   : > { %v879_v30 = vpop.f32.mrb[9].mxu0 }
 0xa14   : > { %v881_v44 = vpop.f32.mrb[10].mxu0  ;;  %v884_v45 = vadd.f32 %v879_v30, %v877_v55 }
 0xa15   : > { %v882_v46 = vpop.f32.mrb[11].mxu0 }
 0xa16   : > { %885 = vadd.xlane.f32.xlu0 %v884_v45 }
 0xaa3   : > { %v886_v47 = vpop.xlane.xlu0 %885 }
 0xaa4   : > { %v887_v48 = vmul.f32 0.00390625, %v886_v47 }
 0xaa6   : > { %v888_v50 = vsub.f32 %v877_v55, %v887_v48  ;;  %v889_v51 = vsub.f32 %v879_v30, %v887_v48 }
 0xaa8   : > { %v890_v53 = vmul.f32 %v888_v50, %v888_v50  ;;  %v891_v54 = vmul.f32 %v889_v51, %v889_v51 }
 0xaaa   : > { %v892_v56 = vadd.f32 %v891_v54, %v890_v53 }
 0xaac   : > { %893 = vadd.xlane.f32.xlu1 %v892_v56 }
 0xb39   : > { %v894_v18 = vpop.xlane.xlu1 %893 }
 0xb3a   : > { %v895_v57 = vmul.f32 0.00390625, %v894_v18 }
 0xb3c   : > { %v896_v58 = vadd.f32 1e-05, %v895_v57 }
 0xb3e   : > { %2192 = vrsqrt.f32 %v896_v58 }
 0xb48   : > { %v2193_v59 = vpop.eup %2192 }
 0xb49   : > { %v898_v60 = vmul.f32 %v2193_v59, %v888_v50  ;;  %v899_v45 = vmul.f32 %v2193_v59, %v889_v51 }
 0xb4b   : > { %v900_v61 = vmul.f32 %v898_v60, %v2846_v49  ;;  %v901_v47 = vmul.f32 %v899_v45, %v2871_v27 }
 0xb4d   : > { %v902_v63 = vadd.f32 %v900_v61, %v2848_v52  ;;  %v903_v53 = vadd.f32 %v901_v47, %v2879_v32 }
 0xb4f   : > { %v904_v19 = vadd.f32 %v1801_v62, %v902_v63 }
 0xb51   : > { %v905_v20 = vmax.f32 %v904_v19, 0.0 }
 0xb53   : > { %v906_v21 = vpack.c.bf16 %v905_v20, %v905_v20 }
 0xb55   : > { %1955 = vmatmul.mubr.bf16.vlgmr.msra.gmra.mrb[8].mxu1 %v906_v21 }
 0xb56   : > { %1959 = vmatpush3.bf16.msra.mxu1 %v2801_v25  ;;  %1974 = vmatprep.mubr.msk.bf16.mxu1 %vm2466_vm0, %v2465_v26 }
 0xb57   : > { %1960 = vmatprep.subr.bf16.mxu1 %v2465_v26 }
 0xb5a   : > { %1961 = vmatpush3.bf16.msra.mxu1 %v2810_v34 }
 0xb5b   : > { %1962 = vmatprep.subr.bf16.mxu1 %v2465_v26 }
 0xb5e   : > { %1963 = vmatpush3.bf16.msra.mxu1 %v2814_v35 }
 0xb5f   : > { %1964 = vmatprep.subr.bf16.mxu1 %v2465_v26 }
 0xb62   : > { %1965 = vmatpush3.bf16.msra.mxu1 %v2818_v36 }
 0xb63   : > { %1966 = vmatprep.subr.bf16.mxu1 %v2465_v26 }
 0xb66   : > { %1967 = vmatpush3.bf16.msra.mxu1 %v2822_v37 }
 0xb67   : > { %1968 = vmatprep.subr.bf16.mxu1 %v2465_v26 }
 0xb6a   : > { %1969 = vmatpush3.bf16.msra.mxu1 %v2826_v38 }
 0xb6b   : > { %1970 = vmatprep.subr.bf16.mxu1 %v2465_v26 }
 0xb6e   : > { %1971 = vmatpush3.bf16.msra.mxu1 %v2830_v39 }
 0xb6f   : > { %1972 = vmatprep.subr.bf16.mxu1 %v2465_v26 }
 0xb72   : > { %1973 = vmatpush3.bf16.msra.mxu1 %v2833_v40 }
 0xb73   : > { %1978 = vmatprep.subr.bf16.mxu1 %v2465_v26 }
 0xc28   : > { %v941_v22 = vpop.f32.mrb[8].mxu1 }
 0xc29   : > { %947 = vadd.xlane.f32.xlu0 %v941_v22  ;;  %v1956_v23 = vpop.f32.mrb[9].mxu1 }
 0xc2a   : > { %v944_v24 = vpop.f32.mrb[10].mxu1 }
 0xc2b   : > { %v1957_v29 = vpop.f32.mrb[11].mxu1 }
 0xcb6   : > { %v948_v33 = vpop.xlane.xlu0 %947 }
 0xcb7   : > { %v949_v0 = vmul.f32 0.0078125, %v948_v33 }
 0xcb9   : > { %v950_v28 = vsub.f32 %v941_v22, %v949_v0 }
 0xcbb   : > { %v951_v43 = vmul.f32 %v950_v28, %v950_v28 }
 0xcbd   : > { %952 = vadd.xlane.f32.xlu1 %v951_v43 }
 0xd4a   : > { %v953_v55 = vpop.xlane.xlu1 %952 }
 0xd4b   : > { %v954_v30 = vmul.f32 0.0078125, %v953_v55 }
 0xd4d   : > { %v955_v44 = vadd.f32 1e-05, %v954_v30 }
 0xd4f   : > { %2194 = vrsqrt.f32 %v955_v44 }
 0xd59   : > { %v2195_v46 = vpop.eup %2194 }
 0xd5a   : > { %v957_v48 = vmul.f32 %v2195_v46, %v950_v28 }
 0xd5c   : > { %v958_v50 = vmul.f32 %v2877_v31, %v957_v48  ;;  %v1804_v48 = vld [vmem:[%s2712_s15 + $0x18] sm:$0xff] }
 0xd5e   : > { %v959_v54 = vadd.f32 %v2885_v42, %v958_v50 }
 0xd60   : > { %v960_v56 = vadd.f32 %v959_v54, %v903_v53 }
 0xd62   : > { %v1802_v18 = vmul.f32 -1.442695, %v960_v56 }
 0xd64   : > { %2196 = vpow2.f32 %v1802_v18 }
 0xd6e   : > { %v2197_v57 = vpop.eup %2196 }
 0xd6f   : > { %v964_v58 = vadd.f32 1.0, %v2197_v57 }
 0xd71   : > { %2198 = vrcp.f32 %v964_v58 }
 0xd7b   : > { %v2199_v60 = vpop.eup %2198 }
 0xd7c   : > { %v967_v61 = vsub.f32 1.0, %v2199_v60  ;;  %v969_v59 = vmul.f32 %v2199_v60, %v905_v20 }
 0xd7e   : > { %v968_v51 = vmul.f32 %v967_v61, %v2940_v41 }
 0xd80   : > { %v2989_v62 = vadd.f32 %v969_v59, %v968_v51 }
 0xd82   : > { %1803 = vst [vmem:[%s2726_s13 + $0x10] sm:$0xff] %v2989_v62  ;;  %v975_v63 = vpack.c.bf16 %v2989_v62, %v2989_v62 }
 0xd84   : > { %1009 = vmatmul.mubr.bf16.vlgmr.msra.gmra.mrb[12].mxu0 %v975_v63 }
 0xd85   : > { %1110 = vmatpush1.bf16.msra.mxu0 %v2732_v2  ;;  %1141 = vmatprep.mubr.bf16.mxu0 %v2464_v3 }
 0xd86   : > { %1111 = vmatprep.subr.bf16.mxu0 %v2736_v4 }
 0xd89   : > { %1112 = vmatpush1.bf16.msra.mxu0 %v2739_v5 }
 0xd8a   : > { %1113 = vmatprep.subr.bf16.mxu0 %v2742_v6 }
 0xd8d   : > { %1114 = vmatpush1.bf16.msra.mxu0 %v2745_v7 }
 0xd8e   : > { %1115 = vmatprep.subr.bf16.mxu0 %v2748_v8 }
 0xd91   : > { %1116 = vmatpush1.bf16.msra.mxu0 %v2750_v9 }
 0xd92   : > { %1117 = vmatprep.subr.bf16.mxu0 %v2752_v10 }
 0xd95   : > { %1118 = vmatpush1.bf16.msra.mxu0 %v2756_v11 }
 0xd96   : > { %1119 = vmatprep.subr.bf16.mxu0 %v2760_v12 }
 0xd99   : > { %1120 = vmatpush1.bf16.msra.mxu0 %v2763_v13 }
 0xd9a   : > { %1121 = vmatprep.subr.bf16.mxu0 %v2766_v14 }
 0xd9d   : > { %1122 = vmatpush1.bf16.msra.mxu0 %v2769_v15 }
 0xd9e   : > { %1123 = vmatprep.subr.bf16.mxu0 %v2772_v16 }
 0xda1   : > { %1124 = vmatpush1.bf16.msra.mxu0 %v2775_v17 }
 0xda2   : > { %1242 = vmatprep.subr.bf16.mxu0 %v2730_v1 }
 0xe57   : > { %v1010_v41 = vpop.f32.mrb[12].mxu0 }
 0xe58   : > { %v1012_v19 = vpop.f32.mrb[13].mxu0 }
 0xe59   : > { %v1014_v20 = vpop.f32.mrb[14].mxu0  ;;  %v1017_v21 = vadd.f32 %v1012_v19, %v1010_v41 }
 0xe5a   : > { %v1015_v22 = vpop.f32.mrb[15].mxu0 }
 0xe5b   : > { %1018 = vadd.xlane.f32.xlu0 %v1017_v21 }
 0xee8   : > { %v1019_v23 = vpop.xlane.xlu0 %1018 }
 0xee9   : > { %v1020_v24 = vmul.f32 0.00390625, %v1019_v23 }
 0xeeb   : > { %v1021_v29 = vsub.f32 %v1010_v41, %v1020_v24  ;;  %v1022_v33 = vsub.f32 %v1012_v19, %v1020_v24 }
 0xeed   : > { %v1023_v0 = vmul.f32 %v1021_v29, %v1021_v29  ;;  %v1024_v28 = vmul.f32 %v1022_v33, %v1022_v33 }
 0xeef   : > { %v1025_v43 = vadd.f32 %v1024_v28, %v1023_v0 }
 0xef1   : > { %1026 = vadd.xlane.f32.xlu1 %v1025_v43 }
 0xf7e   : > { %v1027_v55 = vpop.xlane.xlu1 %1026 }
 0xf7f   : > { %v1028_v30 = vmul.f32 0.00390625, %v1027_v55 }
 0xf81   : > { %v1029_v44 = vadd.f32 1e-05, %v1028_v30 }
 0xf83   : > { %2200 = vrsqrt.f32 %v1029_v44 }
 0xf8d   : > { %v2201_v45 = vpop.eup %2200 }
 0xf8e   : > { %v1031_v46 = vmul.f32 %v2201_v45, %v1021_v29  ;;  %v1032_v21 = vmul.f32 %v2201_v45, %v1022_v33 }
 0xf90   : > { %v1033_v47 = vmul.f32 %v1031_v46, %v2846_v49  ;;  %v1034_v23 = vmul.f32 %v1032_v21, %v2871_v27 }
 0xf92   : > { %v1035_v50 = vadd.f32 %v1033_v47, %v2848_v52  ;;  %v1036_v0 = vadd.f32 %v1034_v23, %v2879_v32 }
 0xf94   : > { %v1037_v53 = vadd.f32 %v1804_v48, %v1035_v50 }
 0xf96   : > { %v1038_v54 = vmax.f32 %v1037_v53, 0.0 }
 0xf98   : > { %v1039_v56 = vpack.c.bf16 %v1038_v54, %v1038_v54 }
 0xf9a   : > { %1975 = vmatmul.mubr.bf16.vlgmr.msra.gmra.mrb[12].mxu1 %v1039_v56 }
 0xf9b   : > { %1979 = vmatpush3.bf16.msra.mxu1 %v2801_v25  ;;  %1994 = vmatprep.mubr.msk.bf16.mxu1 %vm2466_vm0, %v2465_v26 }
 0xf9c   : > { %1980 = vmatprep.subr.bf16.mxu1 %v2465_v26 }
 0xf9f   : > { %1981 = vmatpush3.bf16.msra.mxu1 %v2810_v34 }
 0xfa0   : > { %1982 = vmatprep.subr.bf16.mxu1 %v2465_v26 }
 0xfa3   : > { %1983 = vmatpush3.bf16.msra.mxu1 %v2814_v35 }
 0xfa4   : > { %1984 = vmatprep.subr.bf16.mxu1 %v2465_v26 }
 0xfa7   : > { %1985 = vmatpush3.bf16.msra.mxu1 %v2818_v36 }
 0xfa8   : > { %1986 = vmatprep.subr.bf16.mxu1 %v2465_v26 }
 0xfab   : > { %1987 = vmatpush3.bf16.msra.mxu1 %v2822_v37 }
 0xfac   : > { %1988 = vmatprep.subr.bf16.mxu1 %v2465_v26 }
 0xfaf   : > { %1989 = vmatpush3.bf16.msra.mxu1 %v2826_v38 }
 0xfb0   : > { %1990 = vmatprep.subr.bf16.mxu1 %v2465_v26 }
 0xfb3   : > { %1991 = vmatpush3.bf16.msra.mxu1 %v2830_v39 }
 0xfb4   : > { %1992 = vmatprep.subr.bf16.mxu1 %v2465_v26 }
 0xfb7   : > { %1993 = vmatpush3.bf16.msra.mxu1 %v2833_v40 }
 0xfb8   : > { %1998 = vmatprep.subr.bf16.mxu1 %v2465_v26 }
0x106d   : > { %v1074_v18 = vpop.f32.mrb[12].mxu1 }
0x106e   : > { %1080 = vadd.xlane.f32.xlu0 %v1074_v18  ;;  %v1976_v57 = vpop.f32.mrb[13].mxu1 }
0x106f   : > { %v1077_v58 = vpop.f32.mrb[14].mxu1 }
0x1070   : > { %v1977_v60 = vpop.f32.mrb[15].mxu1 }
0x10fb   : > { %v1081_v61 = vpop.xlane.xlu0 %1080 }
0x10fc   : > { %v1082_v51 = vmul.f32 0.0078125, %v1081_v61 }
0x10fe   : > { %v1083_v59 = vsub.f32 %v1074_v18, %v1082_v51 }
0x1100   : > { %v1084_v63 = vmul.f32 %v1083_v59, %v1083_v59 }
0x1102   : > { %1085 = vadd.xlane.f32.xlu1 %v1084_v63 }
0x118f   : > { %v1086_v41 = vpop.xlane.xlu1 %1085 }
0x1190   : > { %v1087_v19 = vmul.f32 0.0078125, %v1086_v41 }
0x1192   : > { %v1088_v20 = vadd.f32 1e-05, %v1087_v19 }
0x1194   : > { %2202 = vrsqrt.f32 %v1088_v20 }
0x119e   : > { %v2203_v22 = vpop.eup %2202 }
0x119f   : > { %v1090_v24 = vmul.f32 %v2203_v22, %v1083_v59 }
0x11a1   : > { %v1091_v29 = vmul.f32 %v2877_v31, %v1090_v24 }
0x11a3   : > { %v1092_v28 = vadd.f32 %v2885_v42, %v1091_v29 }
0x11a5   : > { %v1093_v43 = vadd.f32 %v1092_v28, %v1036_v0 }
0x11a7   : > { %v1805_v55 = vmul.f32 -1.442695, %v1093_v43 }
0x11a9   : > { %2204 = vpow2.f32 %v1805_v55 }
0x11b3   : > { %v2205_v30 = vpop.eup %2204 }
0x11b4   : > { %v1097_v44 = vadd.f32 1.0, %v2205_v30 }
0x11b6   : > { %2206 = vrcp.f32 %v1097_v44 }
0x11c0   : > { %v2207_v46 = vpop.eup %2206 }
0x11c1   : > { %v1100_v47 = vsub.f32 1.0, %v2207_v46  ;;  %v1102_v45 = vmul.f32 %v2207_v46, %v1038_v54  ;;  %v1807_v54 = vld [vmem:[%s2712_s15 + $0x20] sm:$0xff] }
0x11c3   : > { %v1101_v33 = vmul.f32 %v1100_v47, %v2989_v62  ;;  %v3093_v47 = vld [vmem:[#allocation8] ss:$8 sps:$4 sm:$0xff]  }
0x11c5   : > { %v3038_v48 = vadd.f32 %v1102_v45, %v1101_v33  ;;  %v3097_v33 = vld [vmem:[#allocation8 + $0x14] ss:$8 sps:$4 sm:$0xff]   ;;  %v3100_v45 = vld [vmem:[#allocation8 + $0x10] ss:$8 sps:$4 sm:$0xff]  }
0x11c7   : > { %1806 = vst [vmem:[%s2726_s13 + $0x18] sm:$0xff] %v3038_v48  ;;  %v1108_v50 = vpack.c.bf16 %v3038_v48, %v3038_v48 }
0x11c9   : > { %1142 = vmatmul.mubr.bf16.vlgmr.msra.gmra.mrb[16].mxu0 %v1108_v50  ;;  %v3106_v50 = vld [vmem:[#allocation8 + $0x20] ss:$8 sps:$4 sm:$0xff]  }
0x11ca   : > { %1243 = vmatpush1.bf16.msra.mxu0 %v2732_v2  ;;  %1274 = vmatprep.mubr.bf16.mxu0 %v2464_v3 }
0x11cb   : > { %1244 = vmatprep.subr.bf16.mxu0 %v2736_v4 }
0x11ce   : > { %1245 = vmatpush1.bf16.msra.mxu0 %v2739_v5 }
0x11cf   : > { %1246 = vmatprep.subr.bf16.mxu0 %v2742_v6 }
0x11d2   : > { %1247 = vmatpush1.bf16.msra.mxu0 %v2745_v7 }
0x11d3   : > { %1248 = vmatprep.subr.bf16.mxu0 %v2748_v8 }
0x11d6   : > { %1249 = vmatpush1.bf16.msra.mxu0 %v2750_v9 }
0x11d7   : > { %1250 = vmatprep.subr.bf16.mxu0 %v2752_v10 }
0x11da   : > { %1251 = vmatpush1.bf16.msra.mxu0 %v2756_v11 }
0x11db   : > { %1252 = vmatprep.subr.bf16.mxu0 %v2760_v12 }
0x11de   : > { %1253 = vmatpush1.bf16.msra.mxu0 %v2763_v13 }
0x11df   : > { %1254 = vmatprep.subr.bf16.mxu0 %v2766_v14 }
0x11e2   : > { %1255 = vmatpush1.bf16.msra.mxu0 %v2769_v15 }
0x11e3   : > { %1256 = vmatprep.subr.bf16.mxu0 %v2772_v16 }
0x11e6   : > { %1257 = vmatpush1.bf16.msra.mxu0 %v2775_v17 }
0x11e7   : > { %1375 = vmatprep.subr.bf16.mxu0 %v2730_v1 }
0x129c   : > { %v1143_v2 = vpop.f32.mrb[16].mxu0 }
0x129d   : > { %v1145_v4 = vpop.f32.mrb[17].mxu0 }
0x129e   : > { %v1147_v5 = vpop.f32.mrb[18].mxu0  ;;  %v1150_v6 = vadd.f32 %v1145_v4, %v1143_v2 }
0x129f   : > { %v1148_v7 = vpop.f32.mrb[19].mxu0  ;;  %v3115_v5 = vld [vmem:[#allocation8 + $0x44] ss:$8 sps:$4 sm:$0xff]  }
0x12a0   : > { %1151 = vadd.xlane.f32.xlu0 %v1150_v6  ;;  %v3118_v6 = vld [vmem:[#allocation8 + $0x40] ss:$8 sps:$4 sm:$0xff]   ;;  %v3121_v7 = vld [vmem:[#allocation8 + $0x54] ss:$8 sps:$4 sm:$0xff]  }
0x132d   : > { %v1152_v8 = vpop.xlane.xlu0 %1151 }
0x132e   : > { %v1153_v9 = vmul.f32 0.00390625, %v1152_v8  ;;  %v3124_v8 = vld [vmem:[#allocation8 + $0x50] ss:$8 sps:$4 sm:$0xff]  }
0x1330   : > { %v1154_v10 = vsub.f32 %v1143_v2, %v1153_v9  ;;  %v1155_v11 = vsub.f32 %v1145_v4, %v1153_v9  ;;  %v3109_v2 = vld [vmem:[#allocation8 + $0x34] ss:$8 sps:$4 sm:$0xff]   ;;  %v3112_v4 = vld [vmem:[#allocation8 + $0x30] ss:$8 sps:$4 sm:$0xff]   ;;  %v3127_v9 = vld [vmem:[#allocation8 + $0x64] ss:$8 sps:$4 sm:$0xff]  }
0x1332   : > { %v1156_v12 = vmul.f32 %v1154_v10, %v1154_v10  ;;  %v1157_v13 = vmul.f32 %v1155_v11, %v1155_v11 }
0x1334   : > { %v1158_v14 = vadd.f32 %v1157_v13, %v1156_v12  ;;  %v3136_v12 = vld [vmem:[#allocation8 + $0x70] ss:$8 sps:$4 sm:$0xff]   ;;  %v2255_v13 = vld [vmem:[#allocation8 + $0x4] ss:$8 sps:$4 sm:$0xff]  }
0x1336   : > { %1159 = vadd.xlane.f32.xlu1 %v1158_v14 }
0x13c3   : > { %v1160_v15 = vpop.xlane.xlu1 %1159 }
0x13c4   : > { %v1161_v16 = vmul.f32 0.00390625, %v1160_v15 }
0x13c6   : > { %v1162_v17 = vadd.f32 1e-05, %v1161_v16 }
0x13c8   : > { %2208 = vrsqrt.f32 %v1162_v17 }
0x13d2   : > { %v2209_v1 = vpop.eup %2208 }
0x13d3   : > { %v1164_v62 = vmul.f32 %v2209_v1, %v1154_v10  ;;  %v3130_v10 = vld [vmem:[#allocation8 + $0x60] ss:$8 sps:$4 sm:$0xff]  }
0x13d5   : > { %v1166_v53 = vmul.f32 %v1164_v62, %v2846_v49 }
0x13d7   : > { %v1168_v56 = vadd.f32 %v1166_v53, %v2848_v52 }
0x13d9   : > { %v1170_v18 = vadd.f32 %v1807_v54, %v1168_v56 }
0x13db   : > { %v1171_v57 = vmax.f32 %v1170_v18, 0.0 }
0x13dd   : > { %v1172_v58 = vpack.c.bf16 %v1171_v57, %v1171_v57 }
0x13df   : > { %1995 = vmatmul.mubr.bf16.vlgmr.msra.gmra.mrb[16].mxu1 %v1172_v58 }
0x13e0   : > { %1999 = vmatpush3.bf16.msra.mxu1 %v2801_v25  ;;  %2014 = vmatprep.mubr.msk.bf16.mxu1 %vm2466_vm0, %v2465_v26 }
0x13e1   : > { %2000 = vmatprep.subr.bf16.mxu1 %v2465_v26 }
0x13e4   : > { %2001 = vmatpush3.bf16.msra.mxu1 %v2810_v34 }
0x13e5   : > { %2002 = vmatprep.subr.bf16.mxu1 %v2465_v26 }
0x13e8   : > { %2003 = vmatpush3.bf16.msra.mxu1 %v2814_v35 }
0x13e9   : > { %2004 = vmatprep.subr.bf16.mxu1 %v2465_v26 }
0x13ec   : > { %2005 = vmatpush3.bf16.msra.mxu1 %v2818_v36 }
0x13ed   : > { %2006 = vmatprep.subr.bf16.mxu1 %v2465_v26 }
0x13f0   : > { %2007 = vmatpush3.bf16.msra.mxu1 %v2822_v37 }
0x13f1   : > { %2008 = vmatprep.subr.bf16.mxu1 %v2465_v26 }
0x13f4   : > { %2009 = vmatpush3.bf16.msra.mxu1 %v2826_v38 }
0x13f5   : > { %2010 = vmatprep.subr.bf16.mxu1 %v2465_v26 }
0x13f8   : > { %2011 = vmatpush3.bf16.msra.mxu1 %v2830_v39  ;;  %v1165_v39 = vmul.f32 %v2209_v1, %v1155_v11  ;;  %v3133_v11 = vld [vmem:[#allocation8 + $0x74] ss:$8 sps:$4 sm:$0xff]  }
0x13f9   : > { %2012 = vmatprep.subr.bf16.mxu1 %v2465_v26 }
0x13fc   : > { %2013 = vmatpush3.bf16.msra.mxu1 %v2833_v40  ;;  %v1167_v40 = vmul.f32 %v1165_v39, %v2871_v27  ;;  %v3142_v39 = vld [vmem:[#allocation9] sm:$0xff]  }
0x13fd   : > { %2018 = vmatprep.subr.bf16.mxu1 %v2465_v26 }
0x13fe   : > { %v1169_v21 = vadd.f32 %v1167_v40, %v2879_v32  ;;  %v3152_v40 = vld [vmem:[#allocation9 + $0x10] sm:$0xff]  }
0x14b2   : > { %v1207_v25 = vpop.f32.mrb[16].mxu1 }
0x14b3   : > { %1213 = vadd.xlane.f32.xlu0 %v1207_v25  ;;  %v1996_v34 = vpop.f32.mrb[17].mxu1 }
0x14b4   : > { %v1210_v35 = vpop.f32.mrb[18].mxu1 }
0x14b5   : > { %v1997_v36 = vpop.f32.mrb[19].mxu1 }
0x1540   : > { %v1214_v37 = vpop.xlane.xlu0 %1213 }
0x1541   : > { %v1215_v60 = vmul.f32 0.0078125, %v1214_v37 }
0x1543   : > { %v1216_v61 = vsub.f32 %v1207_v25, %v1215_v60 }
0x1545   : > { %v1217_v51 = vmul.f32 %v1216_v61, %v1216_v61 }
0x1547   : > { %1218 = vadd.xlane.f32.xlu1 %v1217_v51 }
0x15d4   : > { %v1219_v38 = vpop.xlane.xlu1 %1218 }
0x15d5   : > { %v1220_v59 = vmul.f32 0.0078125, %v1219_v38 }
0x15d7   : > { %v1221_v63 = vadd.f32 1e-05, %v1220_v59 }
0x15d9   : > { %2210 = vrsqrt.f32 %v1221_v63 }
0x15e3   : > { %v2211_v41 = vpop.eup %2210 }
0x15e4   : > { %v1223_v19 = vmul.f32 %v2211_v41, %v1216_v61  ;;  %v1810_v61 = vld [vmem:[%s2712_s15 + $0x28] sm:$0xff]  ;;  %v3148_v41 = vld [vmem:[#allocation9 + $0x8] sm:$0xff]  }
0x15e6   : > { %v1224_v20 = vmul.f32 %v2877_v31, %v1223_v19  ;;  %v3156_v19 = vld [vmem:[#allocation9 + $0x18] sm:$0xff]  }
0x15e8   : > { %v1225_v22 = vadd.f32 %v2885_v42, %v1224_v20  ;;  %v3160_v20 = vld [vmem:[#allocation9 + $0x20] sm:$0xff]  }
0x15ea   : > { %v1226_v23 = vadd.f32 %v1225_v22, %v1169_v21  ;;  %v3164_v21 = vld [vmem:[#allocation9 + $0x28] sm:$0xff]   ;;  %v3168_v22 = vld [vmem:[#allocation9 + $0x30] sm:$0xff]  }
0x15ec   : > { %v1808_v24 = vmul.f32 -1.442695, %v1226_v23  ;;  %v3172_v23 = vld [vmem:[#allocation9 + $0x38] sm:$0xff]  }
0x15ee   : > { %2212 = vpow2.f32 %v1808_v24 }
0x15f8   : > { %v2213_v29 = vpop.eup %2212 }
0x15f9   : > { %v1230_v0 = vadd.f32 1.0, %v2213_v29 }
0x15fb   : > { %2214 = vrcp.f32 %v1230_v0 }
0x1605   : > { %v2215_v28 = vpop.eup %2214 }
0x1606   : > { %v1233_v43 = vsub.f32 1.0, %v2215_v28  ;;  %v1235_v30 = vmul.f32 %v2215_v28, %v1171_v57 }
0x1608   : > { %v1234_v55 = vmul.f32 %v1233_v43, %v3038_v48  ;;  %v3103_v48 = vld [vmem:[#allocation8 + $0x24] ss:$8 sps:$4 sm:$0xff]  }
0x160a   : > { %v3087_v44 = vadd.f32 %v1235_v30, %v1234_v55 }
0x160c   : > { %1809 = vst [vmem:[%s2726_s13 + $0x20] sm:$0xff] %v3087_v44  ;;  %v1241_v46 = vpack.c.bf16 %v3087_v44, %v3087_v44 }
0x160e   : > { %1275 = vmatmul.mubr.bf16.vlgmr.msra.gmra.mrb[20].mxu0 %v1241_v46 }
0x160f   : > { %1376 = vmatpush1.bf16.msra.mxu0 %v3093_v47  ;;  %1407 = vmatprep.mubr.bf16.mxu0 %v2464_v3 }
0x1610   : > { %1377 = vmatprep.subr.bf16.mxu0 %v3097_v33 }
0x1613   : > { %1378 = vmatpush1.bf16.msra.mxu0 %v3100_v45 }
0x1614   : > { %1379 = vmatprep.subr.bf16.mxu0 %v3103_v48 }
0x1617   : > { %1380 = vmatpush1.bf16.msra.mxu0 %v3106_v50 }
0x1618   : > { %1381 = vmatprep.subr.bf16.mxu0 %v3109_v2 }
0x161b   : > { %1382 = vmatpush1.bf16.msra.mxu0 %v3112_v4 }
0x161c   : > { %1383 = vmatprep.subr.bf16.mxu0 %v3115_v5 }
0x161f   : > { %1384 = vmatpush1.bf16.msra.mxu0 %v3118_v6 }
0x1620   : > { %1385 = vmatprep.subr.bf16.mxu0 %v3121_v7 }
0x1623   : > { %1386 = vmatpush1.bf16.msra.mxu0 %v3124_v8 }
0x1624   : > { %1387 = vmatprep.subr.bf16.mxu0 %v3127_v9 }
0x1627   : > { %1388 = vmatpush1.bf16.msra.mxu0 %v3130_v10 }
0x1628   : > { %1389 = vmatprep.subr.bf16.mxu0 %v3133_v11 }
0x162b   : > { %1390 = vmatpush1.bf16.msra.mxu0 %v3136_v12 }
0x162c   : > { %1508 = vmatprep.subr.bf16.mxu0 %v2255_v13 }
0x16e1   : > { %v1276_v14 = vpop.f32.mrb[20].mxu0 }
0x16e2   : > { %v1278_v15 = vpop.f32.mrb[21].mxu0 }
0x16e3   : > { %v1280_v16 = vpop.f32.mrb[22].mxu0  ;;  %v1283_v17 = vadd.f32 %v1278_v15, %v1276_v14 }
0x16e4   : > { %v1281_v1 = vpop.f32.mrb[23].mxu0 }
0x16e5   : > { %1284 = vadd.xlane.f32.xlu0 %v1283_v17 }
0x1772   : > { %v1285_v62 = vpop.xlane.xlu0 %1284 }
0x1773   : > { %v1286_v53 = vmul.f32 0.00390625, %v1285_v62 }
0x1775   : > { %v1287_v54 = vsub.f32 %v1276_v14, %v1286_v53  ;;  %v1288_v56 = vsub.f32 %v1278_v15, %v1286_v53 }
0x1777   : > { %v1289_v18 = vmul.f32 %v1287_v54, %v1287_v54  ;;  %v1290_v57 = vmul.f32 %v1288_v56, %v1288_v56 }
0x1779   : > { %v1291_v58 = vadd.f32 %v1290_v57, %v1289_v18 }
0x177b   : > { %1292 = vadd.xlane.f32.xlu1 %v1291_v58 }
0x1808   : > { %v1293_v25 = vpop.xlane.xlu1 %1292 }
0x1809   : > { %v1294_v34 = vmul.f32 0.00390625, %v1293_v25 }
0x180b   : > { %v1295_v35 = vadd.f32 1e-05, %v1294_v34 }
0x180d   : > { %2216 = vrsqrt.f32 %v1295_v35 }
0x1817   : > { %v2217_v36 = vpop.eup %2216 }
0x1818   : > { %v1297_v37 = vmul.f32 %v2217_v36, %v1287_v54  ;;  %v1298_v16 = vmul.f32 %v2217_v36, %v1288_v56 }
0x181a   : > { %v1299_v60 = vmul.f32 %v1297_v37, %v2846_v49  ;;  %v1300_v1 = vmul.f32 %v1298_v16, %v2871_v27 }
0x181c   : > { %v1301_v51 = vadd.f32 %v1299_v60, %v2848_v52  ;;  %v1302_v54 = vadd.f32 %v1300_v1, %v2879_v32 }
0x181e   : > { %v1303_v38 = vadd.f32 %v1810_v61, %v1301_v51  ;;  %v1813_v61 = vld [vmem:[%s2712_s15 + $0x30] sm:$0xff] }
0x1820   : > { %v1304_v59 = vmax.f32 %v1303_v38, 0.0 }
0x1822   : > { %v1305_v63 = vpack.c.bf16 %v1304_v59, %v1304_v59 }
0x1824   : > { %2015 = vmatmul.mubr.bf16.vlgmr.msra.gmra.mrb[20].mxu1 %v1305_v63 }
0x1825   : > { %2019 = vmatpush3.bf16.msra.mxu1 %v3142_v39  ;;  %2034 = vmatprep.mubr.msk.bf16.mxu1 %vm2466_vm0, %v2465_v26 }
0x1826   : > { %2020 = vmatprep.subr.bf16.mxu1 %v2465_v26 }
0x1829   : > { %2021 = vmatpush3.bf16.msra.mxu1 %v3148_v41 }
0x182a   : > { %2022 = vmatprep.subr.bf16.mxu1 %v2465_v26 }
0x182d   : > { %2023 = vmatpush3.bf16.msra.mxu1 %v3152_v40 }
0x182e   : > { %2024 = vmatprep.subr.bf16.mxu1 %v2465_v26 }
0x1831   : > { %2025 = vmatpush3.bf16.msra.mxu1 %v3156_v19 }
0x1832   : > { %2026 = vmatprep.subr.bf16.mxu1 %v2465_v26 }
0x1835   : > { %2027 = vmatpush3.bf16.msra.mxu1 %v3160_v20 }
0x1836   : > { %2028 = vmatprep.subr.bf16.mxu1 %v2465_v26 }
0x1839   : > { %2029 = vmatpush3.bf16.msra.mxu1 %v3164_v21 }
0x183a   : > { %2030 = vmatprep.subr.bf16.mxu1 %v2465_v26 }
0x183d   : > { %2031 = vmatpush3.bf16.msra.mxu1 %v3168_v22 }
0x183e   : > { %2032 = vmatprep.subr.bf16.mxu1 %v2465_v26 }
0x1841   : > { %2033 = vmatpush3.bf16.msra.mxu1 %v3172_v23 }
0x1842   : > { %2038 = vmatprep.subr.bf16.mxu1 %v2465_v26 }
0x18f7   : > { %v1340_v24 = vpop.f32.mrb[20].mxu1 }
0x18f8   : > { %1346 = vadd.xlane.f32.xlu0 %v1340_v24  ;;  %v2016_v29 = vpop.f32.mrb[21].mxu1 }
0x18f9   : > { %v1343_v0 = vpop.f32.mrb[22].mxu1 }
0x18fa   : > { %v2017_v28 = vpop.f32.mrb[23].mxu1 }
0x1985   : > { %v1347_v43 = vpop.xlane.xlu0 %1346 }
0x1986   : > { %v1348_v55 = vmul.f32 0.0078125, %v1347_v43 }
0x1988   : > { %v1349_v30 = vsub.f32 %v1340_v24, %v1348_v55 }
0x198a   : > { %v1350_v46 = vmul.f32 %v1349_v30, %v1349_v30 }
0x198c   : > { %1351 = vadd.xlane.f32.xlu1 %v1350_v46 }
0x1a19   : > { %v1352_v13 = vpop.xlane.xlu1 %1351 }
0x1a1a   : > { %v1353_v14 = vmul.f32 0.0078125, %v1352_v13 }
0x1a1c   : > { %v1354_v15 = vadd.f32 1e-05, %v1353_v14  ;;  %v3234_v14 = vld [vmem:[%s3305_s7] ss:$0 sm:$0xff] }
0x1a1e   : > { %2218 = vrsqrt.f32 %v1354_v15 }
0x1a28   : > { %v2219_v17 = vpop.eup %2218 }
0x1a29   : > { %v1356_v62 = vmul.f32 %v2219_v17, %v1349_v30 }
0x1a2b   : > { %v1357_v53 = vmul.f32 %v2877_v31, %v1356_v62 }
0x1a2d   : > { %v1358_v18 = vadd.f32 %v2885_v42, %v1357_v53 }
0x1a2f   : > { %v1359_v57 = vadd.f32 %v1358_v18, %v1302_v54 }
0x1a31   : > { %v1811_v58 = vmul.f32 -1.442695, %v1359_v57 }
0x1a33   : > { %2220 = vpow2.f32 %v1811_v58 }
0x1a3d   : > { %v2221_v25 = vpop.eup %2220 }
0x1a3e   : > { %v1363_v34 = vadd.f32 1.0, %v2221_v25 }
0x1a40   : > { %2222 = vrcp.f32 %v1363_v34 }
0x1a4a   : > { %v2223_v35 = vpop.eup %2222 }
0x1a4b   : > { %v1366_v37 = vsub.f32 1.0, %v2223_v35  ;;  %v1368_v36 = vmul.f32 %v2223_v35, %v1304_v59 }
0x1a4d   : > { %v1367_v56 = vmul.f32 %v1366_v37, %v3087_v44 }
0x1a4f   : > { %v3181_v60 = vadd.f32 %v1368_v36, %v1367_v56 }
0x1a51   : > { %1812 = vst [vmem:[%s2726_s13 + $0x28] sm:$0xff] %v3181_v60  ;;  %v1374_v31 = vpack.c.bf16 %v3181_v60, %v3181_v60 }
0x1a53   : > { %1408 = vmatmul.mubr.bf16.vlgmr.msra.gmra.mrb[24].mxu0 %v1374_v31 }
0x1a54   : > { %1509 = vmatpush1.bf16.msra.mxu0 %v3093_v47  ;;  %1540 = vmatprep.mubr.bf16.mxu0 %v2464_v3 }
0x1a55   : > { %1510 = vmatprep.subr.bf16.mxu0 %v3097_v33 }
0x1a58   : > { %1511 = vmatpush1.bf16.msra.mxu0 %v3100_v45 }
0x1a59   : > { %1512 = vmatprep.subr.bf16.mxu0 %v3103_v48 }
0x1a5c   : > { %1513 = vmatpush1.bf16.msra.mxu0 %v3106_v50 }
0x1a5d   : > { %1514 = vmatprep.subr.bf16.mxu0 %v3109_v2 }
0x1a60   : > { %1515 = vmatpush1.bf16.msra.mxu0 %v3112_v4 }
0x1a61   : > { %1516 = vmatprep.subr.bf16.mxu0 %v3115_v5 }
0x1a64   : > { %1517 = vmatpush1.bf16.msra.mxu0 %v3118_v6 }
0x1a65   : > { %1518 = vmatprep.subr.bf16.mxu0 %v3121_v7 }
0x1a68   : > { %1519 = vmatpush1.bf16.msra.mxu0 %v3124_v8 }
0x1a69   : > { %1520 = vmatprep.subr.bf16.mxu0 %v3127_v9 }
0x1a6c   : > { %1521 = vmatpush1.bf16.msra.mxu0 %v3130_v10 }
0x1a6d   : > { %1522 = vmatprep.subr.bf16.mxu0 %v3133_v11 }
0x1a70   : > { %1523 = vmatpush1.bf16.msra.mxu0 %v3136_v12 }
0x1b26   : > { %v1409_v3 = vpop.f32.mrb[24].mxu0 }
0x1b27   : > { %v1411_v42 = vpop.f32.mrb[25].mxu0 }
0x1b28   : > { %v1413_v44 = vpop.f32.mrb[26].mxu0  ;;  %v1416_v47 = vadd.f32 %v1411_v42, %v1409_v3 }
0x1b29   : > { %v1414_v33 = vpop.f32.mrb[27].mxu0 }
0x1b2a   : > { %1417 = vadd.xlane.f32.xlu0 %v1416_v47 }
0x1bb7   : > { %v1418_v45 = vpop.xlane.xlu0 %1417 }
0x1bb8   : > { %v1419_v48 = vmul.f32 0.00390625, %v1418_v45 }
0x1bba   : > { %v1420_v50 = vsub.f32 %v1409_v3, %v1419_v48  ;;  %v1421_v2 = vsub.f32 %v1411_v42, %v1419_v48 }
0x1bbc   : > { %v1422_v4 = vmul.f32 %v1420_v50, %v1420_v50  ;;  %v1423_v5 = vmul.f32 %v1421_v2, %v1421_v2 }
0x1bbe   : > { %v1424_v6 = vadd.f32 %v1423_v5, %v1422_v4 }
0x1bc0   : > { %1425 = vadd.xlane.f32.xlu1 %v1424_v6  ;;  %v1816_v6 = vld [vmem:[%s2712_s15 + $0x38] sm:$0xff]  ;;  %s1825_s15 = sshll.u32 %s2536_s9, 10  ;;  %s2467_s9 = smov [#allocation11]  }
0x1bc1   : > { %s3251_s25 = scalar_lea.hbm %s3306_s8, %s1825_s15  ;;  %s2384_s17 = sshll.u32 %s2467_s9, 4  ;;  %s2385_s17 = int_to_ptr.vmem [resolvable:$false] %s2384_s17 }
0x1bc2   : > { %s2386_s19 = scalar_lea.vmem %s2385_s17, 2048  ;;  %p2387_p7 = scmp.lt.s32.totalorder %s3253_s21, %s2385_s17 }
0x1bc3   : > { %p2388_p11 = scmp.lt.s32.totalorder %s2386_s19, %s2380_s20 }
0x1bc5   : > { %p2389_p0 = por %p2388_p11, %p2387_p7 }
0x1bc7   : > { %p2390_p13 = pnand %p2389_p0, %p2383_p3 }
0x1c4d   : > { %v1426_v7 = vpop.xlane.xlu1 %1425 }
0x1c4e   : > { %v1427_v8 = vmul.f32 0.00390625, %v1426_v7 }
0x1c50   : > { %v1428_v9 = vadd.f32 1e-05, %v1427_v8 }
0x1c52   : > { %2224 = vrsqrt.f32 %v1428_v9 }
0x1c5c   : > { %v2225_v10 = vpop.eup %2224 }
0x1c5d   : > { %v1430_v11 = vmul.f32 %v2225_v10, %v1420_v50  ;;  %v1431_v55 = vmul.f32 %v2225_v10, %v1421_v2 }
0x1c5f   : > { %v1432_v12 = vmul.f32 %v1430_v11, %v2846_v49 }
0x1c61   : > { %v1434_v51 = vadd.f32 %v1432_v12, %v2848_v52 }
0x1c63   : > { %v1436_v38 = vadd.f32 %v1813_v61, %v1434_v51 }
0x1c65   : > { %v1437_v59 = vmax.f32 %v1436_v38, 0.0 }
0x1c67   : > { %v1438_v63 = vpack.c.bf16 %v1437_v59, %v1437_v59 }
0x1c69   : > { %2035 = vmatmul.mubr.bf16.vlgmr.msra.gmra.mrb[24].mxu1 %v1438_v63 }
0x1c6a   : > { %2039 = vmatpush3.bf16.msra.mxu1 %v3142_v39  ;;  %2054 = vmatprep.mubr.msk.bf16.mxu1 %vm2466_vm0, %v2465_v26 }
0x1c6b   : > { %2040 = vmatprep.subr.bf16.mxu1 %v2465_v26 }
0x1c6e   : > { %2041 = vmatpush3.bf16.msra.mxu1 %v3148_v41 }
0x1c6f   : > { %2042 = vmatprep.subr.bf16.mxu1 %v2465_v26 }
0x1c72   : > { %2043 = vmatpush3.bf16.msra.mxu1 %v3152_v40 }
0x1c73   : > { %2044 = vmatprep.subr.bf16.mxu1 %v2465_v26 }
0x1c76   : > { %2045 = vmatpush3.bf16.msra.mxu1 %v3156_v19 }
0x1c77   : > { %2046 = vmatprep.subr.bf16.mxu1 %v2465_v26 }
0x1c7a   : > { %2047 = vmatpush3.bf16.msra.mxu1 %v3160_v20 }
0x1c7b   : > { %2048 = vmatprep.subr.bf16.mxu1 %v2465_v26 }
0x1c7e   : > { %2049 = vmatpush3.bf16.msra.mxu1 %v3164_v21 }
0x1c7f   : > { %2050 = vmatprep.subr.bf16.mxu1 %v2465_v26 }
0x1c82   : > { %2051 = vmatpush3.bf16.msra.mxu1 %v3168_v22 }
0x1c83   : > { %2052 = vmatprep.subr.bf16.mxu1 %v2465_v26  ;;  %v1433_v26 = vmul.f32 %v1431_v55, %v2871_v27 }
0x1c85   : > { %v1435_v13 = vadd.f32 %v1433_v26, %v2879_v32 }
0x1c86   : > { %2053 = vmatpush3.bf16.msra.mxu1 %v3172_v23  ;;  %v3227_v23 = vld [vmem:[%s3304_s6] ss:$0 sm:$0xff] }
0x1d3c   : > { %v1473_v39 = vpop.f32.mrb[24].mxu1 }
0x1d3d   : > { %1479 = vadd.xlane.f32.xlu0 %v1473_v39  ;;  %v2036_v41 = vpop.f32.mrb[25].mxu1 }
0x1d3e   : > { %v1476_v40 = vpop.f32.mrb[26].mxu1 }
0x1d3f   : > { %v2037_v19 = vpop.f32.mrb[27].mxu1 }
0x1dca   : > { %v1480_v24 = vpop.xlane.xlu0 %1479 }
0x1dcb   : > { %v1481_v29 = vmul.f32 0.0078125, %v1480_v24 }
0x1dcd   : > { %v1482_v20 = vsub.f32 %v1473_v39, %v1481_v29 }
0x1dcf   : > { %v1483_v0 = vmul.f32 %v1482_v20, %v1482_v20 }
0x1dd1   : > { %1484 = vadd.xlane.f32.xlu1 %v1483_v0 }
0x1e5e   : > { %v1485_v28 = vpop.xlane.xlu1 %1484 }
0x1e5f   : > { %v1486_v21 = vmul.f32 0.0078125, %v1485_v28 }
0x1e61   : > { %v1487_v43 = vadd.f32 1e-05, %v1486_v21 }
0x1e63   : > { %2226 = vrsqrt.f32 %v1487_v43 }
0x1e6d   : > { %v2227_v22 = vpop.eup %2226 }
0x1e6e   : > { %v1489_v30 = vmul.f32 %v2227_v22, %v1482_v20 }
0x1e70   : > { %v1490_v46 = vmul.f32 %v3227_v23, %v1489_v30 }
0x1e72   : > { %v1491_v15 = vadd.f32 %v3234_v14, %v1490_v46 }
0x1e74   : > { %v1492_v16 = vadd.f32 %v1491_v15, %v1435_v13 }
0x1e76   : > { %v1814_v17 = vmul.f32 -1.442695, %v1492_v16 }
0x1e78   : > { %2228 = vpow2.f32 %v1814_v17 }
0x1e82   : > { %v2229_v1 = vpop.eup %2228 }
0x1e83   : > { %v1496_v62 = vadd.f32 1.0, %v2229_v1 }
0x1e85   : > { %2230 = vrcp.f32 %v1496_v62 }
0x1e8f   : > { %v2231_v53 = vpop.eup %2230 }
0x1e90   : > { %v1499_v54 = vsub.f32 1.0, %v2231_v53  ;;  %v1501_v57 = vmul.f32 %v2231_v53, %v1437_v59 }
0x1e92   : > { %v1500_v18 = vmul.f32 %v1499_v54, %v3181_v60 }
0x1e94   : > { %v1502_v58 = vadd.f32 %v1501_v57, %v1500_v18 }
0x1e96   : > { %1815 = vst [vmem:[%s2726_s13 + $0x30] sm:$0xff] %v1502_v58  ;;  %v1507_v25 = vpack.c.bf16 %v1502_v58, %v1502_v58 }
0x1e98   : > { %1541 = vmatmul.mubr.bf16.vlgmr.msra.gmra.mrb[28].mxu0 %v1507_v25 }
0x1f6b   : > { %v1542_v34 = vpop.f32.mrb[28].mxu0 }
0x1f6c   : > { %v1544_v35 = vpop.f32.mrb[29].mxu0 }
0x1f6d   : > { %v1546_v37 = vpop.f32.mrb[30].mxu0  ;;  %v1549_v56 = vadd.f32 %v1544_v35, %v1542_v34 }
0x1f6e   : > { %v1547_v36 = vpop.f32.mrb[31].mxu0 }
0x1f6f   : > { %1550 = vadd.xlane.f32.xlu0 %v1549_v56 }
0x1ffc   : > { %v1551_v31 = vpop.xlane.xlu0 %1550 }
0x1ffd   : > { %v1552_v3 = vmul.f32 0.00390625, %v1551_v31 }
0x1fff   : > { %v1553_v42 = vsub.f32 %v1542_v34, %v1552_v3  ;;  %v1554_v44 = vsub.f32 %v1544_v35, %v1552_v3 }
0x2001   : > { %v1555_v47 = vmul.f32 %v1553_v42, %v1553_v42  ;;  %v1556_v33 = vmul.f32 %v1554_v44, %v1554_v44 }
0x2003   : > { %v1557_v45 = vadd.f32 %v1556_v33, %v1555_v47 }
0x2005   : > { %1558 = vadd.xlane.f32.xlu1 %v1557_v45 }
0x2092   : > { %v1559_v60 = vpop.xlane.xlu1 %1558 }
0x2093   : > { %v1560_v48 = vmul.f32 0.00390625, %v1559_v60 }
0x2095   : > { %v1561_v50 = vadd.f32 1e-05, %v1560_v48 }
0x2097   : > { %2232 = vrsqrt.f32 %v1561_v50 }
0x20a1   : > { %v2233_v2 = vpop.eup %2232 }
0x20a2   : > { %v1563_v4 = vmul.f32 %v2233_v2, %v1553_v42 }
0x20a4   : > { %v1565_v5 = vmul.f32 %v1563_v4, %v2846_v49 }
0x20a6   : > { %v1567_v7 = vadd.f32 %v1565_v5, %v2848_v52  ;;  %v1564_v52 = vmul.f32 %v2233_v2, %v1554_v44 }
0x20a8   : > { %v1569_v8 = vadd.f32 %v1816_v6, %v1567_v7  ;;  %v1566_v24 = vmul.f32 %v1564_v52, %v2871_v27 }
0x20aa   : > { %v1570_v9 = vmax.f32 %v1569_v8, 0.0  ;;  %v1568_v0 = vadd.f32 %v1566_v24, %v2879_v32 }
0x20ac   : > { %v1571_v10 = vpack.c.bf16 %v1570_v9, %v1570_v9 }
0x20ae   : > { %2055 = vmatmul.mubr.bf16.vlgmr.msra.gmra.mrb[28].mxu1 %v1571_v10 }
0x2181   : > { %v1606_v11 = vpop.f32.mrb[28].mxu1 }
0x2182   : > { %1612 = vadd.xlane.f32.xlu0 %v1606_v11  ;;  %v2056_v12 = vpop.f32.mrb[29].mxu1 }
0x2183   : > { %v1609_v61 = vpop.f32.mrb[30].mxu1 }
0x2184   : > { %v2057_v51 = vpop.f32.mrb[31].mxu1 }
0x220f   : > { %v1613_v38 = vpop.xlane.xlu0 %1612 }
0x2210   : > { %v1614_v59 = vmul.f32 0.0078125, %v1613_v38 }
0x2212   : > { %v1615_v63 = vsub.f32 %v1606_v11, %v1614_v59 }
0x2214   : > { %v1616_v39 = vmul.f32 %v1615_v63, %v1615_v63 }
0x2216   : > { %1617 = vadd.xlane.f32.xlu1 %v1616_v39 }
0x22a3   : > { %v1618_v41 = vpop.xlane.xlu1 %1617 }
0x22a4   : > { %v1619_v40 = vmul.f32 0.0078125, %v1618_v41 }
0x22a6   : > { %v1620_v49 = vadd.f32 1e-05, %v1619_v40 }
0x22a8   : > { %2234 = vrsqrt.f32 %v1620_v49 }
0x22b2   : > { %v2235_v19 = vpop.eup %2234 }
0x22b3   : > { %v1622_v29 = vmul.f32 %v2235_v19, %v1615_v63 }
0x22b5   : > { %v1623_v20 = vmul.f32 %v3227_v23, %v1622_v29 }
0x22b7   : > { %v1624_v28 = vadd.f32 %v3234_v14, %v1623_v20 }
0x22b9   : > { %v1625_v21 = vadd.f32 %v1624_v28, %v1568_v0 }
0x22bb   : > { %v1817_v43 = vmul.f32 -1.442695, %v1625_v21 }
0x22bd   : > { %2236 = vpow2.f32 %v1817_v43 }
0x22c7   : > { %v2237_v55 = vpop.eup %2236 }
0x22c8   : > { %v1629_v22 = vadd.f32 1.0, %v2237_v55 }
0x22ca   : > { %2238 = vrcp.f32 %v1629_v22 }
0x22d4   : > { %v2239_v26 = vpop.eup %2238 }
0x22d5   : > { %v1632_v30 = vsub.f32 1.0, %v2239_v26  ;;  %v1634_v46 = vmul.f32 %v2239_v26, %v1570_v9 }
0x22d7   : > { %v1633_v27 = vmul.f32 %v1632_v30, %v1502_v58 }
0x22d9   : > { %v1635_v32 = vadd.f32 %v1634_v46, %v1633_v27 }
0x22db   : > { %1818 = vst [vmem:[%s2726_s13 + $0x38] sm:$0xff] %v1635_v32  ;;  %1638 = vst [vmem:[#allocation2] sm:$0xff] %v1635_v32 }
0x22dc   : > { %2393 = shalt.err (!%p2390_p13)
}
0x22dd   : > { %s2394_s13 = scalar_lea.hbm %s3251_s25, 1024  ;;  %s2398_s11 = scalar_lea.hbm %s3306_s8, 2048 }
0x22de   : > { %p2395_p5 = scmp.ne.s32.totalorder %s3251_s25, %s2394_s13  ;;  %p2399_p10 = scmp.lt.u32.totalorder %s3251_s25, %s3306_s8 }
0x22df   : > { %p2400_p2 = scmp.lt.u32.totalorder %s2398_s11, %s2394_s13  ;;  %p2402_p4 = scmp.lt.u32.totalorder %s2394_s13, %s3251_s25 }
0x22e0   : > { %p2396_p12 = pnand %p2395_p5, %p2657_p6 }
0x22e1   : > { %p2401_p1 = por %p2400_p2, %p2399_p10 }
0x22e2   : > { %p2397_p8 = pneg %p2396_p12 }
0x22e3   : > { %p2403_p9 = por %p2402_p4, %p2401_p1 }
0x22e5   : > { %p2404_p3 = pnand %p2403_p9, %p2397_p8 }
0x22e7   : > { %2407 = shalt.err (!%p2404_p3)
}
0x22e8   : > { %s2468_s23 = smov 128   ;;  %s2469_s20 = smov 8  }
0x22e9   : > { %2072 = dma.vmem_to_hbm [thread:$0]  (%p2657_p6), %s3253_s21, 1024, %s3251_s25, %s1640_s10, %s2468_s23, %s2468_s23, %s2469_s20  }
0x22ea PF: > { %s1668_s9 = sand.u32 1, %s2442_s27   ;;  %p3329_p7 = scmp.ne.s32.totalorder %s3313_s12, 0 }
0x22eb   : > { %p3330_p11 = scmp.ge.s32.totalorder %s2454_s30, 2  ;;  %s1669_s17 = scalar_lea.sflag [#allocation5], %s1668_s9 }
0x22ed   : > { %p2089_p0 = pnand %p3330_p11, %p3329_p7 }
0x22ef   : > { %2437 = dma.done.wait (!%p2089_p0), %s1669_s17, 1024  }
0x22f0   : > { %2439 = vsyncadd (!%p2089_p0), %s1669_s17, 4294966272  ;;  %p23_p13 = scmp.ge.s32.totalorder %s2643_s24, 4   ;;  %s3331_s27 = smov %s2446_s28 }
0x22f1   : > { %s3332_s28 = smov %s2450_s29  ;;  %s3333_s29 = smov %s2653_s14 }
0x22f2   : > { %s3334_s30 = smov %s2643_s24  ;;  %25 = sbr.rel (!%p23_p13) target bundleno = 9 (0x9), region = 127 }
0x22f9   :  { %1674 = vsyncpa [#allocation4], 1 }
0x22fa   :  { %1676 = vsyncpa [#allocation4 + $0x1], 1 }
0x22fb   :  { %1677 = vsyncpa [#allocation7], 1 }
0x22fc   :  { %1678 = vsyncpa [#allocation10], 1 }
0x22fd   :  { %1679 = vsyncpa [#allocation5], 1 }
0x22fe   :  { %1681 = vsyncpa [#allocation5 + $0x1], 1 }

// kernel: tpu_custom_call.1
= control target key start
LH: loop header
LB: loop body
LE: loop exit
PB: predicated region body
PF: predicated region fallthrough
CT: control target
= control target key end

     0   :  { %s3298_s0 = inlined_call_operand.hbm [shape: f32[16,8,128], index: 0, kind: input, shape index: {}]   ;;  %s3299_s1 = inlined_call_operand.hbm [shape: f32[8,128], index: 1, kind: input, shape index: {}]   ;;  %s3300_s2 = inlined_call_operand.hbm [shape: bf16[128,256], index: 2, kind: input, shape index: {}]   ;;  %s3301_s3 = inlined_call_operand.vmem [shape: f32[1,256], index: 3, kind: input, shape index: {}]   ;;  %s3302_s4 = inlined_call_operand.vmem [shape: f32[1,256], index: 4, kind: input, shape index: {}]   ;;  %s3303_s5 = inlined_call_operand.hbm [shape: bf16[128,128], index: 5, kind: input, shape index: {}]   ;;  %s3304_s6 = inlined_call_operand.vmem [shape: f32[1,128], index: 6, kind: input, shape index: {}]   ;;  %s3305_s7 = inlined_call_operand.vmem [shape: f32[1,128], index: 7, kind: input, shape index: {}]   ;;  %s3306_s8 = inlined_call_operand.hbm [shape: f32[16,8,128], index: 8, kind: output, shape index: {}]  }
   0x1   :  { %3311 = sst [smem:[#allocation16_spill]] %s3299_s1 }
   0x2   :  { %13 = vsyncpa [#allocation4], 0 }
   0x3   :  { %15 = vsyncpa [#allocation4 + $0x1], 0 }
   0x4   :  { %16 = vsyncpa [#allocation7], 0 }
   0x5   :  { %17 = vsyncpa [#allocation10], 0 }
   0x6   :  { %18 = vsyncpa [#allocation5], 0 }
   0x7   :  { %20 = vsyncpa [#allocation5 + $0x1], 0  ;;  %s2515_s27 = smov 0   ;;  %s2517_s28 = smov 0  }
   0x8   :  { %s2519_s29 = smov 0   ;;  %s2521_s30 = smov 0  }
   0x9 LB: > { %s2536_s9 = sadd.s32 4294967295, %s2454_s30   ;;  %s1755_s10 = sadd.s32 4294967294, %s2454_s30   ;;  %s2454_s30 = sphi %s2521_s30, %s3334_s30   ;;  %s2450_s29 = sphi %s2519_s29, %s3333_s29   ;;  %s2446_s28 = sphi %s2517_s28, %s3332_s28   ;;  %s2442_s27 = sphi %s2515_s27, %s3331_s27  }
   0xa   : > { %p46_p0 = scmp.ne.s32.totalorder %s2446_s28, %s2442_s27  ;;  %p3307_p1 = scmp.eq.s32.totalorder %s2536_s9, 0 }
   0xb   : > { %p223_p3 = scmp.eq.s32.totalorder %s1755_s10, 1  ;;  %p1756_p5 = scmp.ge.s32.totalorder %s2454_s30, 1 }
   0xc   : > { %p2545_p4 = por %p3307_p1, %p46_p0  ;;  %p230_p7 = scmp.lt.s32.totalorder %s2454_s30, 3 }
   0xd   : > { %p2550_p6 = por %p223_p3, %p46_p0  ;;  %s2456_s14 = smov [#allocation6]  }
   0xe   : > { %s3312_s11 = scalar_select %p2545_p4, 1, 0 }
   0xf   : > { %s3313_s12 = scalar_select %p2550_p6, 1, 0 }
  0x10   : > { %p2556_p9 = pnand %p1756_p5, %p230_p7  ;;  %s243_s15 = sshll.u32 %s2456_s14, 4  ;;  %s244_s15 = int_to_ptr.vmem [resolvable:$true] %s243_s15 }
  0x11   : > { %s2457_s16 = smov [#allocation8]   ;;  %s2458_s19 = smov [#allocation9]  }
  0x12   : > { %s3314_s13 = scalar_select %p2556_p9, 1, 0 }
  0x13   : > { %p2074_p11 = pneg %p2556_p9  ;;  %s253_s17 = sshll.u32 %s2457_s16, 4  ;;  %s2569_s17 = int_to_ptr.vmem [resolvable:$true] %s253_s17 }
  0x14   : > { %s2571_s20 = sshll.u32 %s2458_s19, 4  ;;  %s3316_s1 = sld [smem:[#allocation16_spill]]  ;;  %s273_s20 = int_to_ptr.vmem [resolvable:$true] %s2571_s20 }
  0x15   : > { %p2565_p12 = pnand %p2074_p11, %p3307_p1 }
  0x17   : > { %p2581_p0 = pneg %p2565_p12 }
  0x1a   : > { %s2266_s23 = scalar_lea.hbm %s3316_s1, 128 }
  0x1b   : > { %p2267_p13 = scmp.ne.s32.totalorder %s3316_s1, %s2266_s23  ;;  %p2273_p7 = scmp.lt.u32.totalorder %s2266_s23, %s3316_s1 }
  0x1d   : > { %p2269_p3 = pnand %p2581_p0, %p2267_p13 }
  0x1f   : > { %p2270_p5 = pneg %p2269_p3 }
  0x21   : > { %p2275_p11 = pnand %p2273_p7, %p2270_p5 }
  0x23   : > { %2278 = shalt.err (!%p2275_p11)
}
  0x24   : > { %s2279_s16 = scalar_lea.vmem %s244_s15, 128  ;;  %p2287_p2 = scmp.lt.s32.totalorder %s244_s15, %s244_s15 }
  0x25   : > { %p2280_p10 = scmp.ne.s32.totalorder %s244_s15, %s2279_s16  ;;  %p2288_p6 = scmp.lt.s32.totalorder %s2279_s16, %s2279_s16 }
  0x27   : > { %p2282_p8 = pnand %p2280_p10, %p2581_p0  ;;  %p2289_p4 = por %p2288_p6, %p2287_p2 }
  0x29   : > { %p2283_p1 = pneg %p2282_p8 }
  0x2b   : > { %p2290_p9 = pnand %p2289_p4, %p2283_p1 }
  0x2d   : > { %2293 = shalt.err (!%p2290_p9)
}
  0x2e   : > { %2077 = dma.hbm_to_vmem [thread:$0]  (!%p2565_p12), %s3316_s1, 128, %s244_s15, [#allocation7]  }
  0x2f   : > { %s2294_s24 = scalar_lea.hbm %s3300_s2, 2048 }
  0x30   : > { %p2295_p8 = scmp.ne.s32.totalorder %s3300_s2, %s2294_s24  ;;  %p2301_p1 = scmp.lt.u32.totalorder %s2294_s24, %s3300_s2 }
  0x32   : > { %p2297_p10 = pnand %p2295_p8, %p2581_p0 }
  0x34   : > { %p2298_p2 = pneg %p2297_p10 }
  0x36   : > { %p2303_p4 = pnand %p2301_p1, %p2298_p2 }
  0x38   : > { %2306 = shalt.err (!%p2303_p4)
}
  0x39   : > { %s2307_s15 = scalar_lea.vmem %s2569_s17, 2048  ;;  %p2315_p3 = scmp.lt.s32.totalorder %s2569_s17, %s2569_s17 }
  0x3a   : > { %p2308_p6 = scmp.ne.s32.totalorder %s2569_s17, %s2307_s15  ;;  %p2316_p5 = scmp.lt.s32.totalorder %s2307_s15, %s2307_s15 }
  0x3c   : > { %p2310_p9 = pnand %p2308_p6, %p2581_p0  ;;  %p2317_p7 = por %p2316_p5, %p2315_p3 }
  0x3e   : > { %p2311_p13 = pneg %p2310_p9 }
  0x40   : > { %p2318_p11 = pnand %p2317_p7, %p2311_p13 }
  0x42   : > { %2321 = shalt.err (!%p2318_p11)
}
  0x43   : > { %s3310_s19 = smov 128   ;;  %s2460_s21 = smov 8  }
  0x44   : > { %2080 = dma.hbm_to_vmem [thread:$0]  (!%p2565_p12), %s3300_s2, 2048, %s2569_s17, [#allocation7], %s3310_s19, %s3310_s19, %s2460_s21  }
  0x45   : > { %s2322_s10 = scalar_lea.hbm %s3303_s5, 1024 }
  0x46   : > { %p2323_p8 = scmp.ne.s32.totalorder %s3303_s5, %s2322_s10  ;;  %p2329_p1 = scmp.lt.u32.totalorder %s2322_s10, %s3303_s5 }
  0x48   : > { %p2325_p10 = pnand %p2323_p8, %p2581_p0 }
  0x4a   : > { %p2326_p2 = pneg %p2325_p10 }
  0x4c   : > { %p2331_p4 = pnand %p2329_p1, %p2326_p2 }
  0x4e   : > { %2334 = shalt.err (!%p2331_p4)
}
  0x4f   : > { %s2335_s22 = scalar_lea.vmem %s273_s20, 1024  ;;  %p2343_p3 = scmp.lt.s32.totalorder %s273_s20, %s273_s20 }
  0x50   : > { %p2336_p6 = scmp.ne.s32.totalorder %s273_s20, %s2335_s22  ;;  %p2344_p5 = scmp.lt.s32.totalorder %s2335_s22, %s2335_s22 }
  0x52   : > { %p2338_p9 = pnand %p2336_p6, %p2581_p0  ;;  %p2345_p7 = por %p2344_p5, %p2343_p3 }
  0x54   : > { %p2339_p13 = pneg %p2338_p9 }
  0x56   : > { %p2346_p11 = pnand %p2345_p7, %p2339_p13 }
  0x58   : > { %2349 = shalt.err (!%p2346_p11)
}
  0x59   : > { %s2461_s17 = smov 64   ;;  %s2462_s1 = smov 4  }
  0x5a   : > { %2083 = dma.hbm_to_vmem [thread:$0]  (!%p2565_p12), %s3303_s5, 1024, %s273_s20, [#allocation10], %s2461_s17, %s2461_s17, %s2462_s1  }
  0x5b   : > { %s2643_s24 = sadd.s32 1, %s2454_s30   ;;  %s33_s10 = sadd.s32 1, %s2450_s29 }
  0x5c   : > { %s30_s25 = ssub.s32 %s2454_s30, %s2643_s24  ;;  %p40_p8 = scmp.ne.s32.totalorder %s2450_s29, %s2446_s28 }
  0x5d   : > { %p31_p0 = scmp.eq.s32.totalorder %s30_s25, 0  ;;  %p41_p10 = scmp.eq.s32.totalorder %s2454_s30, 0 }
  0x5e   : > { %p2095_p2 = scmp.lt.s32.totalorder %s2454_s30, 2  ;;  %p3318_p4 = scmp.eq.s32.totalorder %s2536_s9, 1 }
  0x5f   : > { %s2653_s14 = scalar_select %p31_p0, %s2450_s29, %s33_s10  }
  0x60   : > { %p42_p1 = por %p41_p10, %p40_p8  ;;  %p2657_p6 = por %p3318_p4, %p40_p8 }
  0x61   : > { %s292_s18 = sand.u32 1, %s2450_s29   ;;  %s1824_s15 = sshll.u32 %s2454_s30, 10 }
  0x62   : > { %s1761_s20 = sshll.u32 %s292_s18, 6  ;;  %s2666_s1 = scalar_lea.hbm %s3298_s0, %s1824_s15 }
  0x63   : > { %s296_s26 = scalar_lea.vmem [#allocation3], %s1761_s20  ;;  %p2668_p12 = pnand %p2095_p2, %p42_p1 }
  0x64   : > { %s303_s23 = sshll.u32 %s296_s26, 4  ;;  %s2674_s10 = scalar_lea.sflag [#allocation4], %s292_s18  ;;  %s2672_s23 = int_to_ptr.vmem [resolvable:$true] %s303_s23 }
  0x65   : > { %s2350_s19 = scalar_lea.hbm %s2666_s1, 1024  ;;  %p2352_p13 = pneg %p2668_p12 }
  0x66   : > { %p2351_p9 = scmp.ne.s32.totalorder %s2666_s1, %s2350_s19  ;;  %s2355_s22 = scalar_lea.hbm %s3298_s0, 2048 }
  0x67   : > { %p2356_p7 = scmp.lt.u32.totalorder %s2666_s1, %s3298_s0  ;;  %p2357_p11 = scmp.lt.u32.totalorder %s2355_s22, %s2350_s19 }
  0x68   : > { %p2353_p3 = pnand %p2352_p13, %p2351_p9  ;;  %p2359_p8 = scmp.lt.u32.totalorder %s2350_s19, %s2666_s1 }
  0x69   : > { %p2358_p0 = por %p2357_p11, %p2356_p7 }
  0x6a   : > { %p2354_p5 = pneg %p2353_p3 }
  0x6b   : > { %p2360_p10 = por %p2359_p8, %p2358_p0 }
  0x6d   : > { %p2361_p2 = pnand %p2360_p10, %p2354_p5 }
  0x6f   : > { %2364 = shalt.err (!%p2361_p2)
}
  0x70   : > { %s2365_s18 = scalar_lea.vmem %s2672_s23, 1024  ;;  %s2463_s15 = smov [#allocation3]  }
  0x71   : > { %p2366_p1 = scmp.ne.s32.totalorder %s2672_s23, %s2365_s18  ;;  %s2370_s20 = sshll.u32 %s2463_s15, 4  ;;  %s2371_s20 = int_to_ptr.vmem [resolvable:$false] %s2370_s20 }
  0x72   : > { %s2372_s17 = scalar_lea.vmem %s2371_s20, 2048  ;;  %p2373_p3 = scmp.lt.s32.totalorder %s2672_s23, %s2371_s20 }
  0x73   : > { %p2368_p4 = pnand %p2366_p1, %p2352_p13  ;;  %p2374_p7 = scmp.lt.s32.totalorder %s2372_s17, %s2365_s18 }
  0x75   : > { %p2369_p9 = pneg %p2368_p4  ;;  %p2375_p11 = por %p2374_p7, %p2373_p3 }
  0x77   : > { %p2376_p0 = pnand %p2375_p11, %p2369_p9 }
  0x79   : > { %2379 = shalt.err (!%p2376_p0)
}
  0x7a   : > { %s3321_s19 = smov 128   ;;  %p3322_p13 = scmp.ne.s32.totalorder %s3314_s13, 0 }
  0x7b   : > { %2087 = dma.hbm_to_vmem [thread:$0]  (!%p2668_p12), %s2666_s1, 1024, %s2672_s23, %s2674_s10, %s3321_s19, %s3321_s19, %s2460_s21  }
  0x7c   : > { %315 = sbr.rel (%p3322_p13) target bundleno = 8938 (0x22ea), region = 52  ;;  %s2708_s22 = sand.u32 (!%p3322_p13), 1, %s2446_s28  }
  0x7d   : > { %s1765_s26 = sshll.u32 (!%p3322_p13), %s2708_s22, 6  ;;  %s318_s18 = scalar_lea.sflag (!%p3322_p13), [#allocation4], %s2708_s22 }
  0x7e   : > { %s2712_s15 = scalar_lea.vmem (!%p3322_p13), [#allocation3], %s1765_s26  ;;  %p3323_p5 = scmp.ne.s32.totalorder (!%p3322_p13), %s3312_s11, 0 }
  0x83   : > { %2425 = dma.done.wait (%p3323_p5), %s318_s18, 1024  }
  0x84   : > { %2427 = vsyncadd (%p3323_p5), %s318_s18, 4294966272  ;;  %p3324_p12 = scmp.eq.s32.totalorder %s2536_s9, 0 }
  0x86   : > { %2429 = dma.done.wait (%p3324_p12), [#allocation7], 2176   ;;  %p3325_p8 = pmov %p3324_p12 }
  0x88   : > { %2431 = vsyncadd (%p3325_p8), [#allocation7], 4294965120  ;;  %p3326_p10 = pmov %p3325_p8 }
  0x89   : > { %p3327_p2 = pmov %p3325_p8 }
  0x8a   : > { %2433 = dma.done.wait (%p3326_p10), [#allocation10], 1024  }
  0x8b   : > { %2435 = vsyncadd (%p3327_p2), [#allocation10], 4294966272  ;;  %s2726_s13 = scalar_lea.vmem [#allocation11], %s1765_s26  ;;  %p3328_p1 = scmp.ne.s32.totalorder %s2536_s9, 0 }
  0x8c   : > { %v373_v0 = vld [vmem:[#allocation6] sm:$0xff] (!%p3328_p1) }
  0x8d   : > { %372 = sbr.rel (%p3328_p1) target bundleno = 148 (0x94), region = 72  ;;  %374 = vst [vmem:[#allocation2] sm:$0xff] (!%p3328_p1), %v373_v0 }
  0x94 PF: > { %v2730_v1 = vld [vmem:[#allocation8 + $0x4] ss:$8 sps:$4 sm:$0xff]   ;;  %v2732_v2 = vld [vmem:[#allocation8] ss:$8 sps:$4 sm:$0xff]   ;;  %v2464_v3 = vmov 0   ;;  %v2777_v18 = vld [vmem:[#allocation2] sm:$0xff]  ;;  %v553_v43 = vlaneseq }
  0x95   : > { %526 = vmatprep.mubr.bf16.mxu0 %v2464_v3  ;;  %494 = vmatprep.subr.bf16.mxu0 %v2730_v1  ;;  %v2736_v4 = vld [vmem:[#allocation8 + $0x14] ss:$8 sps:$4 sm:$0xff]   ;;  %v2739_v5 = vld [vmem:[#allocation8 + $0x10] ss:$8 sps:$4 sm:$0xff]   ;;  %v2742_v6 = vld [vmem:[#allocation8 + $0x24] ss:$8 sps:$4 sm:$0xff]   ;;  %v413_v19 = vpack.c.bf16 %v2777_v18, %v2777_v18 }
  0x96   : > { %495 = vmatpush1.bf16.msra.mxu0 %v2732_v2  ;;  %v2745_v7 = vld [vmem:[#allocation8 + $0x20] ss:$8 sps:$4 sm:$0xff]   ;;  %v2748_v8 = vld [vmem:[#allocation8 + $0x34] ss:$8 sps:$4 sm:$0xff]   ;;  %v2750_v9 = vld [vmem:[#allocation8 + $0x30] ss:$8 sps:$4 sm:$0xff]  }
  0x97   : > { %496 = vmatprep.subr.bf16.mxu0 %v2736_v4  ;;  %v2752_v10 = vld [vmem:[#allocation8 + $0x44] ss:$8 sps:$4 sm:$0xff]   ;;  %v2756_v11 = vld [vmem:[#allocation8 + $0x40] ss:$8 sps:$4 sm:$0xff]   ;;  %v2760_v12 = vld [vmem:[#allocation8 + $0x54] ss:$8 sps:$4 sm:$0xff]  }
  0x98   : > { %v2763_v13 = vld [vmem:[#allocation8 + $0x50] ss:$8 sps:$4 sm:$0xff]   ;;  %v2766_v14 = vld [vmem:[#allocation8 + $0x64] ss:$8 sps:$4 sm:$0xff]   ;;  %v2769_v15 = vld [vmem:[#allocation8 + $0x60] ss:$8 sps:$4 sm:$0xff]  }
  0x99   : > { %v2772_v16 = vld [vmem:[#allocation8 + $0x74] ss:$8 sps:$4 sm:$0xff]   ;;  %v2775_v17 = vld [vmem:[#allocation8 + $0x70] ss:$8 sps:$4 sm:$0xff]   ;;  %v2801_v25 = vld [vmem:[#allocation9] sm:$0xff]   ;;  %v2465_v26 = vmov 0.0  }
  0x9a   : > { %497 = vmatpush1.bf16.msra.mxu0 %v2739_v5  ;;  %1898 = vmatprep.subr.bf16.mxu1 %v2465_v26  ;;  %v2810_v34 = vld [vmem:[#allocation9 + $0x8] sm:$0xff]   ;;  %v2814_v35 = vld [vmem:[#allocation9 + $0x10] sm:$0xff]   ;;  %v2818_v36 = vld [vmem:[#allocation9 + $0x18] sm:$0xff]   ;;  %vm2466_vm0 = vmmov 0   ;;  %v554_v45 = vshrl.u32 %v553_v43, 7  ;;  %s1653_s21 = sshll.u32 %s2726_s13, 4  ;;  %s3253_s21 = int_to_ptr.vmem [resolvable:$true] %s1653_s21 }
  0x9b   : > { %498 = vmatprep.subr.bf16.mxu0 %v2742_v6  ;;  %1899 = vmatpush3.bf16.msra.mxu1 %v2801_v25  ;;  %v2822_v37 = vld [vmem:[#allocation9 + $0x20] sm:$0xff]   ;;  %v2826_v38 = vld [vmem:[#allocation9 + $0x28] sm:$0xff]   ;;  %v2830_v39 = vld [vmem:[#allocation9 + $0x30] sm:$0xff]   ;;  %s1640_s10 = scalar_lea.sflag [#allocation5], %s2708_s22  ;;  %s2380_s20 = scalar_lea.vmem %s3253_s21, 1024 }
  0x9c   : > { %1900 = vmatprep.subr.bf16.mxu1 %v2465_v26  ;;  %v2833_v40 = vld [vmem:[#allocation9 + $0x38] sm:$0xff]   ;;  %1914 = vmatprep.mubr.msk.bf16.mxu1 %vm2466_vm0, %v2465_v26  ;;  %v555_v46 = vsub.s32 0, %v554_v45  ;;  %v407_v47 = vld [vmem:[%s3301_s3] sm:$0x3]  ;;  %p2381_p4 = scmp.ne.s32.totalorder %s3253_s21, %s2380_s20 }
  0x9d   : > { %v408_v48 = vld [vmem:[%s3302_s4] sm:$0x3]  ;;  %v412_v54 = vld [vmem:[%s2712_s15] sm:$0xff] }
  0x9e   : > { %499 = vmatpush1.bf16.msra.mxu0 %v2745_v7  ;;  %v2846_v49 = vrot.slane %v407_v47, %v555_v46  ;;  %v2848_v52 = vrot.slane %v408_v48, %v555_v46  ;;  %p2382_p9 = pnand %p2381_p4, %p2657_p6 }
  0x9f   : > { %500 = vmatprep.subr.bf16.mxu0 %v2748_v8  ;;  %1901 = vmatpush3.bf16.msra.mxu1 %v2810_v34 }
  0xa0   : > { %1902 = vmatprep.subr.bf16.mxu1 %v2465_v26  ;;  %p2383_p3 = pneg %p2382_p9 }
  0xa2   : > { %501 = vmatpush1.bf16.msra.mxu0 %v2750_v9 }
  0xa3   : > { %502 = vmatprep.subr.bf16.mxu0 %v2752_v10  ;;  %1903 = vmatpush3.bf16.msra.mxu1 %v2814_v35 }
  0xa4   : > { %1904 = vmatprep.subr.bf16.mxu1 %v2465_v26 }
  0xa6   : > { %503 = vmatpush1.bf16.msra.mxu0 %v2756_v11 }
  0xa7   : > { %504 = vmatprep.subr.bf16.mxu0 %v2760_v12  ;;  %1905 = vmatpush3.bf16.msra.mxu1 %v2818_v36 }
  0xa8   : > { %1906 = vmatprep.subr.bf16.mxu1 %v2465_v26 }
  0xaa   : > { %505 = vmatpush1.bf16.msra.mxu0 %v2763_v13 }
  0xab   : > { %506 = vmatprep.subr.bf16.mxu0 %v2766_v14  ;;  %1907 = vmatpush3.bf16.msra.mxu1 %v2822_v37 }
  0xac   : > { %1908 = vmatprep.subr.bf16.mxu1 %v2465_v26 }
  0xae   : > { %507 = vmatpush1.bf16.msra.mxu0 %v2769_v15 }
  0xaf   : > { %508 = vmatprep.subr.bf16.mxu0 %v2772_v16  ;;  %1909 = vmatpush3.bf16.msra.mxu1 %v2826_v38 }
  0xb0   : > { %1910 = vmatprep.subr.bf16.mxu1 %v2465_v26 }
  0xb2   : > { %509 = vmatpush1.bf16.msra.mxu0 %v2775_v17 }
  0xb3   : > { %710 = vmatprep.subr.bf16.mxu0 %v2730_v1  ;;  %1911 = vmatpush3.bf16.msra.mxu1 %v2830_v39 }
  0xb4   : > { %1912 = vmatprep.subr.bf16.mxu1 %v2465_v26 }
  0xb5   : > { %527 = vmatmul.mubr.bf16.vlgmr.msra.gmra.mrb[0].mxu0 %v413_v19 }
  0xb6   : > { %711 = vmatpush1.bf16.msra.mxu0 %v2732_v2  ;;  %742 = vmatprep.mubr.bf16.mxu0 %v2464_v3 }
  0xb7   : > { %712 = vmatprep.subr.bf16.mxu0 %v2736_v4  ;;  %1913 = vmatpush3.bf16.msra.mxu1 %v2833_v40 }
  0xb8   : > { %1918 = vmatprep.subr.bf16.mxu1 %v2465_v26 }
  0xba   : > { %713 = vmatpush1.bf16.msra.mxu0 %v2739_v5 }
  0xbb   : > { %714 = vmatprep.subr.bf16.mxu0 %v2742_v6 }
  0xbe   : > { %715 = vmatpush1.bf16.msra.mxu0 %v2745_v7 }
  0xbf   : > { %716 = vmatprep.subr.bf16.mxu0 %v2748_v8 }
  0xc2   : > { %717 = vmatpush1.bf16.msra.mxu0 %v2750_v9 }
  0xc3   : > { %718 = vmatprep.subr.bf16.mxu0 %v2752_v10 }
  0xc6   : > { %719 = vmatpush1.bf16.msra.mxu0 %v2756_v11 }
  0xc7   : > { %720 = vmatprep.subr.bf16.mxu0 %v2760_v12 }
  0xca   : > { %721 = vmatpush1.bf16.msra.mxu0 %v2763_v13 }
  0xcb   : > { %722 = vmatprep.subr.bf16.mxu0 %v2766_v14 }
  0xce   : > { %723 = vmatpush1.bf16.msra.mxu0 %v2769_v15 }
  0xcf   : > { %724 = vmatprep.subr.bf16.mxu0 %v2772_v16 }
  0xd2   : > { %725 = vmatpush1.bf16.msra.mxu0 %v2775_v17 }
  0xd3   : > { %843 = vmatprep.subr.bf16.mxu0 %v2730_v1 }
 0x188   : > { %v528_v20 = vpop.f32.mrb[0].mxu0 }
 0x189   : > { %v530_v21 = vpop.f32.mrb[1].mxu0 }
 0x18a   : > { %v532_v22 = vpop.f32.mrb[2].mxu0  ;;  %v535_v23 = vadd.f32 %v530_v21, %v528_v20 }
 0x18b   : > { %v533_v24 = vpop.f32.mrb[3].mxu0 }
 0x18c   : > { %536 = vadd.xlane.f32.xlu0 %v535_v23  ;;  %v559_v24 = vsub.s32 1, %v554_v45 }
 0x219   : > { %v537_v27 = vpop.xlane.xlu0 %536 }
 0x21a   : > { %v539_v28 = vmul.f32 0.00390625, %v537_v27  ;;  %v2871_v27 = vrot.slane %v407_v47, %v559_v24 }
 0x21c   : > { %v540_v29 = vsub.f32 %v528_v20, %v539_v28  ;;  %v2806_v30 = vsub.f32 %v530_v21, %v539_v28 }
 0x21e   : > { %v542_v31 = vmul.f32 %v540_v29, %v540_v29  ;;  %v543_v32 = vmul.f32 %v2806_v30, %v2806_v30 }
 0x220   : > { %v544_v33 = vadd.f32 %v543_v32, %v542_v31  ;;  %v2877_v31 = vld [vmem:[%s3304_s6] ss:$0 sm:$0xff]  ;;  %v2879_v32 = vrot.slane %v408_v48, %v559_v24 }
 0x222   : > { %545 = vadd.xlane.f32.xlu0 %v544_v33 }
 0x2af   : > { %v546_v41 = vpop.xlane.xlu0 %545 }
 0x2b0   : > { %v547_v42 = vmul.f32 0.00390625, %v546_v41 }
 0x2b2   : > { %v548_v44 = vadd.f32 1e-05, %v547_v42  ;;  %v2885_v42 = vld [vmem:[%s3305_s7] ss:$0 sm:$0xff] }
 0x2b4   : > { %2176 = vrsqrt.f32 %v548_v44 }
 0x2be   : > { %v2177_v50 = vpop.eup %2176 }
 0x2bf   : > { %v550_v51 = vmul.f32 %v2177_v50, %v540_v29  ;;  %v551_v28 = vmul.f32 %v2177_v50, %v2806_v30 }
 0x2c1   : > { %v563_v53 = vmul.f32 %v2846_v49, %v550_v51  ;;  %v564_v33 = vmul.f32 %v2871_v27, %v551_v28 }
 0x2c3   : > { %v576_v55 = vadd.f32 %v2848_v52, %v563_v53  ;;  %v577_v30 = vadd.f32 %v2879_v32, %v564_v33 }
 0x2c5   : > { %v578_v56 = vadd.f32 %v576_v55, %v412_v54 }
 0x2c7   : > { %v579_v57 = vmax.f32 %v578_v56, 0.0 }
 0x2c9   : > { %v580_v58 = vpack.c.bf16 %v579_v57, %v579_v57 }
 0x2cb   : > { %1915 = vmatmul.mubr.bf16.vlgmr.msra.gmra.mrb[0].mxu1 %v580_v58 }
 0x2cc   : > { %1919 = vmatpush3.bf16.msra.mxu1 %v2801_v25  ;;  %1934 = vmatprep.mubr.msk.bf16.mxu1 %vm2466_vm0, %v2465_v26 }
 0x2cd   : > { %1920 = vmatprep.subr.bf16.mxu1 %v2465_v26 }
 0x2d0   : > { %1921 = vmatpush3.bf16.msra.mxu1 %v2810_v34 }
 0x2d1   : > { %1922 = vmatprep.subr.bf16.mxu1 %v2465_v26 }
 0x2d4   : > { %1923 = vmatpush3.bf16.msra.mxu1 %v2814_v35 }
 0x2d5   : > { %1924 = vmatprep.subr.bf16.mxu1 %v2465_v26 }
 0x2d8   : > { %1925 = vmatpush3.bf16.msra.mxu1 %v2818_v36 }
 0x2d9   : > { %1926 = vmatprep.subr.bf16.mxu1 %v2465_v26 }
 0x2dc   : > { %1927 = vmatpush3.bf16.msra.mxu1 %v2822_v37 }
 0x2dd   : > { %1928 = vmatprep.subr.bf16.mxu1 %v2465_v26 }
 0x2e0   : > { %1929 = vmatpush3.bf16.msra.mxu1 %v2826_v38 }
 0x2e1   : > { %1930 = vmatprep.subr.bf16.mxu1 %v2465_v26 }
 0x2e4   : > { %1931 = vmatpush3.bf16.msra.mxu1 %v2830_v39 }
 0x2e5   : > { %1932 = vmatprep.subr.bf16.mxu1 %v2465_v26 }
 0x2e8   : > { %1933 = vmatpush3.bf16.msra.mxu1 %v2833_v40 }
 0x2e9   : > { %1938 = vmatprep.subr.bf16.mxu1 %v2465_v26 }
 0x39e   : > { %v663_v59 = vpop.f32.mrb[0].mxu1 }
 0x39f   : > { %669 = vadd.xlane.f32.xlu1 %v663_v59  ;;  %v1916_v60 = vpop.f32.mrb[1].mxu1 }
 0x3a0   : > { %v666_v61 = vpop.f32.mrb[2].mxu1 }
 0x3a1   : > { %v1917_v62 = vpop.f32.mrb[3].mxu1 }
 0x42c   : > { %v670_v63 = vpop.xlane.xlu1 %669 }
 0x42d   : > { %v672_v0 = vmul.f32 0.0078125, %v670_v63 }
 0x42f   : > { %v673_v19 = vsub.f32 %v663_v59, %v672_v0 }
 0x431   : > { %v674_v20 = vmul.f32 %v673_v19, %v673_v19 }
 0x433   : > { %675 = vadd.xlane.f32.xlu1 %v674_v20 }
 0x4c0   : > { %v676_v21 = vpop.xlane.xlu1 %675 }
 0x4c1   : > { %v677_v22 = vmul.f32 0.0078125, %v676_v21 }
 0x4c3   : > { %v678_v23 = vadd.f32 1e-05, %v677_v22 }
 0x4c5   : > { %2178 = vrsqrt.f32 %v678_v23 }
 0x4cf   : > { %v2179_v29 = vpop.eup %2178 }
 0x4d0   : > { %v680_v41 = vmul.f32 %v2179_v29, %v673_v19 }
 0x4d2   : > { %v687_v43 = vmul.f32 %v2877_v31, %v680_v41  ;;  %v1798_v41 = vld [vmem:[%s2712_s15 + $0x8] sm:$0xff] }
 0x4d4   : > { %v694_v44 = vadd.f32 %v2885_v42, %v687_v43 }
 0x4d6   : > { %v695_v45 = vadd.f32 %v694_v44, %v577_v30 }
 0x4d8   : > { %v1797_v46 = vmul.f32 -1.442695, %v695_v45 }
 0x4da   : > { %2180 = vpow2.f32 %v1797_v46 }
 0x4e4   : > { %v2181_v47 = vpop.eup %2180 }
 0x4e5   : > { %v699_v48 = vadd.f32 1.0, %v2181_v47 }
 0x4e7   : > { %2182 = vrcp.f32 %v699_v48 }
 0x4f1   : > { %v2183_v50 = vpop.eup %2182 }
 0x4f2   : > { %v702_v51 = vsub.f32 1.0, %v2183_v50  ;;  %v704_v54 = vmul.f32 %v2183_v50, %v579_v57 }
 0x4f4   : > { %v703_v53 = vmul.f32 %v702_v51, %v2777_v18 }
 0x4f6   : > { %v2891_v55 = vadd.f32 %v704_v54, %v703_v53 }
 0x4f8   : > { %706 = vst [vmem:[%s2726_s13] sm:$0xff] %v2891_v55  ;;  %v709_v56 = vpack.c.bf16 %v2891_v55, %v2891_v55 }
 0x4fa   : > { %743 = vmatmul.mubr.bf16.vlgmr.msra.gmra.mrb[4].mxu0 %v709_v56 }
 0x4fb   : > { %844 = vmatpush1.bf16.msra.mxu0 %v2732_v2  ;;  %875 = vmatprep.mubr.bf16.mxu0 %v2464_v3 }
 0x4fc   : > { %845 = vmatprep.subr.bf16.mxu0 %v2736_v4 }
 0x4ff   : > { %846 = vmatpush1.bf16.msra.mxu0 %v2739_v5 }
 0x500   : > { %847 = vmatprep.subr.bf16.mxu0 %v2742_v6 }
 0x503   : > { %848 = vmatpush1.bf16.msra.mxu0 %v2745_v7 }
 0x504   : > { %849 = vmatprep.subr.bf16.mxu0 %v2748_v8 }
 0x507   : > { %850 = vmatpush1.bf16.msra.mxu0 %v2750_v9 }
 0x508   : > { %851 = vmatprep.subr.bf16.mxu0 %v2752_v10 }
 0x50b   : > { %852 = vmatpush1.bf16.msra.mxu0 %v2756_v11 }
 0x50c   : > { %853 = vmatprep.subr.bf16.mxu0 %v2760_v12 }
 0x50f   : > { %854 = vmatpush1.bf16.msra.mxu0 %v2763_v13 }
 0x510   : > { %855 = vmatprep.subr.bf16.mxu0 %v2766_v14 }
 0x513   : > { %856 = vmatpush1.bf16.msra.mxu0 %v2769_v15 }
 0x514   : > { %857 = vmatprep.subr.bf16.mxu0 %v2772_v16 }
 0x517   : > { %858 = vmatpush1.bf16.msra.mxu0 %v2775_v17 }
 0x518   : > { %976 = vmatprep.subr.bf16.mxu0 %v2730_v1 }
 0x5cd   : > { %v744_v18 = vpop.f32.mrb[4].mxu0 }
 0x5ce   : > { %v746_v57 = vpop.f32.mrb[5].mxu0 }
 0x5cf   : > { %v748_v58 = vpop.f32.mrb[6].mxu0  ;;  %v751_v59 = vadd.f32 %v746_v57, %v744_v18 }
 0x5d0   : > { %v749_v60 = vpop.f32.mrb[7].mxu0 }
 0x5d1   : > { %752 = vadd.xlane.f32.xlu0 %v751_v59 }
 0x65e   : > { %v753_v61 = vpop.xlane.xlu0 %752 }
 0x65f   : > { %v754_v62 = vmul.f32 0.00390625, %v753_v61 }
 0x661   : > { %v755_v63 = vsub.f32 %v744_v18, %v754_v62  ;;  %v756_v0 = vsub.f32 %v746_v57, %v754_v62 }
 0x663   : > { %v757_v19 = vmul.f32 %v755_v63, %v755_v63  ;;  %v758_v20 = vmul.f32 %v756_v0, %v756_v0 }
 0x665   : > { %v759_v21 = vadd.f32 %v758_v20, %v757_v19 }
 0x667   : > { %760 = vadd.xlane.f32.xlu1 %v759_v21 }
 0x6f4   : > { %v761_v22 = vpop.xlane.xlu1 %760 }
 0x6f5   : > { %v762_v23 = vmul.f32 0.00390625, %v761_v22 }
 0x6f7   : > { %v763_v24 = vadd.f32 1e-05, %v762_v23 }
 0x6f9   : > { %2184 = vrsqrt.f32 %v763_v24 }
 0x703   : > { %v2185_v28 = vpop.eup %2184 }
 0x704   : > { %v765_v29 = vmul.f32 %v2185_v28, %v755_v63  ;;  %v766_v59 = vmul.f32 %v2185_v28, %v756_v0 }
 0x706   : > { %v767_v33 = vmul.f32 %v765_v29, %v2846_v49  ;;  %v768_v61 = vmul.f32 %v766_v59, %v2871_v27 }
 0x708   : > { %v769_v43 = vadd.f32 %v767_v33, %v2848_v52  ;;  %v770_v19 = vadd.f32 %v768_v61, %v2879_v32 }
 0x70a   : > { %v771_v30 = vadd.f32 %v1798_v41, %v769_v43 }
 0x70c   : > { %v772_v44 = vmax.f32 %v771_v30, 0.0 }
 0x70e   : > { %v773_v45 = vpack.c.bf16 %v772_v44, %v772_v44 }
 0x710   : > { %1935 = vmatmul.mubr.bf16.vlgmr.msra.gmra.mrb[4].mxu1 %v773_v45 }
 0x711   : > { %1939 = vmatpush3.bf16.msra.mxu1 %v2801_v25  ;;  %1954 = vmatprep.mubr.msk.bf16.mxu1 %vm2466_vm0, %v2465_v26 }
 0x712   : > { %1940 = vmatprep.subr.bf16.mxu1 %v2465_v26 }
 0x715   : > { %1941 = vmatpush3.bf16.msra.mxu1 %v2810_v34 }
 0x716   : > { %1942 = vmatprep.subr.bf16.mxu1 %v2465_v26 }
 0x719   : > { %1943 = vmatpush3.bf16.msra.mxu1 %v2814_v35 }
 0x71a   : > { %1944 = vmatprep.subr.bf16.mxu1 %v2465_v26 }
 0x71d   : > { %1945 = vmatpush3.bf16.msra.mxu1 %v2818_v36 }
 0x71e   : > { %1946 = vmatprep.subr.bf16.mxu1 %v2465_v26 }
 0x721   : > { %1947 = vmatpush3.bf16.msra.mxu1 %v2822_v37 }
 0x722   : > { %1948 = vmatprep.subr.bf16.mxu1 %v2465_v26 }
 0x725   : > { %1949 = vmatpush3.bf16.msra.mxu1 %v2826_v38 }
 0x726   : > { %1950 = vmatprep.subr.bf16.mxu1 %v2465_v26 }
 0x729   : > { %1951 = vmatpush3.bf16.msra.mxu1 %v2830_v39 }
 0x72a   : > { %1952 = vmatprep.subr.bf16.mxu1 %v2465_v26 }
 0x72d   : > { %1953 = vmatpush3.bf16.msra.mxu1 %v2833_v40 }
 0x72e   : > { %1958 = vmatprep.subr.bf16.mxu1 %v2465_v26 }
 0x7e3   : > { %v808_v46 = vpop.f32.mrb[4].mxu1 }
 0x7e4   : > { %814 = vadd.xlane.f32.xlu0 %v808_v46  ;;  %v1936_v47 = vpop.f32.mrb[5].mxu1 }
 0x7e5   : > { %v811_v48 = vpop.f32.mrb[6].mxu1 }
 0x7e6   : > { %v1937_v50 = vpop.f32.mrb[7].mxu1 }
 0x871   : > { %v815_v51 = vpop.xlane.xlu0 %814 }
 0x872   : > { %v816_v53 = vmul.f32 0.0078125, %v815_v51 }
 0x874   : > { %v817_v54 = vsub.f32 %v808_v46, %v816_v53 }
 0x876   : > { %v818_v56 = vmul.f32 %v817_v54, %v817_v54 }
 0x878   : > { %819 = vadd.xlane.f32.xlu1 %v818_v56 }
 0x905   : > { %v820_v18 = vpop.xlane.xlu1 %819 }
 0x906   : > { %v821_v57 = vmul.f32 0.0078125, %v820_v18 }
 0x908   : > { %v822_v58 = vadd.f32 1e-05, %v821_v57 }
 0x90a   : > { %2186 = vrsqrt.f32 %v822_v58 }
 0x914   : > { %v2187_v60 = vpop.eup %2186 }
 0x915   : > { %v824_v62 = vmul.f32 %v2187_v60, %v817_v54 }
 0x917   : > { %v825_v63 = vmul.f32 %v2877_v31, %v824_v62  ;;  %v1801_v62 = vld [vmem:[%s2712_s15 + $0x10] sm:$0xff] }
 0x919   : > { %v826_v20 = vadd.f32 %v2885_v42, %v825_v63 }
 0x91b   : > { %v827_v21 = vadd.f32 %v826_v20, %v770_v19 }
 0x91d   : > { %v1799_v22 = vmul.f32 -1.442695, %v827_v21 }
 0x91f   : > { %2188 = vpow2.f32 %v1799_v22 }
 0x929   : > { %v2189_v23 = vpop.eup %2188 }
 0x92a   : > { %v831_v24 = vadd.f32 1.0, %v2189_v23 }
 0x92c   : > { %2190 = vrcp.f32 %v831_v24 }
 0x936   : > { %v2191_v29 = vpop.eup %2190 }
 0x937   : > { %v834_v33 = vsub.f32 1.0, %v2191_v29  ;;  %v836_v28 = vmul.f32 %v2191_v29, %v772_v44 }
 0x939   : > { %v835_v0 = vmul.f32 %v834_v33, %v2891_v55 }
 0x93b   : > { %v2940_v41 = vadd.f32 %v836_v28, %v835_v0 }
 0x93d   : > { %1800 = vst [vmem:[%s2726_s13 + $0x8] sm:$0xff] %v2940_v41  ;;  %v842_v43 = vpack.c.bf16 %v2940_v41, %v2940_v41 }
 0x93f   : > { %876 = vmatmul.mubr.bf16.vlgmr.msra.gmra.mrb[8].mxu0 %v842_v43 }
 0x940   : > { %977 = vmatpush1.bf16.msra.mxu0 %v2732_v2  ;;  %1008 = vmatprep.mubr.bf16.mxu0 %v2464_v3 }
 0x941   : > { %978 = vmatprep.subr.bf16.mxu0 %v2736_v4 }
 0x944   : > { %979 = vmatpush1.bf16.msra.mxu0 %v2739_v5 }
 0x945   : > { %980 = vmatprep.subr.bf16.mxu0 %v2742_v6 }
 0x948   : > { %981 = vmatpush1.bf16.msra.mxu0 %v2745_v7 }
 0x949   : > { %982 = vmatprep.subr.bf16.mxu0 %v2748_v8 }
 0x94c   : > { %983 = vmatpush1.bf16.msra.mxu0 %v2750_v9 }
 0x94d   : > { %984 = vmatprep.subr.bf16.mxu0 %v2752_v10 }
 0x950   : > { %985 = vmatpush1.bf16.msra.mxu0 %v2756_v11 }
 0x951   : > { %986 = vmatprep.subr.bf16.mxu0 %v2760_v12 }
 0x954   : > { %987 = vmatpush1.bf16.msra.mxu0 %v2763_v13 }
 0x955   : > { %988 = vmatprep.subr.bf16.mxu0 %v2766_v14 }
 0x958   : > { %989 = vmatpush1.bf16.msra.mxu0 %v2769_v15 }
 0x959   : > { %990 = vmatprep.subr.bf16.mxu0 %v2772_v16 }
 0x95c   : > { %991 = vmatpush1.bf16.msra.mxu0 %v2775_v17 }
 0x95d   : > { %1109 = vmatprep.subr.bf16.mxu0 %v2730_v1 }
 0xa12   : > { %v877_v55 = vpop.f32.mrb[8].mxu0 }
 0xa13   : > { %v879_v30 = vpop.f32.mrb[9].mxu0 }
 0xa14   : > { %v881_v44 = vpop.f32.mrb[10].mxu0  ;;  %v884_v45 = vadd.f32 %v879_v30, %v877_v55 }
 0xa15   : > { %v882_v46 = vpop.f32.mrb[11].mxu0 }
 0xa16   : > { %885 = vadd.xlane.f32.xlu0 %v884_v45 }
 0xaa3   : > { %v886_v47 = vpop.xlane.xlu0 %885 }
 0xaa4   : > { %v887_v48 = vmul.f32 0.00390625, %v886_v47 }
 0xaa6   : > { %v888_v50 = vsub.f32 %v877_v55, %v887_v48  ;;  %v889_v51 = vsub.f32 %v879_v30, %v887_v48 }
 0xaa8   : > { %v890_v53 = vmul.f32 %v888_v50, %v888_v50  ;;  %v891_v54 = vmul.f32 %v889_v51, %v889_v51 }
 0xaaa   : > { %v892_v56 = vadd.f32 %v891_v54, %v890_v53 }
 0xaac   : > { %893 = vadd.xlane.f32.xlu1 %v892_v56 }
 0xb39   : > { %v894_v18 = vpop.xlane.xlu1 %893 }
 0xb3a   : > { %v895_v57 = vmul.f32 0.00390625, %v894_v18 }
 0xb3c   : > { %v896_v58 = vadd.f32 1e-05, %v895_v57 }
 0xb3e   : > { %2192 = vrsqrt.f32 %v896_v58 }
 0xb48   : > { %v2193_v59 = vpop.eup %2192 }
 0xb49   : > { %v898_v60 = vmul.f32 %v2193_v59, %v888_v50  ;;  %v899_v45 = vmul.f32 %v2193_v59, %v889_v51 }
 0xb4b   : > { %v900_v61 = vmul.f32 %v898_v60, %v2846_v49  ;;  %v901_v47 = vmul.f32 %v899_v45, %v2871_v27 }
 0xb4d   : > { %v902_v63 = vadd.f32 %v900_v61, %v2848_v52  ;;  %v903_v53 = vadd.f32 %v901_v47, %v2879_v32 }
 0xb4f   : > { %v904_v19 = vadd.f32 %v1801_v62, %v902_v63 }
 0xb51   : > { %v905_v20 = vmax.f32 %v904_v19, 0.0 }
 0xb53   : > { %v906_v21 = vpack.c.bf16 %v905_v20, %v905_v20 }
 0xb55   : > { %1955 = vmatmul.mubr.bf16.vlgmr.msra.gmra.mrb[8].mxu1 %v906_v21 }
 0xb56   : > { %1959 = vmatpush3.bf16.msra.mxu1 %v2801_v25  ;;  %1974 = vmatprep.mubr.msk.bf16.mxu1 %vm2466_vm0, %v2465_v26 }
 0xb57   : > { %1960 = vmatprep.subr.bf16.mxu1 %v2465_v26 }
 0xb5a   : > { %1961 = vmatpush3.bf16.msra.mxu1 %v2810_v34 }
 0xb5b   : > { %1962 = vmatprep.subr.bf16.mxu1 %v2465_v26 }
 0xb5e   : > { %1963 = vmatpush3.bf16.msra.mxu1 %v2814_v35 }
 0xb5f   : > { %1964 = vmatprep.subr.bf16.mxu1 %v2465_v26 }
 0xb62   : > { %1965 = vmatpush3.bf16.msra.mxu1 %v2818_v36 }
 0xb63   : > { %1966 = vmatprep.subr.bf16.mxu1 %v2465_v26 }
 0xb66   : > { %1967 = vmatpush3.bf16.msra.mxu1 %v2822_v37 }
 0xb67   : > { %1968 = vmatprep.subr.bf16.mxu1 %v2465_v26 }
 0xb6a   : > { %1969 = vmatpush3.bf16.msra.mxu1 %v2826_v38 }
 0xb6b   : > { %1970 = vmatprep.subr.bf16.mxu1 %v2465_v26 }
 0xb6e   : > { %1971 = vmatpush3.bf16.msra.mxu1 %v2830_v39 }
 0xb6f   : > { %1972 = vmatprep.subr.bf16.mxu1 %v2465_v26 }
 0xb72   : > { %1973 = vmatpush3.bf16.msra.mxu1 %v2833_v40 }
 0xb73   : > { %1978 = vmatprep.subr.bf16.mxu1 %v2465_v26 }
 0xc28   : > { %v941_v22 = vpop.f32.mrb[8].mxu1 }
 0xc29   : > { %947 = vadd.xlane.f32.xlu0 %v941_v22  ;;  %v1956_v23 = vpop.f32.mrb[9].mxu1 }
 0xc2a   : > { %v944_v24 = vpop.f32.mrb[10].mxu1 }
 0xc2b   : > { %v1957_v29 = vpop.f32.mrb[11].mxu1 }
 0xcb6   : > { %v948_v33 = vpop.xlane.xlu0 %947 }
 0xcb7   : > { %v949_v0 = vmul.f32 0.0078125, %v948_v33 }
 0xcb9   : > { %v950_v28 = vsub.f32 %v941_v22, %v949_v0 }
 0xcbb   : > { %v951_v43 = vmul.f32 %v950_v28, %v950_v28 }
 0xcbd   : > { %952 = vadd.xlane.f32.xlu1 %v951_v43 }
 0xd4a   : > { %v953_v55 = vpop.xlane.xlu1 %952 }
 0xd4b   : > { %v954_v30 = vmul.f32 0.0078125, %v953_v55 }
 0xd4d   : > { %v955_v44 = vadd.f32 1e-05, %v954_v30 }
 0xd4f   : > { %2194 = vrsqrt.f32 %v955_v44 }
 0xd59   : > { %v2195_v46 = vpop.eup %2194 }
 0xd5a   : > { %v957_v48 = vmul.f32 %v2195_v46, %v950_v28 }
 0xd5c   : > { %v958_v50 = vmul.f32 %v2877_v31, %v957_v48  ;;  %v1804_v48 = vld [vmem:[%s2712_s15 + $0x18] sm:$0xff] }
 0xd5e   : > { %v959_v54 = vadd.f32 %v2885_v42, %v958_v50 }
 0xd60   : > { %v960_v56 = vadd.f32 %v959_v54, %v903_v53 }
 0xd62   : > { %v1802_v18 = vmul.f32 -1.442695, %v960_v56 }
 0xd64   : > { %2196 = vpow2.f32 %v1802_v18 }
 0xd6e   : > { %v2197_v57 = vpop.eup %2196 }
 0xd6f   : > { %v964_v58 = vadd.f32 1.0, %v2197_v57 }
 0xd71   : > { %2198 = vrcp.f32 %v964_v58 }
 0xd7b   : > { %v2199_v60 = vpop.eup %2198 }
 0xd7c   : > { %v967_v61 = vsub.f32 1.0, %v2199_v60  ;;  %v969_v59 = vmul.f32 %v2199_v60, %v905_v20 }
 0xd7e   : > { %v968_v51 = vmul.f32 %v967_v61, %v2940_v41 }
 0xd80   : > { %v2989_v62 = vadd.f32 %v969_v59, %v968_v51 }
 0xd82   : > { %1803 = vst [vmem:[%s2726_s13 + $0x10] sm:$0xff] %v2989_v62  ;;  %v975_v63 = vpack.c.bf16 %v2989_v62, %v2989_v62 }
 0xd84   : > { %1009 = vmatmul.mubr.bf16.vlgmr.msra.gmra.mrb[12].mxu0 %v975_v63 }
 0xd85   : > { %1110 = vmatpush1.bf16.msra.mxu0 %v2732_v2  ;;  %1141 = vmatprep.mubr.bf16.mxu0 %v2464_v3 }
 0xd86   : > { %1111 = vmatprep.subr.bf16.mxu0 %v2736_v4 }
 0xd89   : > { %1112 = vmatpush1.bf16.msra.mxu0 %v2739_v5 }
 0xd8a   : > { %1113 = vmatprep.subr.bf16.mxu0 %v2742_v6 }
 0xd8d   : > { %1114 = vmatpush1.bf16.msra.mxu0 %v2745_v7 }
 0xd8e   : > { %1115 = vmatprep.subr.bf16.mxu0 %v2748_v8 }
 0xd91   : > { %1116 = vmatpush1.bf16.msra.mxu0 %v2750_v9 }
 0xd92   : > { %1117 = vmatprep.subr.bf16.mxu0 %v2752_v10 }
 0xd95   : > { %1118 = vmatpush1.bf16.msra.mxu0 %v2756_v11 }
 0xd96   : > { %1119 = vmatprep.subr.bf16.mxu0 %v2760_v12 }
 0xd99   : > { %1120 = vmatpush1.bf16.msra.mxu0 %v2763_v13 }
 0xd9a   : > { %1121 = vmatprep.subr.bf16.mxu0 %v2766_v14 }
 0xd9d   : > { %1122 = vmatpush1.bf16.msra.mxu0 %v2769_v15 }
 0xd9e   : > { %1123 = vmatprep.subr.bf16.mxu0 %v2772_v16 }
 0xda1   : > { %1124 = vmatpush1.bf16.msra.mxu0 %v2775_v17 }
 0xda2   : > { %1242 = vmatprep.subr.bf16.mxu0 %v2730_v1 }
 0xe57   : > { %v1010_v41 = vpop.f32.mrb[12].mxu0 }
 0xe58   : > { %v1012_v19 = vpop.f32.mrb[13].mxu0 }
 0xe59   : > { %v1014_v20 = vpop.f32.mrb[14].mxu0  ;;  %v1017_v21 = vadd.f32 %v1012_v19, %v1010_v41 }
 0xe5a   : > { %v1015_v22 = vpop.f32.mrb[15].mxu0 }
 0xe5b   : > { %1018 = vadd.xlane.f32.xlu0 %v1017_v21 }
 0xee8   : > { %v1019_v23 = vpop.xlane.xlu0 %1018 }
 0xee9   : > { %v1020_v24 = vmul.f32 0.00390625, %v1019_v23 }
 0xeeb   : > { %v1021_v29 = vsub.f32 %v1010_v41, %v1020_v24  ;;  %v1022_v33 = vsub.f32 %v1012_v19, %v1020_v24 }
 0xeed   : > { %v1023_v0 = vmul.f32 %v1021_v29, %v1021_v29  ;;  %v1024_v28 = vmul.f32 %v1022_v33, %v1022_v33 }
 0xeef   : > { %v1025_v43 = vadd.f32 %v1024_v28, %v1023_v0 }
 0xef1   : > { %1026 = vadd.xlane.f32.xlu1 %v1025_v43 }
 0xf7e   : > { %v1027_v55 = vpop.xlane.xlu1 %1026 }
 0xf7f   : > { %v1028_v30 = vmul.f32 0.00390625, %v1027_v55 }
 0xf81   : > { %v1029_v44 = vadd.f32 1e-05, %v1028_v30 }
 0xf83   : > { %2200 = vrsqrt.f32 %v1029_v44 }
 0xf8d   : > { %v2201_v45 = vpop.eup %2200 }
 0xf8e   : > { %v1031_v46 = vmul.f32 %v2201_v45, %v1021_v29  ;;  %v1032_v21 = vmul.f32 %v2201_v45, %v1022_v33 }
 0xf90   : > { %v1033_v47 = vmul.f32 %v1031_v46, %v2846_v49  ;;  %v1034_v23 = vmul.f32 %v1032_v21, %v2871_v27 }
 0xf92   : > { %v1035_v50 = vadd.f32 %v1033_v47, %v2848_v52  ;;  %v1036_v0 = vadd.f32 %v1034_v23, %v2879_v32 }
 0xf94   : > { %v1037_v53 = vadd.f32 %v1804_v48, %v1035_v50 }
 0xf96   : > { %v1038_v54 = vmax.f32 %v1037_v53, 0.0 }
 0xf98   : > { %v1039_v56 = vpack.c.bf16 %v1038_v54, %v1038_v54 }
 0xf9a   : > { %1975 = vmatmul.mubr.bf16.vlgmr.msra.gmra.mrb[12].mxu1 %v1039_v56 }
 0xf9b   : > { %1979 = vmatpush3.bf16.msra.mxu1 %v2801_v25  ;;  %1994 = vmatprep.mubr.msk.bf16.mxu1 %vm2466_vm0, %v2465_v26 }
 0xf9c   : > { %1980 = vmatprep.subr.bf16.mxu1 %v2465_v26 }
 0xf9f   : > { %1981 = vmatpush3.bf16.msra.mxu1 %v2810_v34 }
 0xfa0   : > { %1982 = vmatprep.subr.bf16.mxu1 %v2465_v26 }
 0xfa3   : > { %1983 = vmatpush3.bf16.msra.mxu1 %v2814_v35 }
 0xfa4   : > { %1984 = vmatprep.subr.bf16.mxu1 %v2465_v26 }
 0xfa7   : > { %1985 = vmatpush3.bf16.msra.mxu1 %v2818_v36 }
 0xfa8   : > { %1986 = vmatprep.subr.bf16.mxu1 %v2465_v26 }
 0xfab   : > { %1987 = vmatpush3.bf16.msra.mxu1 %v2822_v37 }
 0xfac   : > { %1988 = vmatprep.subr.bf16.mxu1 %v2465_v26 }
 0xfaf   : > { %1989 = vmatpush3.bf16.msra.mxu1 %v2826_v38 }
 0xfb0   : > { %1990 = vmatprep.subr.bf16.mxu1 %v2465_v26 }
 0xfb3   : > { %1991 = vmatpush3.bf16.msra.mxu1 %v2830_v39 }
 0xfb4   : > { %1992 = vmatprep.subr.bf16.mxu1 %v2465_v26 }
 0xfb7   : > { %1993 = vmatpush3.bf16.msra.mxu1 %v2833_v40 }
 0xfb8   : > { %1998 = vmatprep.subr.bf16.mxu1 %v2465_v26 }
0x106d   : > { %v1074_v18 = vpop.f32.mrb[12].mxu1 }
0x106e   : > { %1080 = vadd.xlane.f32.xlu0 %v1074_v18  ;;  %v1976_v57 = vpop.f32.mrb[13].mxu1 }
0x106f   : > { %v1077_v58 = vpop.f32.mrb[14].mxu1 }
0x1070   : > { %v1977_v60 = vpop.f32.mrb[15].mxu1 }
0x10fb   : > { %v1081_v61 = vpop.xlane.xlu0 %1080 }
0x10fc   : > { %v1082_v51 = vmul.f32 0.0078125, %v1081_v61 }
0x10fe   : > { %v1083_v59 = vsub.f32 %v1074_v18, %v1082_v51 }
0x1100   : > { %v1084_v63 = vmul.f32 %v1083_v59, %v1083_v59 }
0x1102   : > { %1085 = vadd.xlane.f32.xlu1 %v1084_v63 }
0x118f   : > { %v1086_v41 = vpop.xlane.xlu1 %1085 }
0x1190   : > { %v1087_v19 = vmul.f32 0.0078125, %v1086_v41 }
0x1192   : > { %v1088_v20 = vadd.f32 1e-05, %v1087_v19 }
0x1194   : > { %2202 = vrsqrt.f32 %v1088_v20 }
0x119e   : > { %v2203_v22 = vpop.eup %2202 }
0x119f   : > { %v1090_v24 = vmul.f32 %v2203_v22, %v1083_v59 }
0x11a1   : > { %v1091_v29 = vmul.f32 %v2877_v31, %v1090_v24 }
0x11a3   : > { %v1092_v28 = vadd.f32 %v2885_v42, %v1091_v29 }
0x11a5   : > { %v1093_v43 = vadd.f32 %v1092_v28, %v1036_v0 }
0x11a7   : > { %v1805_v55 = vmul.f32 -1.442695, %v1093_v43 }
0x11a9   : > { %2204 = vpow2.f32 %v1805_v55 }
0x11b3   : > { %v2205_v30 = vpop.eup %2204 }
0x11b4   : > { %v1097_v44 = vadd.f32 1.0, %v2205_v30 }
0x11b6   : > { %2206 = vrcp.f32 %v1097_v44 }
0x11c0   : > { %v2207_v46 = vpop.eup %2206 }
0x11c1   : > { %v1100_v47 = vsub.f32 1.0, %v2207_v46  ;;  %v1102_v45 = vmul.f32 %v2207_v46, %v1038_v54  ;;  %v1807_v54 = vld [vmem:[%s2712_s15 + $0x20] sm:$0xff] }
0x11c3   : > { %v1101_v33 = vmul.f32 %v1100_v47, %v2989_v62  ;;  %v3093_v47 = vld [vmem:[#allocation8] ss:$8 sps:$4 sm:$0xff]  }
0x11c5   : > { %v3038_v48 = vadd.f32 %v1102_v45, %v1101_v33  ;;  %v3097_v33 = vld [vmem:[#allocation8 + $0x14] ss:$8 sps:$4 sm:$0xff]   ;;  %v3100_v45 = vld [vmem:[#allocation8 + $0x10] ss:$8 sps:$4 sm:$0xff]  }
0x11c7   : > { %1806 = vst [vmem:[%s2726_s13 + $0x18] sm:$0xff] %v3038_v48  ;;  %v1108_v50 = vpack.c.bf16 %v3038_v48, %v3038_v48 }
0x11c9   : > { %1142 = vmatmul.mubr.bf16.vlgmr.msra.gmra.mrb[16].mxu0 %v1108_v50  ;;  %v3106_v50 = vld [vmem:[#allocation8 + $0x20] ss:$8 sps:$4 sm:$0xff]  }
0x11ca   : > { %1243 = vmatpush1.bf16.msra.mxu0 %v2732_v2  ;;  %1274 = vmatprep.mubr.bf16.mxu0 %v2464_v3 }
0x11cb   : > { %1244 = vmatprep.subr.bf16.mxu0 %v2736_v4 }
0x11ce   : > { %1245 = vmatpush1.bf16.msra.mxu0 %v2739_v5 }
0x11cf   : > { %1246 = vmatprep.subr.bf16.mxu0 %v2742_v6 }
0x11d2   : > { %1247 = vmatpush1.bf16.msra.mxu0 %v2745_v7 }
0x11d3   : > { %1248 = vmatprep.subr.bf16.mxu0 %v2748_v8 }
0x11d6   : > { %1249 = vmatpush1.bf16.msra.mxu0 %v2750_v9 }
0x11d7   : > { %1250 = vmatprep.subr.bf16.mxu0 %v2752_v10 }
0x11da   : > { %1251 = vmatpush1.bf16.msra.mxu0 %v2756_v11 }
0x11db   : > { %1252 = vmatprep.subr.bf16.mxu0 %v2760_v12 }
0x11de   : > { %1253 = vmatpush1.bf16.msra.mxu0 %v2763_v13 }
0x11df   : > { %1254 = vmatprep.subr.bf16.mxu0 %v2766_v14 }
0x11e2   : > { %1255 = vmatpush1.bf16.msra.mxu0 %v2769_v15 }
0x11e3   : > { %1256 = vmatprep.subr.bf16.mxu0 %v2772_v16 }
0x11e6   : > { %1257 = vmatpush1.bf16.msra.mxu0 %v2775_v17 }
0x11e7   : > { %1375 = vmatprep.subr.bf16.mxu0 %v2730_v1 }
0x129c   : > { %v1143_v2 = vpop.f32.mrb[16].mxu0 }
0x129d   : > { %v1145_v4 = vpop.f32.mrb[17].mxu0 }
0x129e   : > { %v1147_v5 = vpop.f32.mrb[18].mxu0  ;;  %v1150_v6 = vadd.f32 %v1145_v4, %v1143_v2 }
0x129f   : > { %v1148_v7 = vpop.f32.mrb[19].mxu0  ;;  %v3115_v5 = vld [vmem:[#allocation8 + $0x44] ss:$8 sps:$4 sm:$0xff]  }
0x12a0   : > { %1151 = vadd.xlane.f32.xlu0 %v1150_v6  ;;  %v3118_v6 = vld [vmem:[#allocation8 + $0x40] ss:$8 sps:$4 sm:$0xff]   ;;  %v3121_v7 = vld [vmem:[#allocation8 + $0x54] ss:$8 sps:$4 sm:$0xff]  }
0x132d   : > { %v1152_v8 = vpop.xlane.xlu0 %1151 }
0x132e   : > { %v1153_v9 = vmul.f32 0.00390625, %v1152_v8  ;;  %v3124_v8 = vld [vmem:[#allocation8 + $0x50] ss:$8 sps:$4 sm:$0xff]  }
0x1330   : > { %v1154_v10 = vsub.f32 %v1143_v2, %v1153_v9  ;;  %v1155_v11 = vsub.f32 %v1145_v4, %v1153_v9  ;;  %v3109_v2 = vld [vmem:[#allocation8 + $0x34] ss:$8 sps:$4 sm:$0xff]   ;;  %v3112_v4 = vld [vmem:[#allocation8 + $0x30] ss:$8 sps:$4 sm:$0xff]   ;;  %v3127_v9 = vld [vmem:[#allocation8 + $0x64] ss:$8 sps:$4 sm:$0xff]  }
0x1332   : > { %v1156_v12 = vmul.f32 %v1154_v10, %v1154_v10  ;;  %v1157_v13 = vmul.f32 %v1155_v11, %v1155_v11 }
0x1334   : > { %v1158_v14 = vadd.f32 %v1157_v13, %v1156_v12  ;;  %v3136_v12 = vld [vmem:[#allocation8 + $0x70] ss:$8 sps:$4 sm:$0xff]   ;;  %v2255_v13 = vld [vmem:[#allocation8 + $0x4] ss:$8 sps:$4 sm:$0xff]  }
0x1336   : > { %1159 = vadd.xlane.f32.xlu1 %v1158_v14 }
0x13c3   : > { %v1160_v15 = vpop.xlane.xlu1 %1159 }
0x13c4   : > { %v1161_v16 = vmul.f32 0.00390625, %v1160_v15 }
0x13c6   : > { %v1162_v17 = vadd.f32 1e-05, %v1161_v16 }
0x13c8   : > { %2208 = vrsqrt.f32 %v1162_v17 }
0x13d2   : > { %v2209_v1 = vpop.eup %2208 }
0x13d3   : > { %v1164_v62 = vmul.f32 %v2209_v1, %v1154_v10  ;;  %v3130_v10 = vld [vmem:[#allocation8 + $0x60] ss:$8 sps:$4 sm:$0xff]  }
0x13d5   : > { %v1166_v53 = vmul.f32 %v1164_v62, %v2846_v49 }
0x13d7   : > { %v1168_v56 = vadd.f32 %v1166_v53, %v2848_v52 }
0x13d9   : > { %v1170_v18 = vadd.f32 %v1807_v54, %v1168_v56 }
0x13db   : > { %v1171_v57 = vmax.f32 %v1170_v18, 0.0 }
0x13dd   : > { %v1172_v58 = vpack.c.bf16 %v1171_v57, %v1171_v57 }
0x13df   : > { %1995 = vmatmul.mubr.bf16.vlgmr.msra.gmra.mrb[16].mxu1 %v1172_v58 }
0x13e0   : > { %1999 = vmatpush3.bf16.msra.mxu1 %v2801_v25  ;;  %2014 = vmatprep.mubr.msk.bf16.mxu1 %vm2466_vm0, %v2465_v26 }
0x13e1   : > { %2000 = vmatprep.subr.bf16.mxu1 %v2465_v26 }
0x13e4   : > { %2001 = vmatpush3.bf16.msra.mxu1 %v2810_v34 }
0x13e5   : > { %2002 = vmatprep.subr.bf16.mxu1 %v2465_v26 }
0x13e8   : > { %2003 = vmatpush3.bf16.msra.mxu1 %v2814_v35 }
0x13e9   : > { %2004 = vmatprep.subr.bf16.mxu1 %v2465_v26 }
0x13ec   : > { %2005 = vmatpush3.bf16.msra.mxu1 %v2818_v36 }
0x13ed   : > { %2006 = vmatprep.subr.bf16.mxu1 %v2465_v26 }
0x13f0   : > { %2007 = vmatpush3.bf16.msra.mxu1 %v2822_v37 }
0x13f1   : > { %2008 = vmatprep.subr.bf16.mxu1 %v2465_v26 }
0x13f4   : > { %2009 = vmatpush3.bf16.msra.mxu1 %v2826_v38 }
0x13f5   : > { %2010 = vmatprep.subr.bf16.mxu1 %v2465_v26 }
0x13f8   : > { %2011 = vmatpush3.bf16.msra.mxu1 %v2830_v39  ;;  %v1165_v39 = vmul.f32 %v2209_v1, %v1155_v11  ;;  %v3133_v11 = vld [vmem:[#allocation8 + $0x74] ss:$8 sps:$4 sm:$0xff]  }
0x13f9   : > { %2012 = vmatprep.subr.bf16.mxu1 %v2465_v26 }
0x13fc   : > { %2013 = vmatpush3.bf16.msra.mxu1 %v2833_v40  ;;  %v1167_v40 = vmul.f32 %v1165_v39, %v2871_v27  ;;  %v3142_v39 = vld [vmem:[#allocation9] sm:$0xff]  }
0x13fd   : > { %2018 = vmatprep.subr.bf16.mxu1 %v2465_v26 }
0x13fe   : > { %v1169_v21 = vadd.f32 %v1167_v40, %v2879_v32  ;;  %v3152_v40 = vld [vmem:[#allocation9 + $0x10] sm:$0xff]  }
0x14b2   : > { %v1207_v25 = vpop.f32.mrb[16].mxu1 }
0x14b3   : > { %1213 = vadd.xlane.f32.xlu0 %v1207_v25  ;;  %v1996_v34 = vpop.f32.mrb[17].mxu1 }
0x14b4   : > { %v1210_v35 = vpop.f32.mrb[18].mxu1 }
0x14b5   : > { %v1997_v36 = vpop.f32.mrb[19].mxu1 }
0x1540   : > { %v1214_v37 = vpop.xlane.xlu0 %1213 }
0x1541   : > { %v1215_v60 = vmul.f32 0.0078125, %v1214_v37 }
0x1543   : > { %v1216_v61 = vsub.f32 %v1207_v25, %v1215_v60 }
0x1545   : > { %v1217_v51 = vmul.f32 %v1216_v61, %v1216_v61 }
0x1547   : > { %1218 = vadd.xlane.f32.xlu1 %v1217_v51 }
0x15d4   : > { %v1219_v38 = vpop.xlane.xlu1 %1218 }
0x15d5   : > { %v1220_v59 = vmul.f32 0.0078125, %v1219_v38 }
0x15d7   : > { %v1221_v63 = vadd.f32 1e-05, %v1220_v59 }
0x15d9   : > { %2210 = vrsqrt.f32 %v1221_v63 }
0x15e3   : > { %v2211_v41 = vpop.eup %2210 }
0x15e4   : > { %v1223_v19 = vmul.f32 %v2211_v41, %v1216_v61  ;;  %v1810_v61 = vld [vmem:[%s2712_s15 + $0x28] sm:$0xff]  ;;  %v3148_v41 = vld [vmem:[#allocation9 + $0x8] sm:$0xff]  }
0x15e6   : > { %v1224_v20 = vmul.f32 %v2877_v31, %v1223_v19  ;;  %v3156_v19 = vld [vmem:[#allocation9 + $0x18] sm:$0xff]  }
0x15e8   : > { %v1225_v22 = vadd.f32 %v2885_v42, %v1224_v20  ;;  %v3160_v20 = vld [vmem:[#allocation9 + $0x20] sm:$0xff]  }
0x15ea   : > { %v1226_v23 = vadd.f32 %v1225_v22, %v1169_v21  ;;  %v3164_v21 = vld [vmem:[#allocation9 + $0x28] sm:$0xff]   ;;  %v3168_v22 = vld [vmem:[#allocation9 + $0x30] sm:$0xff]  }
0x15ec   : > { %v1808_v24 = vmul.f32 -1.442695, %v1226_v23  ;;  %v3172_v23 = vld [vmem:[#allocation9 + $0x38] sm:$0xff]  }
0x15ee   : > { %2212 = vpow2.f32 %v1808_v24 }
0x15f8   : > { %v2213_v29 = vpop.eup %2212 }
0x15f9   : > { %v1230_v0 = vadd.f32 1.0, %v2213_v29 }
0x15fb   : > { %2214 = vrcp.f32 %v1230_v0 }
0x1605   : > { %v2215_v28 = vpop.eup %2214 }
0x1606   : > { %v1233_v43 = vsub.f32 1.0, %v2215_v28  ;;  %v1235_v30 = vmul.f32 %v2215_v28, %v1171_v57 }
0x1608   : > { %v1234_v55 = vmul.f32 %v1233_v43, %v3038_v48  ;;  %v3103_v48 = vld [vmem:[#allocation8 + $0x24] ss:$8 sps:$4 sm:$0xff]  }
0x160a   : > { %v3087_v44 = vadd.f32 %v1235_v30, %v1234_v55 }
0x160c   : > { %1809 = vst [vmem:[%s2726_s13 + $0x20] sm:$0xff] %v3087_v44  ;;  %v1241_v46 = vpack.c.bf16 %v3087_v44, %v3087_v44 }
0x160e   : > { %1275 = vmatmul.mubr.bf16.vlgmr.msra.gmra.mrb[20].mxu0 %v1241_v46 }
0x160f   : > { %1376 = vmatpush1.bf16.msra.mxu0 %v3093_v47  ;;  %1407 = vmatprep.mubr.bf16.mxu0 %v2464_v3 }
0x1610   : > { %1377 = vmatprep.subr.bf16.mxu0 %v3097_v33 }
0x1613   : > { %1378 = vmatpush1.bf16.msra.mxu0 %v3100_v45 }
0x1614   : > { %1379 = vmatprep.subr.bf16.mxu0 %v3103_v48 }
0x1617   : > { %1380 = vmatpush1.bf16.msra.mxu0 %v3106_v50 }
0x1618   : > { %1381 = vmatprep.subr.bf16.mxu0 %v3109_v2 }
0x161b   : > { %1382 = vmatpush1.bf16.msra.mxu0 %v3112_v4 }
0x161c   : > { %1383 = vmatprep.subr.bf16.mxu0 %v3115_v5 }
0x161f   : > { %1384 = vmatpush1.bf16.msra.mxu0 %v3118_v6 }
0x1620   : > { %1385 = vmatprep.subr.bf16.mxu0 %v3121_v7 }
0x1623   : > { %1386 = vmatpush1.bf16.msra.mxu0 %v3124_v8 }
0x1624   : > { %1387 = vmatprep.subr.bf16.mxu0 %v3127_v9 }
0x1627   : > { %1388 = vmatpush1.bf16.msra.mxu0 %v3130_v10 }
0x1628   : > { %1389 = vmatprep.subr.bf16.mxu0 %v3133_v11 }
0x162b   : > { %1390 = vmatpush1.bf16.msra.mxu0 %v3136_v12 }
0x162c   : > { %1508 = vmatprep.subr.bf16.mxu0 %v2255_v13 }
0x16e1   : > { %v1276_v14 = vpop.f32.mrb[20].mxu0 }
0x16e2   : > { %v1278_v15 = vpop.f32.mrb[21].mxu0 }
0x16e3   : > { %v1280_v16 = vpop.f32.mrb[22].mxu0  ;;  %v1283_v17 = vadd.f32 %v1278_v15, %v1276_v14 }
0x16e4   : > { %v1281_v1 = vpop.f32.mrb[23].mxu0 }
0x16e5   : > { %1284 = vadd.xlane.f32.xlu0 %v1283_v17 }
0x1772   : > { %v1285_v62 = vpop.xlane.xlu0 %1284 }
0x1773   : > { %v1286_v53 = vmul.f32 0.00390625, %v1285_v62 }
0x1775   : > { %v1287_v54 = vsub.f32 %v1276_v14, %v1286_v53  ;;  %v1288_v56 = vsub.f32 %v1278_v15, %v1286_v53 }
0x1777   : > { %v1289_v18 = vmul.f32 %v1287_v54, %v1287_v54  ;;  %v1290_v57 = vmul.f32 %v1288_v56, %v1288_v56 }
0x1779   : > { %v1291_v58 = vadd.f32 %v1290_v57, %v1289_v18 }
0x177b   : > { %1292 = vadd.xlane.f32.xlu1 %v1291_v58 }
0x1808   : > { %v1293_v25 = vpop.xlane.xlu1 %1292 }
0x1809   : > { %v1294_v34 = vmul.f32 0.00390625, %v1293_v25 }
0x180b   : > { %v1295_v35 = vadd.f32 1e-05, %v1294_v34 }
0x180d   : > { %2216 = vrsqrt.f32 %v1295_v35 }
0x1817   : > { %v2217_v36 = vpop.eup %2216 }
0x1818   : > { %v1297_v37 = vmul.f32 %v2217_v36, %v1287_v54  ;;  %v1298_v16 = vmul.f32 %v2217_v36, %v1288_v56 }
0x181a   : > { %v1299_v60 = vmul.f32 %v1297_v37, %v2846_v49  ;;  %v1300_v1 = vmul.f32 %v1298_v16, %v2871_v27 }
0x181c   : > { %v1301_v51 = vadd.f32 %v1299_v60, %v2848_v52  ;;  %v1302_v54 = vadd.f32 %v1300_v1, %v2879_v32 }
0x181e   : > { %v1303_v38 = vadd.f32 %v1810_v61, %v1301_v51  ;;  %v1813_v61 = vld [vmem:[%s2712_s15 + $0x30] sm:$0xff] }
0x1820   : > { %v1304_v59 = vmax.f32 %v1303_v38, 0.0 }
0x1822   : > { %v1305_v63 = vpack.c.bf16 %v1304_v59, %v1304_v59 }
0x1824   : > { %2015 = vmatmul.mubr.bf16.vlgmr.msra.gmra.mrb[20].mxu1 %v1305_v63 }
0x1825   : > { %2019 = vmatpush3.bf16.msra.mxu1 %v3142_v39  ;;  %2034 = vmatprep.mubr.msk.bf16.mxu1 %vm2466_vm0, %v2465_v26 }
0x1826   : > { %2020 = vmatprep.subr.bf16.mxu1 %v2465_v26 }
0x1829   : > { %2021 = vmatpush3.bf16.msra.mxu1 %v3148_v41 }
0x182a   : > { %2022 = vmatprep.subr.bf16.mxu1 %v2465_v26 }
0x182d   : > { %2023 = vmatpush3.bf16.msra.mxu1 %v3152_v40 }
0x182e   : > { %2024 = vmatprep.subr.bf16.mxu1 %v2465_v26 }
0x1831   : > { %2025 = vmatpush3.bf16.msra.mxu1 %v3156_v19 }
0x1832   : > { %2026 = vmatprep.subr.bf16.mxu1 %v2465_v26 }
0x1835   : > { %2027 = vmatpush3.bf16.msra.mxu1 %v3160_v20 }
0x1836   : > { %2028 = vmatprep.subr.bf16.mxu1 %v2465_v26 }
0x1839   : > { %2029 = vmatpush3.bf16.msra.mxu1 %v3164_v21 }
0x183a   : > { %2030 = vmatprep.subr.bf16.mxu1 %v2465_v26 }
0x183d   : > { %2031 = vmatpush3.bf16.msra.mxu1 %v3168_v22 }
0x183e   : > { %2032 = vmatprep.subr.bf16.mxu1 %v2465_v26 }
0x1841   : > { %2033 = vmatpush3.bf16.msra.mxu1 %v3172_v23 }
0x1842   : > { %2038 = vmatprep.subr.bf16.mxu1 %v2465_v26 }
0x18f7   : > { %v1340_v24 = vpop.f32.mrb[20].mxu1 }
0x18f8   : > { %1346 = vadd.xlane.f32.xlu0 %v1340_v24  ;;  %v2016_v29 = vpop.f32.mrb[21].mxu1 }
0x18f9   : > { %v1343_v0 = vpop.f32.mrb[22].mxu1 }
0x18fa   : > { %v2017_v28 = vpop.f32.mrb[23].mxu1 }
0x1985   : > { %v1347_v43 = vpop.xlane.xlu0 %1346 }
0x1986   : > { %v1348_v55 = vmul.f32 0.0078125, %v1347_v43 }
0x1988   : > { %v1349_v30 = vsub.f32 %v1340_v24, %v1348_v55 }
0x198a   : > { %v1350_v46 = vmul.f32 %v1349_v30, %v1349_v30 }
0x198c   : > { %1351 = vadd.xlane.f32.xlu1 %v1350_v46 }
0x1a19   : > { %v1352_v13 = vpop.xlane.xlu1 %1351 }
0x1a1a   : > { %v1353_v14 = vmul.f32 0.0078125, %v1352_v13 }
0x1a1c   : > { %v1354_v15 = vadd.f32 1e-05, %v1353_v14  ;;  %v3234_v14 = vld [vmem:[%s3305_s7] ss:$0 sm:$0xff] }
0x1a1e   : > { %2218 = vrsqrt.f32 %v1354_v15 }
0x1a28   : > { %v2219_v17 = vpop.eup %2218 }
0x1a29   : > { %v1356_v62 = vmul.f32 %v2219_v17, %v1349_v30 }
0x1a2b   : > { %v1357_v53 = vmul.f32 %v2877_v31, %v1356_v62 }
0x1a2d   : > { %v1358_v18 = vadd.f32 %v2885_v42, %v1357_v53 }
0x1a2f   : > { %v1359_v57 = vadd.f32 %v1358_v18, %v1302_v54 }
0x1a31   : > { %v1811_v58 = vmul.f32 -1.442695, %v1359_v57 }
0x1a33   : > { %2220 = vpow2.f32 %v1811_v58 }
0x1a3d   : > { %v2221_v25 = vpop.eup %2220 }
0x1a3e   : > { %v1363_v34 = vadd.f32 1.0, %v2221_v25 }
0x1a40   : > { %2222 = vrcp.f32 %v1363_v34 }
0x1a4a   : > { %v2223_v35 = vpop.eup %2222 }
0x1a4b   : > { %v1366_v37 = vsub.f32 1.0, %v2223_v35  ;;  %v1368_v36 = vmul.f32 %v2223_v35, %v1304_v59 }
0x1a4d   : > { %v1367_v56 = vmul.f32 %v1366_v37, %v3087_v44 }
0x1a4f   : > { %v3181_v60 = vadd.f32 %v1368_v36, %v1367_v56 }
0x1a51   : > { %1812 = vst [vmem:[%s2726_s13 + $0x28] sm:$0xff] %v3181_v60  ;;  %v1374_v31 = vpack.c.bf16 %v3181_v60, %v3181_v60 }
0x1a53   : > { %1408 = vmatmul.mubr.bf16.vlgmr.msra.gmra.mrb[24].mxu0 %v1374_v31 }
0x1a54   : > { %1509 = vmatpush1.bf16.msra.mxu0 %v3093_v47  ;;  %1540 = vmatprep.mubr.bf16.mxu0 %v2464_v3 }
0x1a55   : > { %1510 = vmatprep.subr.bf16.mxu0 %v3097_v33 }
0x1a58   : > { %1511 = vmatpush1.bf16.msra.mxu0 %v3100_v45 }
0x1a59   : > { %1512 = vmatprep.subr.bf16.mxu0 %v3103_v48 }
0x1a5c   : > { %1513 = vmatpush1.bf16.msra.mxu0 %v3106_v50 }
0x1a5d   : > { %1514 = vmatprep.subr.bf16.mxu0 %v3109_v2 }
0x1a60   : > { %1515 = vmatpush1.bf16.msra.mxu0 %v3112_v4 }
0x1a61   : > { %1516 = vmatprep.subr.bf16.mxu0 %v3115_v5 }
0x1a64   : > { %1517 = vmatpush1.bf16.msra.mxu0 %v3118_v6 }
0x1a65   : > { %1518 = vmatprep.subr.bf16.mxu0 %v3121_v7 }
0x1a68   : > { %1519 = vmatpush1.bf16.msra.mxu0 %v3124_v8 }
0x1a69   : > { %1520 = vmatprep.subr.bf16.mxu0 %v3127_v9 }
0x1a6c   : > { %1521 = vmatpush1.bf16.msra.mxu0 %v3130_v10 }
0x1a6d   : > { %1522 = vmatprep.subr.bf16.mxu0 %v3133_v11 }
0x1a70   : > { %1523 = vmatpush1.bf16.msra.mxu0 %v3136_v12 }
0x1b26   : > { %v1409_v3 = vpop.f32.mrb[24].mxu0 }
0x1b27   : > { %v1411_v42 = vpop.f32.mrb[25].mxu0 }
0x1b28   : > { %v1413_v44 = vpop.f32.mrb[26].mxu0  ;;  %v1416_v47 = vadd.f32 %v1411_v42, %v1409_v3 }
0x1b29   : > { %v1414_v33 = vpop.f32.mrb[27].mxu0 }
0x1b2a   : > { %1417 = vadd.xlane.f32.xlu0 %v1416_v47 }
0x1bb7   : > { %v1418_v45 = vpop.xlane.xlu0 %1417 }
0x1bb8   : > { %v1419_v48 = vmul.f32 0.00390625, %v1418_v45 }
0x1bba   : > { %v1420_v50 = vsub.f32 %v1409_v3, %v1419_v48  ;;  %v1421_v2 = vsub.f32 %v1411_v42, %v1419_v48 }
0x1bbc   : > { %v1422_v4 = vmul.f32 %v1420_v50, %v1420_v50  ;;  %v1423_v5 = vmul.f32 %v1421_v2, %v1421_v2 }
0x1bbe   : > { %v1424_v6 = vadd.f32 %v1423_v5, %v1422_v4 }
0x1bc0   : > { %1425 = vadd.xlane.f32.xlu1 %v1424_v6  ;;  %v1816_v6 = vld [vmem:[%s2712_s15 + $0x38] sm:$0xff]  ;;  %s1825_s15 = sshll.u32 %s2536_s9, 10  ;;  %s2467_s9 = smov [#allocation11]  }
0x1bc1   : > { %s3251_s25 = scalar_lea.hbm %s3306_s8, %s1825_s15  ;;  %s2384_s17 = sshll.u32 %s2467_s9, 4  ;;  %s2385_s17 = int_to_ptr.vmem [resolvable:$false] %s2384_s17 }
0x1bc2   : > { %s2386_s19 = scalar_lea.vmem %s2385_s17, 2048  ;;  %p2387_p7 = scmp.lt.s32.totalorder %s3253_s21, %s2385_s17 }
0x1bc3   : > { %p2388_p11 = scmp.lt.s32.totalorder %s2386_s19, %s2380_s20 }
0x1bc5   : > { %p2389_p0 = por %p2388_p11, %p2387_p7 }
0x1bc7   : > { %p2390_p13 = pnand %p2389_p0, %p2383_p3 }
0x1c4d   : > { %v1426_v7 = vpop.xlane.xlu1 %1425 }
0x1c4e   : > { %v1427_v8 = vmul.f32 0.00390625, %v1426_v7 }
0x1c50   : > { %v1428_v9 = vadd.f32 1e-05, %v1427_v8 }
0x1c52   : > { %2224 = vrsqrt.f32 %v1428_v9 }
0x1c5c   : > { %v2225_v10 = vpop.eup %2224 }
0x1c5d   : > { %v1430_v11 = vmul.f32 %v2225_v10, %v1420_v50  ;;  %v1431_v55 = vmul.f32 %v2225_v10, %v1421_v2 }
0x1c5f   : > { %v1432_v12 = vmul.f32 %v1430_v11, %v2846_v49 }
0x1c61   : > { %v1434_v51 = vadd.f32 %v1432_v12, %v2848_v52 }
0x1c63   : > { %v1436_v38 = vadd.f32 %v1813_v61, %v1434_v51 }
0x1c65   : > { %v1437_v59 = vmax.f32 %v1436_v38, 0.0 }
0x1c67   : > { %v1438_v63 = vpack.c.bf16 %v1437_v59, %v1437_v59 }
0x1c69   : > { %2035 = vmatmul.mubr.bf16.vlgmr.msra.gmra.mrb[24].mxu1 %v1438_v63 }
0x1c6a   : > { %2039 = vmatpush3.bf16.msra.mxu1 %v3142_v39  ;;  %2054 = vmatprep.mubr.msk.bf16.mxu1 %vm2466_vm0, %v2465_v26 }
0x1c6b   : > { %2040 = vmatprep.subr.bf16.mxu1 %v2465_v26 }
0x1c6e   : > { %2041 = vmatpush3.bf16.msra.mxu1 %v3148_v41 }
0x1c6f   : > { %2042 = vmatprep.subr.bf16.mxu1 %v2465_v26 }
0x1c72   : > { %2043 = vmatpush3.bf16.msra.mxu1 %v3152_v40 }
0x1c73   : > { %2044 = vmatprep.subr.bf16.mxu1 %v2465_v26 }
0x1c76   : > { %2045 = vmatpush3.bf16.msra.mxu1 %v3156_v19 }
0x1c77   : > { %2046 = vmatprep.subr.bf16.mxu1 %v2465_v26 }
0x1c7a   : > { %2047 = vmatpush3.bf16.msra.mxu1 %v3160_v20 }
0x1c7b   : > { %2048 = vmatprep.subr.bf16.mxu1 %v2465_v26 }
0x1c7e   : > { %2049 = vmatpush3.bf16.msra.mxu1 %v3164_v21 }
0x1c7f   : > { %2050 = vmatprep.subr.bf16.mxu1 %v2465_v26 }
0x1c82   : > { %2051 = vmatpush3.bf16.msra.mxu1 %v3168_v22 }
0x1c83   : > { %2052 = vmatprep.subr.bf16.mxu1 %v2465_v26  ;;  %v1433_v26 = vmul.f32 %v1431_v55, %v2871_v27 }
0x1c85   : > { %v1435_v13 = vadd.f32 %v1433_v26, %v2879_v32 }
0x1c86   : > { %2053 = vmatpush3.bf16.msra.mxu1 %v3172_v23  ;;  %v3227_v23 = vld [vmem:[%s3304_s6] ss:$0 sm:$0xff] }
0x1d3c   : > { %v1473_v39 = vpop.f32.mrb[24].mxu1 }
0x1d3d   : > { %1479 = vadd.xlane.f32.xlu0 %v1473_v39  ;;  %v2036_v41 = vpop.f32.mrb[25].mxu1 }
0x1d3e   : > { %v1476_v40 = vpop.f32.mrb[26].mxu1 }
0x1d3f   : > { %v2037_v19 = vpop.f32.mrb[27].mxu1 }
0x1dca   : > { %v1480_v24 = vpop.xlane.xlu0 %1479 }
0x1dcb   : > { %v1481_v29 = vmul.f32 0.0078125, %v1480_v24 }
0x1dcd   : > { %v1482_v20 = vsub.f32 %v1473_v39, %v1481_v29 }
0x1dcf   : > { %v1483_v0 = vmul.f32 %v1482_v20, %v1482_v20 }
0x1dd1   : > { %1484 = vadd.xlane.f32.xlu1 %v1483_v0 }
0x1e5e   : > { %v1485_v28 = vpop.xlane.xlu1 %1484 }
0x1e5f   : > { %v1486_v21 = vmul.f32 0.0078125, %v1485_v28 }
0x1e61   : > { %v1487_v43 = vadd.f32 1e-05, %v1486_v21 }
0x1e63   : > { %2226 = vrsqrt.f32 %v1487_v43 }
0x1e6d   : > { %v2227_v22 = vpop.eup %2226 }
0x1e6e   : > { %v1489_v30 = vmul.f32 %v2227_v22, %v1482_v20 }
0x1e70   : > { %v1490_v46 = vmul.f32 %v3227_v23, %v1489_v30 }
0x1e72   : > { %v1491_v15 = vadd.f32 %v3234_v14, %v1490_v46 }
0x1e74   : > { %v1492_v16 = vadd.f32 %v1491_v15, %v1435_v13 }
0x1e76   : > { %v1814_v17 = vmul.f32 -1.442695, %v1492_v16 }
0x1e78   : > { %2228 = vpow2.f32 %v1814_v17 }
0x1e82   : > { %v2229_v1 = vpop.eup %2228 }
0x1e83   : > { %v1496_v62 = vadd.f32 1.0, %v2229_v1 }
0x1e85   : > { %2230 = vrcp.f32 %v1496_v62 }
0x1e8f   : > { %v2231_v53 = vpop.eup %2230 }
0x1e90   : > { %v1499_v54 = vsub.f32 1.0, %v2231_v53  ;;  %v1501_v57 = vmul.f32 %v2231_v53, %v1437_v59 }
0x1e92   : > { %v1500_v18 = vmul.f32 %v1499_v54, %v3181_v60 }
0x1e94   : > { %v1502_v58 = vadd.f32 %v1501_v57, %v1500_v18 }
0x1e96   : > { %1815 = vst [vmem:[%s2726_s13 + $0x30] sm:$0xff] %v1502_v58  ;;  %v1507_v25 = vpack.c.bf16 %v1502_v58, %v1502_v58 }
0x1e98   : > { %1541 = vmatmul.mubr.bf16.vlgmr.msra.gmra.mrb[28].mxu0 %v1507_v25 }
0x1f6b   : > { %v1542_v34 = vpop.f32.mrb[28].mxu0 }
0x1f6c   : > { %v1544_v35 = vpop.f32.mrb[29].mxu0 }
0x1f6d   : > { %v1546_v37 = vpop.f32.mrb[30].mxu0  ;;  %v1549_v56 = vadd.f32 %v1544_v35, %v1542_v34 }
0x1f6e   : > { %v1547_v36 = vpop.f32.mrb[31].mxu0 }
0x1f6f   : > { %1550 = vadd.xlane.f32.xlu0 %v1549_v56 }
0x1ffc   : > { %v1551_v31 = vpop.xlane.xlu0 %1550 }
0x1ffd   : > { %v1552_v3 = vmul.f32 0.00390625, %v1551_v31 }
0x1fff   : > { %v1553_v42 = vsub.f32 %v1542_v34, %v1552_v3  ;;  %v1554_v44 = vsub.f32 %v1544_v35, %v1552_v3 }
0x2001   : > { %v1555_v47 = vmul.f32 %v1553_v42, %v1553_v42  ;;  %v1556_v33 = vmul.f32 %v1554_v44, %v1554_v44 }
0x2003   : > { %v1557_v45 = vadd.f32 %v1556_v33, %v1555_v47 }
0x2005   : > { %1558 = vadd.xlane.f32.xlu1 %v1557_v45 }
0x2092   : > { %v1559_v60 = vpop.xlane.xlu1 %1558 }
0x2093   : > { %v1560_v48 = vmul.f32 0.00390625, %v1559_v60 }
0x2095   : > { %v1561_v50 = vadd.f32 1e-05, %v1560_v48 }
0x2097   : > { %2232 = vrsqrt.f32 %v1561_v50 }
0x20a1   : > { %v2233_v2 = vpop.eup %2232 }
0x20a2   : > { %v1563_v4 = vmul.f32 %v2233_v2, %v1553_v42 }
0x20a4   : > { %v1565_v5 = vmul.f32 %v1563_v4, %v2846_v49 }
0x20a6   : > { %v1567_v7 = vadd.f32 %v1565_v5, %v2848_v52  ;;  %v1564_v52 = vmul.f32 %v2233_v2, %v1554_v44 }
0x20a8   : > { %v1569_v8 = vadd.f32 %v1816_v6, %v1567_v7  ;;  %v1566_v24 = vmul.f32 %v1564_v52, %v2871_v27 }
0x20aa   : > { %v1570_v9 = vmax.f32 %v1569_v8, 0.0  ;;  %v1568_v0 = vadd.f32 %v1566_v24, %v2879_v32 }
0x20ac   : > { %v1571_v10 = vpack.c.bf16 %v1570_v9, %v1570_v9 }
0x20ae   : > { %2055 = vmatmul.mubr.bf16.vlgmr.msra.gmra.mrb[28].mxu1 %v1571_v10 }
0x2181   : > { %v1606_v11 = vpop.f32.mrb[28].mxu1 }
0x2182   : > { %1612 = vadd.xlane.f32.xlu0 %v1606_v11  ;;  %v2056_v12 = vpop.f32.mrb[29].mxu1 }
0x2183   : > { %v1609_v61 = vpop.f32.mrb[30].mxu1 }
0x2184   : > { %v2057_v51 = vpop.f32.mrb[31].mxu1 }
0x220f   : > { %v1613_v38 = vpop.xlane.xlu0 %1612 }
0x2210   : > { %v1614_v59 = vmul.f32 0.0078125, %v1613_v38 }
0x2212   : > { %v1615_v63 = vsub.f32 %v1606_v11, %v1614_v59 }
0x2214   : > { %v1616_v39 = vmul.f32 %v1615_v63, %v1615_v63 }
0x2216   : > { %1617 = vadd.xlane.f32.xlu1 %v1616_v39 }
0x22a3   : > { %v1618_v41 = vpop.xlane.xlu1 %1617 }
0x22a4   : > { %v1619_v40 = vmul.f32 0.0078125, %v1618_v41 }
0x22a6   : > { %v1620_v49 = vadd.f32 1e-05, %v1619_v40 }
0x22a8   : > { %2234 = vrsqrt.f32 %v1620_v49 }
0x22b2   : > { %v2235_v19 = vpop.eup %2234 }
0x22b3   : > { %v1622_v29 = vmul.f32 %v2235_v19, %v1615_v63 }
0x22b5   : > { %v1623_v20 = vmul.f32 %v3227_v23, %v1622_v29 }
0x22b7   : > { %v1624_v28 = vadd.f32 %v3234_v14, %v1623_v20 }
0x22b9   : > { %v1625_v21 = vadd.f32 %v1624_v28, %v1568_v0 }
0x22bb   : > { %v1817_v43 = vmul.f32 -1.442695, %v1625_v21 }
0x22bd   : > { %2236 = vpow2.f32 %v1817_v43 }
0x22c7   : > { %v2237_v55 = vpop.eup %2236 }
0x22c8   : > { %v1629_v22 = vadd.f32 1.0, %v2237_v55 }
0x22ca   : > { %2238 = vrcp.f32 %v1629_v22 }
0x22d4   : > { %v2239_v26 = vpop.eup %2238 }
0x22d5   : > { %v1632_v30 = vsub.f32 1.0, %v2239_v26  ;;  %v1634_v46 = vmul.f32 %v2239_v26, %v1570_v9 }
0x22d7   : > { %v1633_v27 = vmul.f32 %v1632_v30, %v1502_v58 }
0x22d9   : > { %v1635_v32 = vadd.f32 %v1634_v46, %v1633_v27 }
0x22db   : > { %1818 = vst [vmem:[%s2726_s13 + $0x38] sm:$0xff] %v1635_v32  ;;  %1638 = vst [vmem:[#allocation2] sm:$0xff] %v1635_v32 }
0x22dc   : > { %2393 = shalt.err (!%p2390_p13)
}
0x22dd   : > { %s2394_s13 = scalar_lea.hbm %s3251_s25, 1024  ;;  %s2398_s11 = scalar_lea.hbm %s3306_s8, 2048 }
0x22de   : > { %p2395_p5 = scmp.ne.s32.totalorder %s3251_s25, %s2394_s13  ;;  %p2399_p10 = scmp.lt.u32.totalorder %s3251_s25, %s3306_s8 }
0x22df   : > { %p2400_p2 = scmp.lt.u32.totalorder %s2398_s11, %s2394_s13  ;;  %p2402_p4 = scmp.lt.u32.totalorder %s2394_s13, %s3251_s25 }
0x22e0   : > { %p2396_p12 = pnand %p2395_p5, %p2657_p6 }
0x22e1   : > { %p2401_p1 = por %p2400_p2, %p2399_p10 }
0x22e2   : > { %p2397_p8 = pneg %p2396_p12 }
0x22e3   : > { %p2403_p9 = por %p2402_p4, %p2401_p1 }
0x22e5   : > { %p2404_p3 = pnand %p2403_p9, %p2397_p8 }
0x22e7   : > { %2407 = shalt.err (!%p2404_p3)
}
0x22e8   : > { %s2468_s23 = smov 128   ;;  %s2469_s20 = smov 8  }
0x22e9   : > { %2072 = dma.vmem_to_hbm [thread:$0]  (%p2657_p6), %s3253_s21, 1024, %s3251_s25, %s1640_s10, %s2468_s23, %s2468_s23, %s2469_s20  }
0x22ea PF: > { %s1668_s9 = sand.u32 1, %s2442_s27   ;;  %p3329_p7 = scmp.ne.s32.totalorder %s3313_s12, 0 }
0x22eb   : > { %p3330_p11 = scmp.ge.s32.totalorder %s2454_s30, 2  ;;  %s1669_s17 = scalar_lea.sflag [#allocation5], %s1668_s9 }
0x22ed   : > { %p2089_p0 = pnand %p3330_p11, %p3329_p7 }
0x22ef   : > { %2437 = dma.done.wait (!%p2089_p0), %s1669_s17, 1024  }
0x22f0   : > { %2439 = vsyncadd (!%p2089_p0), %s1669_s17, 4294966272  ;;  %p23_p13 = scmp.ge.s32.totalorder %s2643_s24, 4   ;;  %s3331_s27 = smov %s2446_s28 }
0x22f1   : > { %s3332_s28 = smov %s2450_s29  ;;  %s3333_s29 = smov %s2653_s14 }
0x22f2   : > { %s3334_s30 = smov %s2643_s24  ;;  %25 = sbr.rel (!%p23_p13) target bundleno = 9 (0x9), region = 127 }
0x22f9   :  { %1674 = vsyncpa [#allocation4], 1 }
0x22fa   :  { %1676 = vsyncpa [#allocation4 + $0x1], 1 }
0x22fb   :  { %1677 = vsyncpa [#allocation7], 1 }
0x22fc   :  { %1678 = vsyncpa [#allocation10], 1 }
0x22fd   :  { %1679 = vsyncpa [#allocation5], 1 }
0x22fe   :  { %1681 = vsyncpa [#allocation5 + $0x1], 1 }

</bundles_post_ra>
